<compile_context>
chip_gen: v5e
topology: v5e:2x2
jax: 0.10.0
libtpu: 0.0.40
codegen_flags: <defaults>
</compile_context>

<pallas_src>
import jax
import jax.numpy as jnp
from jax import lax
from jax.experimental import pallas as pl
from jax.experimental.pallas import tpu as pltpu


def _full_spec(shape):
    nd = len(shape)
    return pl.BlockSpec(shape, lambda i, _nd=nd: (0,) * _nd)


# ------------------------------ fused kernel --------------------------------
def _down_kernel(x_ref, w1_ref, b1_ref, g1_ref, bt1_ref,
                 w2_ref, b2_ref, g2_ref, bt2_ref,
                 o_ref, xp1_ref, xp2_ref):
    # x_ref  : (N, Ho, 2, Wo, 2*Cin) f32   pre-pool input, H/W split 2x2
    # w1_ref : (9*Cin, C2) bf16            conv1 weights, im2col layout
    # w2_ref : (9*C2,  C2) bf16            conv2 weights, im2col layout
    # b*/g*/bt*: (1, C2) f32               conv bias, BN gamma, BN beta
    # o_ref  : (N*Ho*Wo, C2) f32
    # xp1_ref: (N, Ho+2, Wo+2, Cin) f32    VMEM scratch: zero-padded pool out
    # xp2_ref: (N, Ho+2, Wo+2, C2)  f32    VMEM scratch: zero-padded stage-1 out
    N, Hp, Wp, Cin = xp1_ref.shape
    Ho, Wo = Hp - 2, Wp - 2
    C2 = o_ref.shape[-1]
    rows = N * Ho * Wo
    inv_rows = 1.0 / rows

    # ---- fused 2x2 max-pool (VPU) ------------------------------------------
    xv = x_ref[...]
    xe = xv[:, :, 0, :, :]                       # even rows: (N, Ho, Wo, 2*Cin)
    xo = xv[:, :, 1, :, :]                       # odd rows
    pooled = jnp.maximum(
        jnp.maximum(xe[..., :Cin], xe[..., Cin:]),
        jnp.maximum(xo[..., :Cin], xo[..., Cin:]))          # (N, Ho, Wo, Cin)

    # ---- in-kernel zero padding (conv halo) into VMEM scratch ---------------
    xp1_ref[...] = jnp.zeros(xp1_ref.shape, xp1_ref.dtype)
    xp1_ref[:, 1:Ho + 1, 1:Wo + 1, :] = pooled

    def conv_bn_relu(xp_ref, cin, w_ref, b_ref, g_ref, bt_ref):
        # im2col: concat the 9 shifted windows along the lane axis and run a
        # single (rows, 9*cin) x (9*cin, C2) MXU matmul (bf16 in, f32 acc).
        parts = [xp_ref[:, kh:kh + Ho, kw:kw + Wo, :]
                 for kh in range(3) for kw in range(3)]
        patches = jnp.concatenate(parts, axis=-1)            # (N, Ho, Wo, 9*cin)
        p2d = patches.reshape(rows, 9 * cin).astype(jnp.bfloat16)
        acc = jnp.dot(p2d, w_ref[...],
                      preferred_element_type=jnp.float32)    # (rows, C2) f32
        acc = acc + b_ref[...]

        # BatchNorm2d training-mode forward: one-pass batch statistics over
        # (N, H, W), biased variance, all in f32.
        mean = jnp.sum(acc, axis=0, keepdims=True) * inv_rows
        ex2 = jnp.sum(acc * acc, axis=0, keepdims=True) * inv_rows
        var = ex2 - mean * mean
        y = (acc - mean) * lax.rsqrt(var + 1e-5)
        y = y * g_ref[...] + bt_ref[...]
        return jnp.maximum(y, 0.0)                           # (rows, C2) f32

    h1 = conv_bn_relu(xp1_ref, Cin, w1_ref, b1_ref, g1_ref, bt1_ref)

    xp2_ref[...] = jnp.zeros(xp2_ref.shape, xp2_ref.dtype)
    xp2_ref[:, 1:Ho + 1, 1:Wo + 1, :] = h1.reshape(N, Ho, Wo, C2)

    o_ref[...] = conv_bn_relu(xp2_ref, C2, w2_ref, b2_ref, g2_ref, bt2_ref)


# ------------------------------ wrapper --------------------------------------
def down_forward(x_nchw, params):
    x = jnp.transpose(x_nchw, (0, 2, 3, 1)).astype(jnp.float32)   # NCHW -> NHWC
    N, H, W, Cin = x.shape
    assert H % 2 == 0 and W % 2 == 0, "MaxPool2d(2) path assumes even H, W"
    Ho, Wo = H // 2, W // 2
    C2 = params["w1"].shape[-1]
    rows = N * Ho * Wo

    # Free row-major split reshape: (N,H,W,Cin) -> (N,Ho,2,Wo,2*Cin); the 2x2
    # pooling windows are then selected inside the kernel (no HBM gather).
    xr = x.reshape(N, Ho, 2, Wo, 2 * Cin)

    # Conv weights in im2col layout (9*Cin, C2), bf16 for the MXU.
    w1 = params["w1"].reshape(9 * Cin, C2).astype(jnp.bfloat16)
    w2 = params["w2"].reshape(9 * C2, C2).astype(jnp.bfloat16)
    b1 = params["b1"].reshape(1, C2).astype(jnp.float32)
    b2 = params["b2"].reshape(1, C2).astype(jnp.float32)
    g1 = params["g1"].reshape(1, C2).astype(jnp.float32)
    g2 = params["g2"].reshape(1, C2).astype(jnp.float32)
    bt1 = params["bt1"].reshape(1, C2).astype(jnp.float32)
    bt2 = params["bt2"].reshape(1, C2).astype(jnp.float32)

    out2d = pl.pallas_call(
        _down_kernel,
        out_shape=jax.ShapeDtypeStruct((rows, C2), jnp.float32),
        grid=(1,),
        in_specs=[_full_spec(xr.shape),
                  _full_spec(w1.shape), _full_spec(b1.shape),
                  _full_spec(g1.shape), _full_spec(bt1.shape),
                  _full_spec(w2.shape), _full_spec(b2.shape),
                  _full_spec(g2.shape), _full_spec(bt2.shape)],
        out_specs=_full_spec((rows, C2)),
        scratch_shapes=[pltpu.VMEM((N, Ho + 2, Wo + 2, Cin), jnp.float32),
                        pltpu.VMEM((N, Ho + 2, Wo + 2, C2), jnp.float32)],
        compiler_params=pltpu.CompilerParams(
            dimension_semantics=("arbitrary",),
            vmem_limit_bytes=32 * 1024 * 1024),
    )(xr, w1, b1, g1, bt1, w2, b2, g2, bt2)

    out = out2d.reshape(N, Ho, Wo, C2)
    return jnp.transpose(out, (0, 3, 1, 2))                       # NHWC -> NCHW


# --------------------------- params / reference ------------------------------
def init_params(key, in_channels, out_channels):
    k1, k2, k3, k4 = jax.random.split(key, 4)
    # PyTorch conv weight is OIHW; store as HWIO for the NHWC kernel.
    w1 = 0.1 * jax.random.normal(k1, (out_channels, in_channels, 3, 3), jnp.float32)
    w2 = 0.1 * jax.random.normal(k2, (out_channels, out_channels, 3, 3), jnp.float32)
    b1 = 0.1 * jax.random.normal(k3, (out_channels,), jnp.float32)
    b2 = 0.1 * jax.random.normal(k4, (out_channels,), jnp.float32)
    ones = jnp.ones((out_channels,), jnp.float32)
    zeros = jnp.zeros((out_channels,), jnp.float32)
    return {
        "w1": jnp.transpose(w1, (2, 3, 1, 0)), "b1": b1, "g1": ones, "bt1": zeros,
        "w2": jnp.transpose(w2, (2, 3, 1, 0)), "b2": b2, "g2": ones, "bt2": zeros,
    }
    # TODO(synk): running_mean/running_var buffer updates (train-mode side
    # effect) are not replicated; they do not affect the forward output.


def ref_forward(x_nchw, params):
    x = jnp.transpose(x_nchw, (0, 2, 3, 1)).astype(jnp.float32)
    N, H, W, C = x.shape
    p = x.reshape(N, H // 2, 2, W // 2, 2, C).max(axis=(2, 4))

    def block(h, w, b, g, bt):
        y = lax.conv_general_dilated(
            h, w, window_strides=(1, 1), padding="SAME",
            dimension_numbers=("NHWC", "HWIO", "NHWC")) + b
        mean = y.mean(axis=(0, 1, 2))
        var = ((y - mean) ** 2).mean(axis=(0, 1, 2))
        yh = (y - mean) * lax.rsqrt(var + 1e-5)
        return jnp.maximum(yh * g + bt, 0.0)

    h1 = block(p, params["w1"], params["b1"], params["g1"], params["bt1"])
    h2 = block(h1, params["w2"], params["b2"], params["g2"], params["bt2"])
    return jnp.transpose(h2, (0, 3, 1, 2))


# ------------------------------------ main -----------------------------------
if __name__ == "__main__":
    key = jax.random.PRNGKey(0)
    kx, kp = jax.random.split(key)

    N, Cin, H, W, Cout = 2, 4, 16, 16, 8
    x = jax.random.normal(kx, (N, Cin, H, W), jnp.float32)
    params = init_params(kp, Cin, Cout)

    out = jax.jit(down_forward)(x, params)
    out = jax.block_until_ready(out)

    assert out.shape == (N, Cout, H // 2, W // 2), out.shape
    assert bool(jnp.all(jnp.isfinite(out)))

    # Reference is full-f32; the kernel uses bf16 MXU operands with f32
    # accumulation / BN stats, so allow a slightly looser tolerance.
    ref = ref_forward(x, params)
    assert bool(jnp.allclose(out, ref, atol=1e-1, rtol=1e-1)), \
        float(jnp.max(jnp.abs(out - ref)))

    print("KERNEL_OK")
</pallas_src>

<mosaic_0001>
module attributes {stable_mosaic.version = 11 : i64} {
  func.func @_down_kernel(%arg0: i32, %arg1: memref<2x8x2x8x8xf32, #tpu.memory_space<vmem>>, %arg2: memref<36x8xbf16, #tpu.memory_space<vmem>>, %arg3: memref<1x8xf32, #tpu.memory_space<vmem>>, %arg4: memref<1x8xf32, #tpu.memory_space<vmem>>, %arg5: memref<1x8xf32, #tpu.memory_space<vmem>>, %arg6: memref<72x8xbf16, #tpu.memory_space<vmem>>, %arg7: memref<1x8xf32, #tpu.memory_space<vmem>>, %arg8: memref<1x8xf32, #tpu.memory_space<vmem>>, %arg9: memref<1x8xf32, #tpu.memory_space<vmem>>, %arg10: memref<128x8xf32, #tpu.memory_space<vmem>>, %arg11: memref<2x10x10x4xf32, #tpu.memory_space<vmem>>, %arg12: memref<2x10x10x8xf32, #tpu.memory_space<vmem>>) attributes {dimension_semantics = [#tpu.dimension_semantics<arbitrary>], iteration_bounds = array<i64: 1>, scalar_prefetch = 0 : i64, scratch_operands = 2 : i64, tpu.core_type = #tpu.core_type<tc>, window_params = [{pipeline_mode = #tpu.pipeline_mode<synchronous>, transform_indices = @transform_0, window_bounds = array<i64: 2, 8, 2, 8, 8>}, {pipeline_mode = #tpu.pipeline_mode<synchronous>, transform_indices = @transform_1, window_bounds = array<i64: 36, 8>}, {pipeline_mode = #tpu.pipeline_mode<synchronous>, transform_indices = @transform_2, window_bounds = array<i64: 1, 8>}, {pipeline_mode = #tpu.pipeline_mode<synchronous>, transform_indices = @transform_3, window_bounds = array<i64: 1, 8>}, {pipeline_mode = #tpu.pipeline_mode<synchronous>, transform_indices = @transform_4, window_bounds = array<i64: 1, 8>}, {pipeline_mode = #tpu.pipeline_mode<synchronous>, transform_indices = @transform_5, window_bounds = array<i64: 72, 8>}, {pipeline_mode = #tpu.pipeline_mode<synchronous>, transform_indices = @transform_6, window_bounds = array<i64: 1, 8>}, {pipeline_mode = #tpu.pipeline_mode<synchronous>, transform_indices = @transform_7, window_bounds = array<i64: 1, 8>}, {pipeline_mode = #tpu.pipeline_mode<synchronous>, transform_indices = @transform_8, window_bounds = array<i64: 1, 8>}, {pipeline_mode = #tpu.pipeline_mode<synchronous>, transform_indices = @transform_9, window_bounds = array<i64: 128, 8>}]} {
    %c0 = arith.constant 0 : index
    %c0_0 = arith.constant 0 : index
    %c0_1 = arith.constant 0 : index
    %c0_2 = arith.constant 0 : index
    %c0_3 = arith.constant 0 : index
    %0 = vector.load %arg1[%c0, %c0_0, %c0_1, %c0_2, %c0_3] : memref<2x8x2x8x8xf32, #tpu.memory_space<vmem>>, vector<2x8x2x8x8xf32>
    %1 = vector.extract_strided_slice %0 {offsets = [0, 0, 0, 0, 0], sizes = [2, 8, 1, 8, 8], strides = [1, 1, 1, 1, 1]} : vector<2x8x2x8x8xf32> to vector<2x8x1x8x8xf32>
    %2 = vector.shape_cast %1 : vector<2x8x1x8x8xf32> to vector<2x8x8x8xf32>
    %3 = vector.extract_strided_slice %0 {offsets = [0, 0, 1, 0, 0], sizes = [2, 8, 1, 8, 8], strides = [1, 1, 1, 1, 1]} : vector<2x8x2x8x8xf32> to vector<2x8x1x8x8xf32>
    %4 = vector.shape_cast %3 : vector<2x8x1x8x8xf32> to vector<2x8x8x8xf32>
    %5 = vector.extract_strided_slice %2 {offsets = [0, 0, 0, 0], sizes = [2, 8, 8, 4], strides = [1, 1, 1, 1]} : vector<2x8x8x8xf32> to vector<2x8x8x4xf32>
    %6 = vector.extract_strided_slice %2 {offsets = [0, 0, 0, 4], sizes = [2, 8, 8, 4], strides = [1, 1, 1, 1]} : vector<2x8x8x8xf32> to vector<2x8x8x4xf32>
    %7 = arith.maximumf %5, %6 : vector<2x8x8x4xf32>
    %8 = vector.extract_strided_slice %4 {offsets = [0, 0, 0, 0], sizes = [2, 8, 8, 4], strides = [1, 1, 1, 1]} : vector<2x8x8x8xf32> to vector<2x8x8x4xf32>
    %9 = vector.extract_strided_slice %4 {offsets = [0, 0, 0, 4], sizes = [2, 8, 8, 4], strides = [1, 1, 1, 1]} : vector<2x8x8x8xf32> to vector<2x8x8x4xf32>
    %10 = arith.maximumf %8, %9 : vector<2x8x8x4xf32>
    %11 = arith.maximumf %7, %10 : vector<2x8x8x4xf32>
    %cst = arith.constant 0.000000e+00 : f32
    %12 = vector.broadcast %cst : f32 to vector<2x10x10x4xf32>
    %c0_4 = arith.constant 0 : index
    %c0_5 = arith.constant 0 : index
    %c0_6 = arith.constant 0 : index
    %c0_7 = arith.constant 0 : index
    %13 = vector.load %arg11[%c0_4, %c0_5, %c0_6, %c0_7] : memref<2x10x10x4xf32, #tpu.memory_space<vmem>>, vector<2x10x10x4xf32>
    tpu.vector_store %arg11[%c0_4, %c0_5, %c0_6, %c0_7], %12 {strides = array<i32>} : memref<2x10x10x4xf32, #tpu.memory_space<vmem>>, vector<2x10x10x4xf32>,
    %c0_8 = arith.constant 0 : index
    %c1 = arith.constant 1 : index
    %c1_9 = arith.constant 1 : index
    %c0_10 = arith.constant 0 : index
    %14 = vector.load %arg11[%c0_8, %c1, %c1_9, %c0_10] : memref<2x10x10x4xf32, #tpu.memory_space<vmem>>, vector<2x8x8x4xf32>
    tpu.vector_store %arg11[%c0_8, %c1, %c1_9, %c0_10], %11 {strides = array<i32>} : memref<2x10x10x4xf32, #tpu.memory_space<vmem>>, vector<2x8x8x4xf32>,
    %c0_11 = arith.constant 0 : index
    %c0_12 = arith.constant 0 : index
    %c0_13 = arith.constant 0 : index
    %c0_14 = arith.constant 0 : index
    %15 = vector.load %arg11[%c0_11, %c0_12, %c0_13, %c0_14] : memref<2x10x10x4xf32, #tpu.memory_space<vmem>>, vector<2x8x8x4xf32>
    %c0_15 = arith.constant 0 : index
    %c0_16 = arith.constant 0 : index
    %c1_17 = arith.constant 1 : index
    %c0_18 = arith.constant 0 : index
    %16 = vector.load %arg11[%c0_15, %c0_16, %c1_17, %c0_18] : memref<2x10x10x4xf32, #tpu.memory_space<vmem>>, vector<2x8x8x4xf32>
    %c0_19 = arith.constant 0 : index
    %c0_20 = arith.constant 0 : index
    %c2 = arith.constant 2 : index
    %c0_21 = arith.constant 0 : index
    %17 = vector.load %arg11[%c0_19, %c0_20, %c2, %c0_21] : memref<2x10x10x4xf32, #tpu.memory_space<vmem>>, vector<2x8x8x4xf32>
    %c0_22 = arith.constant 0 : index
    %c1_23 = arith.constant 1 : index
    %c0_24 = arith.constant 0 : index
    %c0_25 = arith.constant 0 : index
    %18 = vector.load %arg11[%c0_22, %c1_23, %c0_24, %c0_25] : memref<2x10x10x4xf32, #tpu.memory_space<vmem>>, vector<2x8x8x4xf32>
    %c0_26 = arith.constant 0 : index
    %c1_27 = arith.constant 1 : index
    %c1_28 = arith.constant 1 : index
    %c0_29 = arith.constant 0 : index
    %19 = vector.load %arg11[%c0_26, %c1_27, %c1_28, %c0_29] : memref<2x10x10x4xf32, #tpu.memory_space<vmem>>, vector<2x8x8x4xf32>
    %c0_30 = arith.constant 0 : index
    %c1_31 = arith.constant 1 : index
    %c2_32 = arith.constant 2 : index
    %c0_33 = arith.constant 0 : index
    %20 = vector.load %arg11[%c0_30, %c1_31, %c2_32, %c0_33] : memref<2x10x10x4xf32, #tpu.memory_space<vmem>>, vector<2x8x8x4xf32>
    %c0_34 = arith.constant 0 : index
    %c2_35 = arith.constant 2 : index
    %c0_36 = arith.constant 0 : index
    %c0_37 = arith.constant 0 : index
    %21 = vector.load %arg11[%c0_34, %c2_35, %c0_36, %c0_37] : memref<2x10x10x4xf32, #tpu.memory_space<vmem>>, vector<2x8x8x4xf32>
    %c0_38 = arith.constant 0 : index
    %c2_39 = arith.constant 2 : index
    %c1_40 = arith.constant 1 : index
    %c0_41 = arith.constant 0 : index
    %22 = vector.load %arg11[%c0_38, %c2_39, %c1_40, %c0_41] : memref<2x10x10x4xf32, #tpu.memory_space<vmem>>, vector<2x8x8x4xf32>
    %c0_42 = arith.constant 0 : index
    %c2_43 = arith.constant 2 : index
    %c2_44 = arith.constant 2 : index
    %c0_45 = arith.constant 0 : index
    %23 = vector.load %arg11[%c0_42, %c2_43, %c2_44, %c0_45] : memref<2x10x10x4xf32, #tpu.memory_space<vmem>>, vector<2x8x8x4xf32>
    %24 = tpu.concatenate %15, %16, %17, %18, %19, %20, %21, %22, %23 in 3 : vector<2x8x8x4xf32>, vector<2x8x8x4xf32>, vector<2x8x8x4xf32>, vector<2x8x8x4xf32>, vector<2x8x8x4xf32>, vector<2x8x8x4xf32>, vector<2x8x8x4xf32>, vector<2x8x8x4xf32>, vector<2x8x8x4xf32> -> vector<2x8x8x36xf32>
    %25 = vector.shape_cast %24 : vector<2x8x8x36xf32> to vector<128x36xf32>
    %26 = arith.truncf %25 : vector<128x36xf32> to vector<128x36xbf16>
    %c0_46 = arith.constant 0 : index
    %c0_47 = arith.constant 0 : index
    %27 = vector.load %arg2[%c0_46, %c0_47] : memref<36x8xbf16, #tpu.memory_space<vmem>>, vector<36x8xbf16>
    %cst_48 = arith.constant dense<0.000000e+00> : vector<128x8xf32>
    %28 = tpu.matmul %26, %27, %cst_48 {dimension_numbers = #tpu.dot_dimension_numbers<[1], [0], [0], [1], [0, 0, 1, 1], [], []>} : vector<128x36xbf16>, vector<36x8xbf16>, vector<128x8xf32> -> vector<128x8xf32>
    %c0_49 = arith.constant 0 : index
    %c0_50 = arith.constant 0 : index
    %29 = vector.load %arg3[%c0_49, %c0_50] : memref<1x8xf32, #tpu.memory_space<vmem>>, vector<1x8xf32>
    %30 = vector.broadcast %29 : vector<1x8xf32> to vector<128x8xf32>
    %31 = arith.addf %28, %30 : vector<128x8xf32>
    %cst_51 = arith.constant dense<0.000000e+00> : vector<8xf32>
    %32 = vector.multi_reduction <add>, %31, %cst_51 [0] : vector<128x8xf32> to vector<8xf32>
    %33 = vector.shape_cast %32 : vector<8xf32> to vector<1x8xf32>
    %cst_52 = arith.constant 7.812500e-03 : f32
    %34 = vector.broadcast %cst_52 : f32 to vector<1x8xf32>
    %35 = arith.mulf %33, %34 : vector<1x8xf32>
    %36 = arith.mulf %31, %31 : vector<128x8xf32>
    %cst_53 = arith.constant dense<0.000000e+00> : vector<8xf32>
    %37 = vector.multi_reduction <add>, %36, %cst_53 [0] : vector<128x8xf32> to vector<8xf32>
    %38 = vector.shape_cast %37 : vector<8xf32> to vector<1x8xf32>
    %cst_54 = arith.constant 7.812500e-03 : f32
    %39 = vector.broadcast %cst_54 : f32 to vector<1x8xf32>
    %40 = arith.mulf %38, %39 : vector<1x8xf32>
    %41 = arith.mulf %35, %35 : vector<1x8xf32>
    %42 = arith.subf %40, %41 : vector<1x8xf32>
    %43 = vector.broadcast %35 : vector<1x8xf32> to vector<128x8xf32>
    %44 = arith.subf %31, %43 : vector<128x8xf32>
    %cst_55 = arith.constant 9.99999974E-6 : f32
    %45 = vector.broadcast %cst_55 : f32 to vector<1x8xf32>
    %46 = arith.addf %42, %45 : vector<1x8xf32>
    %47 = math.rsqrt %46 : vector<1x8xf32>
    %48 = vector.broadcast %47 : vector<1x8xf32> to vector<128x8xf32>
    %49 = arith.mulf %44, %48 : vector<128x8xf32>
    %c0_56 = arith.constant 0 : index
    %c0_57 = arith.constant 0 : index
    %50 = vector.load %arg4[%c0_56, %c0_57] : memref<1x8xf32, #tpu.memory_space<vmem>>, vector<1x8xf32>
    %51 = vector.broadcast %50 : vector<1x8xf32> to vector<128x8xf32>
    %52 = arith.mulf %49, %51 : vector<128x8xf32>
    %c0_58 = arith.constant 0 : index
    %c0_59 = arith.constant 0 : index
    %53 = vector.load %arg5[%c0_58, %c0_59] : memref<1x8xf32, #tpu.memory_space<vmem>>, vector<1x8xf32>
    %54 = vector.broadcast %53 : vector<1x8xf32> to vector<128x8xf32>
    %55 = arith.addf %52, %54 : vector<128x8xf32>
    %cst_60 = arith.constant 0.000000e+00 : f32
    %56 = vector.broadcast %cst_60 : f32 to vector<128x8xf32>
    %57 = arith.maximumf %55, %56 : vector<128x8xf32>
    %cst_61 = arith.constant 0.000000e+00 : f32
    %58 = vector.broadcast %cst_61 : f32 to vector<2x10x10x8xf32>
    %c0_62 = arith.constant 0 : index
    %c0_63 = arith.constant 0 : index
    %c0_64 = arith.constant 0 : index
    %c0_65 = arith.constant 0 : index
    %59 = vector.load %arg12[%c0_62, %c0_63, %c0_64, %c0_65] : memref<2x10x10x8xf32, #tpu.memory_space<vmem>>, vector<2x10x10x8xf32>
    tpu.vector_store %arg12[%c0_62, %c0_63, %c0_64, %c0_65], %58 {strides = array<i32>} : memref<2x10x10x8xf32, #tpu.memory_space<vmem>>, vector<2x10x10x8xf32>,
    %60 = vector.shape_cast %57 : vector<128x8xf32> to vector<2x8x8x8xf32>
    %c0_66 = arith.constant 0 : index
    %c1_67 = arith.constant 1 : index
    %c1_68 = arith.constant 1 : index
    %c0_69 = arith.constant 0 : index
    %61 = vector.load %arg12[%c0_66, %c1_67, %c1_68, %c0_69] : memref<2x10x10x8xf32, #tpu.memory_space<vmem>>, vector<2x8x8x8xf32>
    tpu.vector_store %arg12[%c0_66, %c1_67, %c1_68, %c0_69], %60 {strides = array<i32>} : memref<2x10x10x8xf32, #tpu.memory_space<vmem>>, vector<2x8x8x8xf32>,
    %c0_70 = arith.constant 0 : index
    %c0_71 = arith.constant 0 : index
    %c0_72 = arith.constant 0 : index
    %c0_73 = arith.constant 0 : index
    %62 = vector.load %arg12[%c0_70, %c0_71, %c0_72, %c0_73] : memref<2x10x10x8xf32, #tpu.memory_space<vmem>>, vector<2x8x8x8xf32>
    %c0_74 = arith.constant 0 : index
    %c0_75 = arith.constant 0 : index
    %c1_76 = arith.constant 1 : index
    %c0_77 = arith.constant 0 : index
    %63 = vector.load %arg12[%c0_74, %c0_75, %c1_76, %c0_77] : memref<2x10x10x8xf32, #tpu.memory_space<vmem>>, vector<2x8x8x8xf32>
    %c0_78 = arith.constant 0 : index
    %c0_79 = arith.constant 0 : index
    %c2_80 = arith.constant 2 : index
    %c0_81 = arith.constant 0 : index
    %64 = vector.load %arg12[%c0_78, %c0_79, %c2_80, %c0_81] : memref<2x10x10x8xf32, #tpu.memory_space<vmem>>, vector<2x8x8x8xf32>
    %c0_82 = arith.constant 0 : index
    %c1_83 = arith.constant 1 : index
    %c0_84 = arith.constant 0 : index
    %c0_85 = arith.constant 0 : index
    %65 = vector.load %arg12[%c0_82, %c1_83, %c0_84, %c0_85] : memref<2x10x10x8xf32, #tpu.memory_space<vmem>>, vector<2x8x8x8xf32>
    %c0_86 = arith.constant 0 : index
    %c1_87 = arith.constant 1 : index
    %c1_88 = arith.constant 1 : index
    %c0_89 = arith.constant 0 : index
    %66 = vector.load %arg12[%c0_86, %c1_87, %c1_88, %c0_89] : memref<2x10x10x8xf32, #tpu.memory_space<vmem>>, vector<2x8x8x8xf32>
    %c0_90 = arith.constant 0 : index
    %c1_91 = arith.constant 1 : index
    %c2_92 = arith.constant 2 : index
    %c0_93 = arith.constant 0 : index
    %67 = vector.load %arg12[%c0_90, %c1_91, %c2_92, %c0_93] : memref<2x10x10x8xf32, #tpu.memory_space<vmem>>, vector<2x8x8x8xf32>
    %c0_94 = arith.constant 0 : index
    %c2_95 = arith.constant 2 : index
    %c0_96 = arith.constant 0 : index
    %c0_97 = arith.constant 0 : index
    %68 = vector.load %arg12[%c0_94, %c2_95, %c0_96, %c0_97] : memref<2x10x10x8xf32, #tpu.memory_space<vmem>>, vector<2x8x8x8xf32>
    %c0_98 = arith.constant 0 : index
    %c2_99 = arith.constant 2 : index
    %c1_100 = arith.constant 1 : index
    %c0_101 = arith.constant 0 : index
    %69 = vector.load %arg12[%c0_98, %c2_99, %c1_100, %c0_101] : memref<2x10x10x8xf32, #tpu.memory_space<vmem>>, vector<2x8x8x8xf32>
    %c0_102 = arith.constant 0 : index
    %c2_103 = arith.constant 2 : index
    %c2_104 = arith.constant 2 : index
    %c0_105 = arith.constant 0 : index
    %70 = vector.load %arg12[%c0_102, %c2_103, %c2_104, %c0_105] : memref<2x10x10x8xf32, #tpu.memory_space<vmem>>, vector<2x8x8x8xf32>
    %71 = tpu.concatenate %62, %63, %64, %65, %66, %67, %68, %69, %70 in 3 : vector<2x8x8x8xf32>, vector<2x8x8x8xf32>, vector<2x8x8x8xf32>, vector<2x8x8x8xf32>, vector<2x8x8x8xf32>, vector<2x8x8x8xf32>, vector<2x8x8x8xf32>, vector<2x8x8x8xf32>, vector<2x8x8x8xf32> -> vector<2x8x8x72xf32>
    %72 = vector.shape_cast %71 : vector<2x8x8x72xf32> to vector<128x72xf32>
    %73 = arith.truncf %72 : vector<128x72xf32> to vector<128x72xbf16>
    %c0_106 = arith.constant 0 : index
    %c0_107 = arith.constant 0 : index
    %74 = vector.load %arg6[%c0_106, %c0_107] : memref<72x8xbf16, #tpu.memory_space<vmem>>, vector<72x8xbf16>
    %cst_108 = arith.constant dense<0.000000e+00> : vector<128x8xf32>
    %75 = tpu.matmul %73, %74, %cst_108 {dimension_numbers = #tpu.dot_dimension_numbers<[1], [0], [0], [1], [0, 0, 1, 1], [], []>} : vector<128x72xbf16>, vector<72x8xbf16>, vector<128x8xf32> -> vector<128x8xf32>
    %c0_109 = arith.constant 0 : index
    %c0_110 = arith.constant 0 : index
    %76 = vector.load %arg7[%c0_109, %c0_110] : memref<1x8xf32, #tpu.memory_space<vmem>>, vector<1x8xf32>
    %77 = vector.broadcast %76 : vector<1x8xf32> to vector<128x8xf32>
    %78 = arith.addf %75, %77 : vector<128x8xf32>
    %cst_111 = arith.constant dense<0.000000e+00> : vector<8xf32>
    %79 = vector.multi_reduction <add>, %78, %cst_111 [0] : vector<128x8xf32> to vector<8xf32>
    %80 = vector.shape_cast %79 : vector<8xf32> to vector<1x8xf32>
    %cst_112 = arith.constant 7.812500e-03 : f32
    %81 = vector.broadcast %cst_112 : f32 to vector<1x8xf32>
    %82 = arith.mulf %80, %81 : vector<1x8xf32>
    %83 = arith.mulf %78, %78 : vector<128x8xf32>
    %cst_113 = arith.constant dense<0.000000e+00> : vector<8xf32>
    %84 = vector.multi_reduction <add>, %83, %cst_113 [0] : vector<128x8xf32> to vector<8xf32>
    %85 = vector.shape_cast %84 : vector<8xf32> to vector<1x8xf32>
    %cst_114 = arith.constant 7.812500e-03 : f32
    %86 = vector.broadcast %cst_114 : f32 to vector<1x8xf32>
    %87 = arith.mulf %85, %86 : vector<1x8xf32>
    %88 = arith.mulf %82, %82 : vector<1x8xf32>
    %89 = arith.subf %87, %88 : vector<1x8xf32>
    %90 = vector.broadcast %82 : vector<1x8xf32> to vector<128x8xf32>
    %91 = arith.subf %78, %90 : vector<128x8xf32>
    %cst_115 = arith.constant 9.99999974E-6 : f32
    %92 = vector.broadcast %cst_115 : f32 to vector<1x8xf32>
    %93 = arith.addf %89, %92 : vector<1x8xf32>
    %94 = math.rsqrt %93 : vector<1x8xf32>
    %95 = vector.broadcast %94 : vector<1x8xf32> to vector<128x8xf32>
    %96 = arith.mulf %91, %95 : vector<128x8xf32>
    %c0_116 = arith.constant 0 : index
    %c0_117 = arith.constant 0 : index
    %97 = vector.load %arg8[%c0_116, %c0_117] : memref<1x8xf32, #tpu.memory_space<vmem>>, vector<1x8xf32>
    %98 = vector.broadcast %97 : vector<1x8xf32> to vector<128x8xf32>
    %99 = arith.mulf %96, %98 : vector<128x8xf32>
    %c0_118 = arith.constant 0 : index
    %c0_119 = arith.constant 0 : index
    %100 = vector.load %arg9[%c0_118, %c0_119] : memref<1x8xf32, #tpu.memory_space<vmem>>, vector<1x8xf32>
    %101 = vector.broadcast %100 : vector<1x8xf32> to vector<128x8xf32>
    %102 = arith.addf %99, %101 : vector<128x8xf32>
    %cst_120 = arith.constant 0.000000e+00 : f32
    %103 = vector.broadcast %cst_120 : f32 to vector<128x8xf32>
    %104 = arith.maximumf %102, %103 : vector<128x8xf32>
    %c0_121 = arith.constant 0 : index
    %c0_122 = arith.constant 0 : index
    %105 = vector.load %arg10[%c0_121, %c0_122] : memref<128x8xf32, #tpu.memory_space<vmem>>, vector<128x8xf32>
    tpu.vector_store %arg10[%c0_121, %c0_122], %104 {strides = array<i32>} : memref<128x8xf32, #tpu.memory_space<vmem>>, vector<128x8xf32>,
    return
  }
  func.func @transform_0(%arg0: i32) -> (i32, i32, i32, i32, i32) {
    %c0_i32 = arith.constant 0 : i32
    %c0_i32_0 = arith.constant 0 : i32
    %c0_i32_1 = arith.constant 0 : i32
    %c0_i32_2 = arith.constant 0 : i32
    %c0_i32_3 = arith.constant 0 : i32
    %c0_i32_4 = arith.constant 0 : i32
    return %c0_i32, %c0_i32_0, %c0_i32_1, %c0_i32_2, %c0_i32_3 : i32, i32, i32, i32, i32
  }
  func.func @transform_1(%arg0: i32) -> (i32, i32) {
    %c0_i32 = arith.constant 0 : i32
    %c0_i32_0 = arith.constant 0 : i32
    %c0_i32_1 = arith.constant 0 : i32
    return %c0_i32, %c0_i32_0 : i32, i32
  }
  func.func @transform_2(%arg0: i32) -> (i32, i32) {
    %c0_i32 = arith.constant 0 : i32
    %c0_i32_0 = arith.constant 0 : i32
    %c0_i32_1 = arith.constant 0 : i32
    return %c0_i32, %c0_i32_0 : i32, i32
  }
  func.func @transform_3(%arg0: i32) -> (i32, i32) {
    %c0_i32 = arith.constant 0 : i32
    %c0_i32_0 = arith.constant 0 : i32
    %c0_i32_1 = arith.constant 0 : i32
    return %c0_i32, %c0_i32_0 : i32, i32
  }
  func.func @transform_4(%arg0: i32) -> (i32, i32) {
    %c0_i32 = arith.constant 0 : i32
    %c0_i32_0 = arith.constant 0 : i32
    %c0_i32_1 = arith.constant 0 : i32
    return %c0_i32, %c0_i32_0 : i32, i32
  }
  func.func @transform_5(%arg0: i32) -> (i32, i32) {
    %c0_i32 = arith.constant 0 : i32
    %c0_i32_0 = arith.constant 0 : i32
    %c0_i32_1 = arith.constant 0 : i32
    return %c0_i32, %c0_i32_0 : i32, i32
  }
  func.func @transform_6(%arg0: i32) -> (i32, i32) {
    %c0_i32 = arith.constant 0 : i32
    %c0_i32_0 = arith.constant 0 : i32
    %c0_i32_1 = arith.constant 0 : i32
    return %c0_i32, %c0_i32_0 : i32, i32
  }
  func.func @transform_7(%arg0: i32) -> (i32, i32) {
    %c0_i32 = arith.constant 0 : i32
    %c0_i32_0 = arith.constant 0 : i32
    %c0_i32_1 = arith.constant 0 : i32
    return %c0_i32, %c0_i32_0 : i32, i32
  }
  func.func @transform_8(%arg0: i32) -> (i32, i32) {
    %c0_i32 = arith.constant 0 : i32
    %c0_i32_0 = arith.constant 0 : i32
    %c0_i32_1 = arith.constant 0 : i32
    return %c0_i32, %c0_i32_0 : i32, i32
  }
  func.func @transform_9(%arg0: i32) -> (i32, i32) {
    %c0_i32 = arith.constant 0 : i32
    %c0_i32_0 = arith.constant 0 : i32
    %c0_i32_1 = arith.constant 0 : i32
    return %c0_i32, %c0_i32_0 : i32, i32
  }
}

</mosaic_0001>

<bundles_post_ra>
// kernel: down_forward.1
= control target key start
LH: loop header
LB: loop body
LE: loop exit
PB: predicated region body
PF: predicated region fallthrough
CT: control target
= control target key end

     0   :  { %s3299_s15 = smov 124   ;;  %vm241_vm0 = vcmask 31744   ;;  %vm243_vm1 = vcmask 25600   ;;  %v3300_v34 = vmov 0.0   ;;  %s3303_s13 = smov 12   ;;  %vm973_vm2 = vcmask 64512   ;;  %s5373_s0 = inlined_call_operand.vmem [shape: f32[2,8,2,8,8], index: 0, kind: input, shape index: {}]   ;;  %s5374_s1 = inlined_call_operand.vmem [shape: bf16[36,8], index: 1, kind: input, shape index: {}]   ;;  %s5375_s2 = inlined_call_operand.vmem [shape: f32[1,8], index: 2, kind: input, shape index: {}]   ;;  %s5376_s3 = inlined_call_operand.vmem [shape: f32[1,8], index: 3, kind: input, shape index: {}]   ;;  %s5377_s4 = inlined_call_operand.vmem [shape: f32[1,8], index: 4, kind: input, shape index: {}]   ;;  %s5378_s5 = inlined_call_operand.vmem [shape: bf16[72,8], index: 5, kind: input, shape index: {}]   ;;  %s5379_s6 = inlined_call_operand.vmem [shape: f32[1,8], index: 6, kind: input, shape index: {}]   ;;  %s5380_s7 = inlined_call_operand.vmem [shape: f32[1,8], index: 7, kind: input, shape index: {}]   ;;  %s5381_s8 = inlined_call_operand.vmem [shape: f32[1,8], index: 8, kind: input, shape index: {}]   ;;  %s5382_s9 = inlined_call_operand.vmem [shape: f32[128,8], index: 9, kind: output, shape index: {}]  }
   0x1   :  { %v3366_v0 = vld [vmem:[%s5373_s0 + $0x40] sm:$0xff]  ;;  %v3387_v3 = vld [vmem:[%s5373_s0 + $0x50] sm:$0xff]  ;;  %v3471_v15 = vld [vmem:[%s5373_s0 + $0x18] sm:$0xff]  ;;  %247 = vst.msk [vmem:[#allocation2 + $0x20] sm:$0xff] %vm241_vm0, %v3300_v34  ;;  %s3304_s14 = smov 20   ;;  %s3305_s16 = smov 16  }
   0x2   :  { %v3371_v1 = vld [vmem:[%s5373_s0 + $0x20] sm:$0xff]  ;;  %89 = vrot.lane.b32.xlu2 %v3366_v0, %s3299_s15  ;;  %v3392_v4 = vld [vmem:[%s5373_s0 + $0x30] sm:$0xff]  ;;  %v3476_v16 = vld [vmem:[%s5373_s0 + $0x8] sm:$0xff]  ;;  %248 = vst.msk [vmem:[#allocation2 + $0x28] sm:$0x3] %vm243_vm1, %v3300_v34  ;;  %s3306_s17 = smov 32  }
   0x3   :  { %v3376_v2 = vld [vmem:[%s5373_s0] sm:$0xff]  ;;  %85 = vrot.lane.b32.xlu1 %v3371_v1, %s3299_s15  ;;  %v3397_v5 = vld [vmem:[%s5373_s0 + $0x10] sm:$0xff]  ;;  %v3492_v18 = vld [vmem:[%s5373_s0 + $0x48] sm:$0xff]  ;;  %242 = vst.msk [vmem:[#allocation2] sm:$0xff] %vm241_vm0, %v3300_v34  ;;  %s3307_s18 = smov 24   ;;  %s3308_s19 = smov 28  }
   0x4   :  { %81 = vrot.lane.b32.xlu0 %v3376_v2, %s3299_s15  ;;  %v3408_v6 = vld [vmem:[%s5373_s0 + $0x80] sm:$0xff]  ;;  %v3413_v7 = vld [vmem:[%s5373_s0 + $0x70] sm:$0xff]  ;;  %v3497_v19 = vld [vmem:[%s5373_s0 + $0x38] sm:$0xff]  ;;  %244 = vst.msk [vmem:[#allocation2 + $0x8] sm:$0x3] %vm243_vm1, %v3300_v34  ;;  %vm1149_vm3 = vcmask 1041408  }
   0x5   :  { %v3418_v8 = vld [vmem:[%s5373_s0 + $0x60] sm:$0xff]  ;;  %v3429_v9 = vld [vmem:[%s5373_s0 + $0xb0] sm:$0xff]  ;;  %v3502_v20 = vld [vmem:[%s5373_s0 + $0x28] sm:$0xff]  ;;  %245 = vst.msk [vmem:[#allocation2 + $0x10] sm:$0xff] %vm241_vm0, %v3300_v34  ;;  %vm990_vm4 = vcmask 97280   ;;  %vm1007_vm5 = vcmask 130048  }
   0x6   :  { %v3434_v10 = vld [vmem:[%s5373_s0 + $0xa0] sm:$0xff]  ;;  %v3439_v11 = vld [vmem:[%s5373_s0 + $0x90] sm:$0xff]  ;;  %v3513_v21 = vld [vmem:[%s5373_s0 + $0x78] sm:$0xff]  ;;  %246 = vst.msk [vmem:[#allocation2 + $0x18] sm:$0x3] %vm243_vm1, %v3300_v34  ;;  %vm1024_vm6 = vcmask 162816  }
   0x7   :  { %v3450_v12 = vld [vmem:[%s5373_s0 + $0xe0] sm:$0xff]  ;;  %v3455_v13 = vld [vmem:[%s5373_s0 + $0xd0] sm:$0xff]  ;;  %v3518_v22 = vld [vmem:[%s5373_s0 + $0x68] sm:$0xff]  ;;  %249 = vst.msk [vmem:[#allocation2 + $0x30] sm:$0xff] %vm241_vm0, %v3300_v34  ;;  %vm1041_vm7 = vcmask 195584   ;;  %vm1058_vm8 = vcmask 228352  }
   0x8   :  { %v3460_v14 = vld [vmem:[%s5373_s0 + $0xc0] sm:$0xff]  ;;  %v3481_v17 = vld [vmem:[%s5373_s0 + $0xf0] sm:$0xff]  ;;  %v3523_v23 = vld [vmem:[%s5373_s0 + $0x58] sm:$0xff]  ;;  %250 = vst.msk [vmem:[#allocation2 + $0x38] sm:$0x3] %vm243_vm1, %v3300_v34  ;;  %vm1075_vm9 = vcmask 261120  }
   0x9   :  { %v3534_v24 = vld [vmem:[%s5373_s0 + $0xa8] sm:$0xff]  ;;  %v3539_v25 = vld [vmem:[%s5373_s0 + $0x98] sm:$0xff]  ;;  %251 = vst.msk [vmem:[#allocation2 + $0x40] sm:$0xff] %vm241_vm0, %v3300_v34  ;;  %vm1124_vm10 = vcmask 293888   ;;  %vm1396_vm11 = vcmask 58368   ;;  %s3310_s29 = smov 64  }
   0xa   :  { %91 = vrot.lane.b32.xlu2 %v3387_v3, %s3299_s15  ;;  %v3544_v26 = vld [vmem:[%s5373_s0 + $0x88] sm:$0xff]  ;;  %v3555_v27 = vld [vmem:[%s5373_s0 + $0xd8] sm:$0xff]  ;;  %252 = vst.msk [vmem:[#allocation2 + $0x48] sm:$0x3] %vm243_vm1, %v3300_v34  ;;  %s3311_s30 = smov 56   ;;  %s3312_s10 = smov 48  }
   0xb   :  { %87 = vrot.lane.b32.xlu1 %v3392_v4, %s3299_s15  ;;  %v3560_v28 = vld [vmem:[%s5373_s0 + $0xc8] sm:$0xff]  ;;  %v3565_v29 = vld [vmem:[%s5373_s0 + $0xb8] sm:$0xff]  ;;  %253 = vst.msk [vmem:[#allocation2 + $0x50] sm:$0xff] %vm241_vm0, %v3300_v34  ;;  %vm2315_vm15 = vcmask 1043456  }
   0xc   :  { %83 = vrot.lane.b32.xlu0 %v3397_v5, %s3299_s15  ;;  %v3576_v30 = vld [vmem:[%s5373_s0 + $0xf8] sm:$0xff]  ;;  %v3581_v31 = vld [vmem:[%s5373_s0 + $0xe8] sm:$0xff]  ;;  %254 = vst.msk [vmem:[#allocation2 + $0x58] sm:$0x3] %vm243_vm1, %v3300_v34  ;;  %s3301_s0 = smov 4  }
   0xd   :  { %255 = vst.msk [vmem:[#allocation2 + $0x60] sm:$0xff] %vm241_vm0, %v3300_v34 }
   0xe   :  { %256 = vst.msk [vmem:[#allocation2 + $0x68] sm:$0x3] %vm243_vm1, %v3300_v34 }
   0xf   :  { %257 = vst.msk [vmem:[#allocation2 + $0x70] sm:$0xff] %vm241_vm0, %v3300_v34 }
  0x10   :  { %258 = vst.msk [vmem:[#allocation2 + $0x78] sm:$0x3] %vm243_vm1, %v3300_v34 }
  0x11   :  { %259 = vst.msk [vmem:[#allocation2 + $0x80] sm:$0xff] %vm241_vm0, %v3300_v34 }
  0x12   :  { %97 = vrot.lane.b32.xlu2 %v3408_v6, %s3299_s15  ;;  %260 = vst.msk [vmem:[#allocation2 + $0x88] sm:$0x3] %vm243_vm1, %v3300_v34 }
  0x13   :  { %95 = vrot.lane.b32.xlu1 %v3413_v7, %s3299_s15  ;;  %261 = vst.msk [vmem:[#allocation2 + $0x90] sm:$0xff] %vm241_vm0, %v3300_v34 }
  0x14   :  { %93 = vrot.lane.b32.xlu0 %v3418_v8, %s3299_s15  ;;  %262 = vst.msk [vmem:[#allocation2 + $0x98] sm:$0x3] %vm243_vm1, %v3300_v34 }
  0x15   :  { %263 = vst.msk [vmem:[#allocation2 + $0xa0] sm:$0xff] %vm241_vm0, %v3300_v34 }
  0x16   :  { %264 = vst.msk [vmem:[#allocation2 + $0xa8] sm:$0x3] %vm243_vm1, %v3300_v34 }
  0x17   :  { %265 = vst.msk [vmem:[#allocation2 + $0xb0] sm:$0xff] %vm241_vm0, %v3300_v34 }
  0x18   :  { %266 = vst.msk [vmem:[#allocation2 + $0xb8] sm:$0x3] %vm243_vm1, %v3300_v34 }
  0x19   :  { %267 = vst.msk [vmem:[#allocation2 + $0xc0] sm:$0xff] %vm241_vm0, %v3300_v34 }
  0x1a   :  { %103 = vrot.lane.b32.xlu2 %v3429_v9, %s3299_s15  ;;  %268 = vst.msk [vmem:[#allocation2 + $0xc8] sm:$0x3] %vm243_vm1, %v3300_v34 }
  0x1b   :  { %101 = vrot.lane.b32.xlu1 %v3434_v10, %s3299_s15  ;;  %269 = vst.msk [vmem:[#allocation2 + $0xd0] sm:$0xff] %vm241_vm0, %v3300_v34 }
  0x1c   :  { %99 = vrot.lane.b32.xlu0 %v3439_v11, %s3299_s15  ;;  %270 = vst.msk [vmem:[#allocation2 + $0xd8] sm:$0x3] %vm243_vm1, %v3300_v34 }
  0x1d   :  { %271 = vst.msk [vmem:[#allocation2 + $0xe0] sm:$0xff] %vm241_vm0, %v3300_v34 }
  0x1e   :  { %272 = vst.msk [vmem:[#allocation2 + $0xe8] sm:$0x3] %vm243_vm1, %v3300_v34 }
  0x1f   :  { %273 = vst.msk [vmem:[#allocation2 + $0xf0] sm:$0xff] %vm241_vm0, %v3300_v34 }
  0x20   :  { %274 = vst.msk [vmem:[#allocation2 + $0xf8] sm:$0x3] %vm243_vm1, %v3300_v34 }
  0x21   :  { %275 = vst.msk [vmem:[#allocation2 + $0x100] sm:$0xff] %vm241_vm0, %v3300_v34 }
  0x22   :  { %109 = vrot.lane.b32.xlu2 %v3450_v12, %s3299_s15  ;;  %276 = vst.msk [vmem:[#allocation2 + $0x108] sm:$0x3] %vm243_vm1, %v3300_v34 }
  0x23   :  { %107 = vrot.lane.b32.xlu1 %v3455_v13, %s3299_s15  ;;  %277 = vst.msk [vmem:[#allocation2 + $0x110] sm:$0xff] %vm241_vm0, %v3300_v34 }
  0x24   :  { %105 = vrot.lane.b32.xlu0 %v3460_v14, %s3299_s15  ;;  %278 = vst.msk [vmem:[#allocation2 + $0x118] sm:$0x3] %vm243_vm1, %v3300_v34 }
  0x25   :  { %279 = vst.msk [vmem:[#allocation2 + $0x120] sm:$0xff] %vm241_vm0, %v3300_v34 }
  0x26   :  { %280 = vst.msk [vmem:[#allocation2 + $0x128] sm:$0x3] %vm243_vm1, %v3300_v34 }
  0x27   :  { %281 = vst.msk [vmem:[#allocation2 + $0x130] sm:$0xff] %vm241_vm0, %v3300_v34 }
  0x28   :  { %282 = vst.msk [vmem:[#allocation2 + $0x138] sm:$0x3] %vm243_vm1, %v3300_v34  ;;  %vm2191_vm1 = vcmask 392192  }
  0x29   :  { %1395 = vst.msk [vmem:[#allocation3] sm:$0xff] %vm973_vm2, %v3300_v34 }
  0x2a   :  { %163 = vrot.lane.b32.xlu2 %v3471_v15, %s3299_s15  ;;  %1398 = vst.msk [vmem:[#allocation3 + $0x10] sm:$0xff] %vm973_vm2, %v3300_v34 }
  0x2b   :  { %161 = vrot.lane.b32.xlu1 %v3476_v16, %s3299_s15  ;;  %1400 = vst.msk [vmem:[#allocation3 + $0x20] sm:$0xff] %vm973_vm2, %v3300_v34 }
  0x2c   :  { %111 = vrot.lane.b32.xlu0 %v3481_v17, %s3299_s15  ;;  %1402 = vst.msk [vmem:[#allocation3 + $0x30] sm:$0xff] %vm973_vm2, %v3300_v34 }
  0x2d   :  { %1404 = vst.msk [vmem:[#allocation3 + $0x40] sm:$0xff] %vm973_vm2, %v3300_v34 }
  0x2e   :  { %1406 = vst.msk [vmem:[#allocation3 + $0x50] sm:$0xff] %vm973_vm2, %v3300_v34 }
  0x2f   :  { %1408 = vst.msk [vmem:[#allocation3 + $0x60] sm:$0xff] %vm973_vm2, %v3300_v34 }
  0x30   :  { %1410 = vst.msk [vmem:[#allocation3 + $0x70] sm:$0xff] %vm973_vm2, %v3300_v34 }
  0x31   :  { %1412 = vst.msk [vmem:[#allocation3 + $0x80] sm:$0xff] %vm973_vm2, %v3300_v34 }
  0x32   :  { %169 = vrot.lane.b32.xlu2 %v3492_v18, %s3299_s15  ;;  %1414 = vst.msk [vmem:[#allocation3 + $0x90] sm:$0xff] %vm973_vm2, %v3300_v34 }
  0x33   :  { %167 = vrot.lane.b32.xlu1 %v3497_v19, %s3299_s15  ;;  %1416 = vst.msk [vmem:[#allocation3 + $0xa0] sm:$0xff] %vm973_vm2, %v3300_v34 }
  0x34   :  { %165 = vrot.lane.b32.xlu0 %v3502_v20, %s3299_s15  ;;  %1418 = vst.msk [vmem:[#allocation3 + $0xb0] sm:$0xff] %vm973_vm2, %v3300_v34 }
  0x35   :  { %1420 = vst.msk [vmem:[#allocation3 + $0xc0] sm:$0xff] %vm973_vm2, %v3300_v34 }
  0x36   :  { %1422 = vst.msk [vmem:[#allocation3 + $0xd0] sm:$0xff] %vm973_vm2, %v3300_v34 }
  0x37   :  { %1424 = vst.msk [vmem:[#allocation3 + $0xe0] sm:$0xff] %vm973_vm2, %v3300_v34 }
  0x38   :  { %1426 = vst.msk [vmem:[#allocation3 + $0xf0] sm:$0xff] %vm973_vm2, %v3300_v34 }
  0x39   :  { %1428 = vst.msk [vmem:[#allocation3 + $0x100] sm:$0xff] %vm973_vm2, %v3300_v34 }
  0x3a   :  { %175 = vrot.lane.b32.xlu2 %v3513_v21, %s3299_s15  ;;  %1430 = vst.msk [vmem:[#allocation3 + $0x110] sm:$0xff] %vm973_vm2, %v3300_v34 }
  0x3b   :  { %173 = vrot.lane.b32.xlu1 %v3518_v22, %s3299_s15  ;;  %1432 = vst.msk [vmem:[#allocation3 + $0x120] sm:$0xff] %vm973_vm2, %v3300_v34 }
  0x3c   :  { %171 = vrot.lane.b32.xlu0 %v3523_v23, %s3299_s15  ;;  %1434 = vst.msk [vmem:[#allocation3 + $0x130] sm:$0xff] %vm973_vm2, %v3300_v34 }
  0x3d   :  { %1433 = vst.msk [vmem:[#allocation3 + $0x128] sm:$0x3] %vm1396_vm11, %v3300_v34 }
  0x3e   :  { %1397 = vst.msk [vmem:[#allocation3 + $0x8] sm:$0x3] %vm1396_vm11, %v3300_v34 }
  0x3f   :  { %1399 = vst.msk [vmem:[#allocation3 + $0x18] sm:$0x3] %vm1396_vm11, %v3300_v34 }
  0x40   :  { %1401 = vst.msk [vmem:[#allocation3 + $0x28] sm:$0x3] %vm1396_vm11, %v3300_v34 }
  0x41   :  { %1403 = vst.msk [vmem:[#allocation3 + $0x38] sm:$0x3] %vm1396_vm11, %v3300_v34 }
  0x42   :  { %181 = vrot.lane.b32.xlu2 %v3534_v24, %s3299_s15  ;;  %1405 = vst.msk [vmem:[#allocation3 + $0x48] sm:$0x3] %vm1396_vm11, %v3300_v34 }
  0x43   :  { %179 = vrot.lane.b32.xlu1 %v3539_v25, %s3299_s15  ;;  %1407 = vst.msk [vmem:[#allocation3 + $0x58] sm:$0x3] %vm1396_vm11, %v3300_v34 }
  0x44   :  { %177 = vrot.lane.b32.xlu0 %v3544_v26, %s3299_s15  ;;  %1409 = vst.msk [vmem:[#allocation3 + $0x68] sm:$0x3] %vm1396_vm11, %v3300_v34 }
  0x45   :  { %1411 = vst.msk [vmem:[#allocation3 + $0x78] sm:$0x3] %vm1396_vm11, %v3300_v34 }
  0x46   :  { %1413 = vst.msk [vmem:[#allocation3 + $0x88] sm:$0x3] %vm1396_vm11, %v3300_v34 }
  0x47   :  { %1415 = vst.msk [vmem:[#allocation3 + $0x98] sm:$0x3] %vm1396_vm11, %v3300_v34 }
  0x48   :  { %1417 = vst.msk [vmem:[#allocation3 + $0xa8] sm:$0x3] %vm1396_vm11, %v3300_v34 }
  0x49   :  { %1419 = vst.msk [vmem:[#allocation3 + $0xb8] sm:$0x3] %vm1396_vm11, %v3300_v34 }
  0x4a   :  { %187 = vrot.lane.b32.xlu2 %v3555_v27, %s3299_s15  ;;  %1421 = vst.msk [vmem:[#allocation3 + $0xc8] sm:$0x3] %vm1396_vm11, %v3300_v34 }
  0x4b   :  { %185 = vrot.lane.b32.xlu1 %v3560_v28, %s3299_s15  ;;  %1423 = vst.msk [vmem:[#allocation3 + $0xd8] sm:$0x3] %vm1396_vm11, %v3300_v34 }
  0x4c   :  { %183 = vrot.lane.b32.xlu0 %v3565_v29, %s3299_s15  ;;  %1425 = vst.msk [vmem:[#allocation3 + $0xe8] sm:$0x3] %vm1396_vm11, %v3300_v34 }
  0x4d   :  { %1427 = vst.msk [vmem:[#allocation3 + $0xf8] sm:$0x3] %vm1396_vm11, %v3300_v34 }
  0x4e   :  { %1429 = vst.msk [vmem:[#allocation3 + $0x108] sm:$0x3] %vm1396_vm11, %v3300_v34 }
  0x4f   :  { %1431 = vst.msk [vmem:[#allocation3 + $0x118] sm:$0x3] %vm1396_vm11, %v3300_v34 }
  0x50   :  { %1435 = vst.msk [vmem:[#allocation3 + $0x138] sm:$0x3] %vm1396_vm11, %v3300_v34 }
  0x53   :  { %191 = vrot.lane.b32.xlu1 %v3576_v30, %s3299_s15 }
  0x54   :  { %189 = vrot.lane.b32.xlu0 %v3581_v31, %s3299_s15  ;;  %s3302_s15 = smov 8  }
  0x5c   :  { %v3587_v32 = vpop.permute.xlu2 %89 }
  0x5d   :  { %v133_v50 = vmax.f32 %v3366_v0, %v3587_v32 }
  0x64   :  { %v3589_v33 = vpop.permute.xlu2 %91 }
  0x6c   :  { %v3603_v35 = vpop.permute.xlu2 %97 }
  0x74   :  { %v3621_v36 = vpop.permute.xlu2 %103 }
  0x75   :  { %v3623_v37 = vpop.permute.xlu1 %85 }
  0x76   :  { %v82_v38 = vpop.permute.xlu0 %81 }
  0x77   :  { %v129_v62 = vmax.f32 %v3376_v2, %v82_v38  ;;  %v131_v38 = vmax.f32 %v3371_v1, %v3623_v37 }
  0x7c   :  { %v3641_v39 = vpop.permute.xlu2 %109 }
  0x7d   :  { %v3643_v40 = vpop.permute.xlu1 %87 }
  0x7e   :  { %v84_v41 = vpop.permute.xlu0 %83 }
  0x7f   :  { %v130_v44 = vmax.f32 %v3397_v5, %v84_v41  ;;  %v132_v41 = vmax.f32 %v3392_v4, %v3643_v40  ;;  %v134_v40 = vmax.f32 %v3387_v3, %v3589_v33 }
  0x84   :  { %v164_v43 = vpop.permute.xlu2 %163 }
  0x85   :  { %v96_v42 = vpop.permute.xlu1 %95  ;;  %v210_v45 = vmax.f32 %v3471_v15, %v164_v43 }
  0x86   :  { %v3667_v46 = vpop.permute.xlu0 %93  ;;  %v136_v56 = vmax.f32 %v3413_v7, %v96_v42 }
  0x87   :  { %v226_v47 = vmax.f32 %v130_v44, %v210_v45  ;;  %v316_v45 = vld [vmem:[#allocation2 + $0x1] sm:$0xff] }
  0x89   :  { %285 = vst.msk [vmem:[#allocation2 + $0x21] sm:$0xff] %vm241_vm0, %v226_v47 }
  0x8c   :  { %v170_v49 = vpop.permute.xlu2 %169 }
  0x8d   :  { %v102_v48 = vpop.permute.xlu1 %101  ;;  %v213_v51 = vmax.f32 %v3492_v18, %v170_v49 }
  0x8e   :  { %v3687_v52 = vpop.permute.xlu0 %99  ;;  %v139_v63 = vmax.f32 %v3434_v10, %v102_v48 }
  0x8f   :  { %v229_v53 = vmax.f32 %v133_v50, %v213_v51 }
  0x91   :  { %288 = vst.msk [vmem:[#allocation2 + $0x51] sm:$0xff] %vm241_vm0, %v229_v53 }
  0x94   :  { %v176_v55 = vpop.permute.xlu2 %175 }
  0x95   :  { %v108_v54 = vpop.permute.xlu1 %107  ;;  %v216_v57 = vmax.f32 %v3513_v21, %v176_v55 }
  0x96   :  { %v3694_v58 = vpop.permute.xlu0 %105  ;;  %v142_v2 = vmax.f32 %v3455_v13, %v108_v54  ;;  %v3718_v13 = vld [vmem:[#allocation2 + $0x21] sm:$0xff] }
  0x97   :  { %v232_v59 = vmax.f32 %v136_v56, %v216_v57  ;;  %v137_v57 = vmax.f32 %v3408_v6, %v3603_v35 }
  0x98   :  { %v3733_v54 = vld [vmem:[#allocation2 + $0x51] sm:$0xff] }
  0x99   :  { %291 = vst.msk [vmem:[#allocation2 + $0x81] sm:$0xff] %vm241_vm0, %v232_v59 }
  0x9c   :  { %v182_v60 = vpop.permute.xlu2 %181 }
  0x9d   :  { %v162_v61 = vpop.permute.xlu1 %161  ;;  %v219_v0 = vmax.f32 %v3534_v24, %v182_v60 }
  0x9e   :  { %v209_v5 = vmax.f32 %v3476_v16, %v162_v61  ;;  %v3701_v15 = vpop.permute.xlu0 %111 }
  0x9f   :  { %v235_v7 = vmax.f32 %v139_v63, %v219_v0  ;;  %v140_v0 = vmax.f32 %v3429_v9, %v3621_v36 }
  0xa0   :  { %v225_v18 = vmax.f32 %v129_v62, %v209_v5 }
  0xa1   :  { %294 = vst.msk [vmem:[#allocation2 + $0xd1] sm:$0xff] %vm241_vm0, %v235_v7 }
  0xa2   :  { %284 = vst.msk [vmem:[#allocation2 + $0x11] sm:$0xff] %vm241_vm0, %v225_v18  ;;  %v324_v18 = vld [vmem:[#allocation2 + $0xa1] sm:$0xff] }
  0xa4   :  { %v188_v21 = vpop.permute.xlu2 %187 }
  0xa5   :  { %v168_v32 = vpop.permute.xlu1 %167  ;;  %v222_v10 = vmax.f32 %v3555_v27, %v188_v21 }
  0xa6   :  { %v212_v24 = vmax.f32 %v3497_v19, %v168_v32  ;;  %v166_v16 = vpop.permute.xlu0 %165 }
  0xa7   :  { %v211_v42 = vmax.f32 %v3502_v20, %v166_v16  ;;  %v238_v43 = vmax.f32 %v142_v2, %v222_v10  ;;  %v135_v20 = vmax.f32 %v3418_v8, %v3667_v46  ;;  %v138_v46 = vmax.f32 %v3439_v11, %v3687_v52 }
  0xa8   :  { %v228_v44 = vmax.f32 %v132_v41, %v212_v24  ;;  %v3780_v41 = vld [vmem:[#allocation2 + $0xd1] sm:$0xff]  ;;  %v144_v24 = vmax.f32 %v3481_v17, %v3701_v15 }
  0xa9   :  { %v227_v47 = vmax.f32 %v131_v38, %v211_v42  ;;  %297 = vst.msk [vmem:[#allocation2 + $0x101] sm:$0xff] %vm241_vm0, %v238_v43  ;;  %v3714_v48 = vld [vmem:[#allocation2 + $0x11] sm:$0xff]  ;;  %v143_v42 = vmax.f32 %v3450_v12, %v3641_v39  ;;  %v3933_v39 = vld [vmem:[#allocation2 + $0x80] sm:$0xff] }
  0xaa   :  { %287 = vst.msk [vmem:[#allocation2 + $0x41] sm:$0xff] %vm241_vm0, %v228_v44  ;;  %v2649_v4 = vpack.i.bf16 %v3714_v48, %v316_v45  ;;  %v2769_v1 = vpack.i.bf16 %v3718_v13, %v3714_v48  ;;  %v332_v44 = vld [vmem:[#allocation2 + $0x2] sm:$0xff]  ;;  %v3808_v45 = vld [vmem:[#allocation2 + $0x12] sm:$0xff] }
  0xab   :  { %286 = vst.msk [vmem:[#allocation2 + $0x31] sm:$0xff] %vm241_vm0, %v227_v47  ;;  %v3931_v15 = vld [vmem:[#allocation2 + $0xd0] sm:$0xff] }
  0xac   :  { %2650 = vrot.lane.b32.xlu2 %v2649_v4, %s3301_s0 }
  0xad   :  { %v174_v19 = vpop.permute.xlu1 %173 }
  0xae   :  { %v215_v27 = vmax.f32 %v3518_v22, %v174_v19  ;;  %v172_v37 = vpop.permute.xlu0 %171 }
  0xaf   :  { %v214_v49 = vmax.f32 %v3523_v23, %v172_v37 }
  0xb0   :  { %v231_v50 = vmax.f32 %v135_v20, %v215_v27  ;;  %v3810_v4 = vld [vmem:[#allocation2 + $0x101] sm:$0xff] }
  0xb1   :  { %v230_v51 = vmax.f32 %v134_v40, %v214_v49  ;;  %v3731_v53 = vld [vmem:[#allocation2 + $0x41] sm:$0xff]  ;;  %v3833_v40 = vld [vmem:[#allocation2 + $0xd2] sm:$0xff] }
  0xb2   :  { %290 = vst.msk [vmem:[#allocation2 + $0x71] sm:$0xff] %vm241_vm0, %v231_v50  ;;  %v3738_v8 = vpack.i.bf16 %v3733_v54, %v3731_v53  ;;  %v3740_v22 = vld [vmem:[#allocation2 + $0x31] sm:$0xff]  ;;  %v3816_v17 = vld [vmem:[#allocation2 + $0x102] sm:$0xff] }
  0xb3   :  { %289 = vst.msk [vmem:[#allocation2 + $0x61] sm:$0xff] %vm241_vm0, %v230_v51  ;;  %v3744_v3 = vpack.i.bf16 %v3740_v22, %v3718_v13  ;;  %v2774_v33 = vpack.i.bf16 %v3731_v53, %v3740_v22  ;;  %v3945_v49 = vld [vmem:[#allocation2 + $0x100] sm:$0xff] }
  0xb4   :  { %2660 = vrot.lane.b32.xlu1 %v3738_v8, %s3301_s0 }
  0xb5   :  { %v180_v23 = vpop.permute.xlu1 %179  ;;  %2655 = vrot.lane.b32.xlu0 %v3744_v3, %s3301_s0 }
  0xb6   :  { %v218_v55 = vmax.f32 %v3539_v25, %v180_v23  ;;  %v178_v56 = vpop.permute.xlu0 %177 }
  0xb7   :  { %v217_v59 = vmax.f32 %v3544_v26, %v178_v56  ;;  %v141_v26 = vmax.f32 %v3460_v14, %v3694_v58  ;;  %v334_v56 = vld [vmem:[#allocation2 + $0x22] sm:$0xff] }
  0xb8   :  { %v234_v60 = vmax.f32 %v138_v46, %v218_v55  ;;  %v3846_v46 = vld [vmem:[#allocation2 + $0x32] sm:$0xff]  ;;  %v2779_v50 = vpack.i.bf16 %v334_v56, %v3808_v45 }
  0xb9   :  { %v233_v61 = vmax.f32 %v137_v57, %v217_v59  ;;  %v3758_v62 = vld [vmem:[#allocation2 + $0x71] sm:$0xff]  ;;  %v2694_v59 = vpack.i.bf16 %v3846_v46, %v334_v56 }
  0xba   :  { %293 = vst.msk [vmem:[#allocation2 + $0xc1] sm:$0xff] %vm241_vm0, %v234_v60  ;;  %v3761_v63 = vld [vmem:[#allocation2 + $0x61] sm:$0xff]  ;;  %v3844_v23 = vld [vmem:[#allocation2 + $0x72] sm:$0xff] }
  0xbb   :  { %292 = vst.msk [vmem:[#allocation2 + $0xb1] sm:$0xff] %vm241_vm0, %v233_v61  ;;  %v3766_v11 = vpack.i.bf16 %v3758_v62, %v3761_v63  ;;  %v3842_v51 = vld [vmem:[#allocation2 + $0x62] sm:$0xff]  ;;  %v3927_v58 = vld [vmem:[#allocation2 + $0x70] sm:$0xff] }
  0xbc   :  { %v3850_v55 = vpack.i.bf16 %v3844_v23, %v3842_v51  ;;  %v340_v61 = vld [vmem:[#allocation2 + $0xa2] sm:$0xff] }
  0xbd   :  { %2665 = vrot.lane.b32.xlu2 %v3766_v11, %s3301_s0  ;;  %v186_v6 = vpop.permute.xlu1 %185 }
  0xbe   :  { %v221_v35 = vmax.f32 %v3560_v28, %v186_v6  ;;  %v184_v52 = vpop.permute.xlu0 %183  ;;  %v336_v6 = vld [vmem:[#allocation2 + $0x42] sm:$0xff] }
  0xbf   :  { %v220_v5 = vmax.f32 %v3565_v29, %v184_v52 }
  0xc0   :  { %v237_v7 = vmax.f32 %v141_v26, %v221_v35  ;;  %v3868_v35 = vld [vmem:[#allocation2 + $0x52] sm:$0xff] }
  0xc1   :  { %v236_v21 = vmax.f32 %v140_v0, %v220_v5  ;;  %v3778_v32 = vld [vmem:[#allocation2 + $0xc1] sm:$0xff]  ;;  %v3872_v0 = vpack.i.bf16 %v3868_v35, %v336_v6  ;;  %v3879_v5 = vld [vmem:[#allocation2 + $0x30] sm:$0xff]  ;;  %v2824_v48 = vpack.i.bf16 %v3842_v51, %v3868_v35 }
  0xc2   :  { %v3782_v2 = vld [vmem:[#allocation2 + $0xc2] sm:$0xff]  ;;  %296 = vst.msk [vmem:[#allocation2 + $0xf1] sm:$0xff] %vm241_vm0, %v237_v7  ;;  %v3787_v14 = vpack.i.bf16 %v3780_v41, %v3778_v32  ;;  %v3789_v28 = vld [vmem:[#allocation2 + $0xb1] sm:$0xff] }
  0xc3   :  { %v3791_v9 = vld [vmem:[#allocation2 + $0xb2] sm:$0xff]  ;;  %295 = vst.msk [vmem:[#allocation2 + $0xe1] sm:$0xff] %vm241_vm0, %v236_v21  ;;  %v2669_v29 = vpack.i.bf16 %v3789_v28, %v324_v18  ;;  %v3881_v7 = vld [vmem:[#allocation2 + $0x40] sm:$0xff] }
  0xc4   :  { %2675 = vrot.lane.b32.xlu1 %v3787_v14, %s3301_s0  ;;  %v2709_v52 = vpack.i.bf16 %v3791_v9, %v340_v61  ;;  %v2734_v21 = vpack.i.bf16 %v3881_v7, %v3879_v5 }
  0xc5   :  { %2670 = vrot.lane.b32.xlu0 %v2669_v29, %s3301_s0  ;;  %v192_v10 = vpop.permute.xlu1 %191 }
  0xc6   :  { %v224_v16 = vmax.f32 %v3576_v30, %v192_v10  ;;  %v190_v38 = vpop.permute.xlu0 %189  ;;  %v2689_v30 = vpack.i.bf16 %v3808_v45, %v332_v44  ;;  %v3893_v10 = vpack.i.bf16 %v3833_v40, %v3782_v2  ;;  %v3910_v44 = vld [vmem:[#allocation2 + $0x50] sm:$0xff]  ;;  %v2799_v45 = vpack.i.bf16 %v336_v6, %v3846_v46 }
  0xc7   :  { %v223_v43 = vmax.f32 %v3581_v31, %v190_v38  ;;  %v3904_v38 = vld [vmem:[#allocation2 + $0x60] sm:$0xff]  ;;  %v2804_v13 = vpack.i.bf16 %v3910_v44, %v3881_v7 }
  0xc8   :  { %v240_v47 = vmax.f32 %v144_v24, %v224_v16  ;;  %v3900_v24 = vld [vmem:[#allocation2 + $0xb0] sm:$0xff]  ;;  %v3902_v16 = vld [vmem:[#allocation2 + $0xc0] sm:$0xff]  ;;  %v2829_v53 = vpack.i.bf16 %v3927_v58, %v3904_v38 }
  0xc9   :  { %v239_v19 = vmax.f32 %v143_v42, %v223_v43  ;;  %v3812_v20 = vld [vmem:[#allocation2 + $0xf1] sm:$0xff]  ;;  %v2749_v43 = vpack.i.bf16 %v3902_v16, %v3900_v24 }
  0xca   :  { %v3814_v27 = vld [vmem:[#allocation2 + $0xf2] sm:$0xff]  ;;  %299 = vst.msk [vmem:[#allocation2 + $0x121] sm:$0xff] %vm241_vm0, %v240_v47  ;;  %v3820_v12 = vld [vmem:[#allocation2 + $0xe1] sm:$0xff] }
  0xcb   :  { %v3822_v31 = vld [vmem:[#allocation2 + $0xe2] sm:$0xff]  ;;  %298 = vst.msk [vmem:[#allocation2 + $0x111] sm:$0xff] %vm241_vm0, %v239_v19  ;;  %v3831_v37 = vpack.i.bf16 %v3812_v20, %v3820_v12  ;;  %v3906_v42 = vld [vmem:[#allocation2 + $0x10] sm:$0xff]  ;;  %v2739_v19 = vpack.i.bf16 %v3904_v38, %v3910_v44 }
  0xcc   :  { %2690 = vrot.lane.b32.xlu1 %v2689_v30, %s3302_s15  ;;  %v3866_v26 = vpack.i.bf16 %v3814_v27, %v3822_v31  ;;  %v3912_v47 = vld [vmem:[#allocation2 + $0x20] sm:$0xff] }
  0xcd   :  { %2680 = vrot.lane.b32.xlu2 %v3831_v37, %s3301_s0  ;;  %v2729_v30 = vpack.i.bf16 %v3912_v47, %v3906_v42 }
  0xd2   :  { %v3852_v57 = vld [vmem:[#allocation2 + $0x111] sm:$0xff] }
  0xd3   :  { %v3857_v60 = vpack.i.bf16 %v3852_v57, %v3810_v4  ;;  %v3883_v18 = vld [vmem:[#allocation2 + $0x112] sm:$0xff] }
  0xd4   :  { %2705 = vrot.lane.b32.xlu1 %v3850_v55, %s3302_s15  ;;  %v3889_v29 = vpack.i.bf16 %v3883_v18, %v3816_v17  ;;  %v3921_v61 = vld [vmem:[#allocation2 + $0x110] sm:$0xff] }
  0xd5   :  { %2695 = vrot.lane.b32.xlu2 %v2694_v59, %s3302_s15  ;;  %2685 = vrot.lane.b32.xlu0 %v3857_v60, %s3301_s0 }
  0xdc   :  { %2720 = vrot.lane.b32.xlu1 %v3866_v26, %s3302_s15 }
  0xdd   :  { %2710 = vrot.lane.b32.xlu2 %v2709_v52, %s3302_s15  ;;  %2700 = vrot.lane.b32.xlu0 %v3872_v0, %s3302_s15  ;;  %v3923_v52 = vld [vmem:[#allocation2 + $0x120] sm:$0xff] }
  0xde   :  { %v2764_v36 = vpack.i.bf16 %v3923_v52, %v3921_v61 }
  0xe4   :  { %2735 = vrot.lane.b32.xlu1 %v2734_v21, %s3303_s13  ;;  %v3925_v21 = vld [vmem:[#allocation2 + $0xe0] sm:$0xff] }
  0xe5   :  { %2725 = vrot.lane.b32.xlu2 %v3889_v29, %s3302_s15  ;;  %2715 = vrot.lane.b32.xlu0 %v3893_v10, %s3302_s15 }
  0xec   :  { %2750 = vrot.lane.b32.xlu1 %v2749_v43, %s3303_s13  ;;  %v2754_v43 = vpack.i.bf16 %v3925_v21, %v3931_v15 }
  0xed   :  { %2740 = vrot.lane.b32.xlu2 %v2739_v19, %s3303_s13  ;;  %2730 = vrot.lane.b32.xlu0 %v2729_v30, %s3303_s13  ;;  %v2744_v19 = vpack.i.bf16 %v3933_v39, %v3927_v58  ;;  %v3942_v30 = vld [vmem:[#allocation2 + $0xf0] sm:$0xff] }
  0xee   :  { %v2759_v25 = vpack.i.bf16 %v3945_v49, %v3942_v30 }
  0xf4   :  { %2765 = vrot.lane.b32.xlu1 %v2764_v36, %s3303_s13  ;;  %v2784_v36 = vpack.i.bf16 %v3879_v5, %v3912_v47 }
  0xf5   :  { %2755 = vrot.lane.b32.xlu2 %v2754_v43, %s3303_s13  ;;  %2745 = vrot.lane.b32.xlu0 %v2744_v19, %s3303_s13  ;;  %v308_v43 = vld [vmem:[#allocation2 + $0xa0] sm:$0xff] }
  0xfc   :  { %2780 = vrot.lane.b32.xlu1 %v2779_v50, %s3304_s14 }
  0xfd   :  { %2770 = vrot.lane.b32.xlu2 %v2769_v1, %s3305_s16  ;;  %2760 = vrot.lane.b32.xlu0 %v2759_v25, %s3303_s13 }
 0x104   :  { %2795 = vrot.lane.b32.xlu1 %v2694_v59, %s3306_s17 }
 0x105   :  { %2785 = vrot.lane.b32.xlu2 %v2784_v36, %s3307_s18  ;;  %2775 = vrot.lane.b32.xlu0 %v2774_v33, %s3305_s16 }
 0x106   :  { %v3995_v1 = vpop.permute.xlu2 %2650 }
 0x10c   :  { %2810 = vrot.lane.b32.xlu1 %v3738_v8, %s3308_s19  ;;  %v5383_v8 = vpack.i.bf16 %v3761_v63, %v3733_v54  ;;  %v2854_v54 = vpack.i.bf16 %v3942_v30, %v3925_v21  ;;  %v371_v63 = vld [vmem:[#allocation2 + $0x81] sm:$0xff] }
 0x10d   :  { %2800 = vrot.lane.b32.xlu2 %v2799_v45, %s3304_s14  ;;  %2790 = vrot.lane.b32.xlu0 %v3744_v3, %s3308_s19  ;;  %v5384_v3 = vpack.i.bf16 %v3820_v12, %v3780_v41  ;;  %v2869_v50 = vpack.i.bf16 %v371_v63, %v3758_v62  ;;  %v5385_v41 = vpack.i.bf16 %v3822_v31, %v3833_v40  ;;  %v387_v40 = vld [vmem:[#allocation2 + $0x82] sm:$0xff] }
 0x114   :  { %2825 = vrot.lane.b32.xlu1 %v2824_v48, %s3304_s14 }
 0x115   :  { %2815 = vrot.lane.b32.xlu2 %v3872_v0, %s3306_s17  ;;  %2805 = vrot.lane.b32.xlu0 %v2804_v13, %s3307_s18  ;;  %v2874_v0 = vpack.i.bf16 %v387_v40, %v3844_v23 }
 0x117   :  { %v4022_v22 = vpop.permute.xlu2 %2665 }
 0x11c   :  { %2840 = vrot.lane.b32.xlu1 %v3850_v55, %s3306_s17  ;;  %v420_v55 = vld [vmem:[#allocation2 + $0x91] sm:$0xff] }
 0x11d   :  { %2830 = vrot.lane.b32.xlu2 %v2829_v53, %s3307_s18  ;;  %2820 = vrot.lane.b32.xlu0 %v5383_v8, %s3305_s16  ;;  %v2884_v31 = vpack.i.bf16 %v420_v55, %v371_v63  ;;  %v436_v53 = vld [vmem:[#allocation2 + $0x92] sm:$0xff] }
 0x11e   :  { %v404_v8 = vld [vmem:[#allocation2 + $0x90] sm:$0xff] }
 0x11f   :  { %v2879_v63 = vpack.i.bf16 %v404_v8, %v3933_v39  ;;  %v2904_v39 = vpack.i.bf16 %v3921_v61, %v3945_v49 }
 0x124   :  { %2855 = vrot.lane.b32.xlu1 %v2854_v54, %s3307_s18 }
 0x125   :  { %2845 = vrot.lane.b32.xlu2 %v5384_v3, %s3305_s16  ;;  %2835 = vrot.lane.b32.xlu0 %v3766_v11, %s3308_s19  ;;  %v2889_v3 = vpack.i.bf16 %v436_v53, %v387_v40 }
 0x126   :  { %v4049_v12 = vpop.permute.xlu1 %2660 }
 0x127   :  { %v4039_v33 = vpop.permute.xlu2 %2680  ;;  %v2656_v25 = vpop.permute.xlu0 %2655 }
 0x128   :  { %v2658_v51 = vunpack.i.h.bf16 %v2656_v25  ;;  %v2657_v46 = vunpack.i.l.bf16 %v2656_v25 }
 0x12a   :  { %v960_v62 = vsel %vm241_vm0, %v3879_v5, %v2658_v51  ;;  %v959_v6 = vsel %vm241_vm0, %v3912_v47, %v2657_v46  ;;  %v2668_v46 = vunpack.i.h.bf16 %v4022_v22 }
 0x12c   :  { %2870 = vrot.lane.b32.xlu1 %v2869_v50, %s3305_s16  ;;  %v5386_v50 = vpack.i.bf16 %v3816_v17, %v3814_v27  ;;  %v5387_v27 = vpack.i.bf16 %v3810_v4, %v3812_v20 }
 0x12d   :  { %2860 = vrot.lane.b32.xlu2 %v3831_v37, %s3308_s19  ;;  %2850 = vrot.lane.b32.xlu0 %v5385_v41, %s3304_s14  ;;  %v2667_v41 = vunpack.i.l.bf16 %v4022_v22 }
 0x12f   :  { %v2696_v11 = vpop.permute.xlu2 %2695  ;;  %v963_v22 = vsel %vm241_vm0, %v3904_v38, %v2667_v41 }
 0x130   :  { %v2698_v56 = vunpack.i.h.bf16 %v2696_v11  ;;  %v2697_v59 = vunpack.i.l.bf16 %v2696_v11 }
 0x132   :  { %v4056_v35 = vsel %vm973_vm2, %v959_v6, %v2697_v59  ;;  %v4059_v37 = vsel %vm973_vm2, %v960_v62, %v2698_v56  ;;  %v964_v62 = vsel %vm241_vm0, %v3927_v58, %v2668_v46  ;;  %v2929_v58 = vpack.i.bf16 %v3931_v15, %v3902_v16 }
 0x134   :  { %2885 = vrot.lane.b32.xlu1 %v2884_v31, %s3308_s19 }
 0x135   :  { %2875 = vrot.lane.b32.xlu2 %v2874_v0, %s3304_s14  ;;  %2865 = vrot.lane.b32.xlu0 %v3866_v26, %s3306_s17 }
 0x136   :  { %v4066_v5 = vpop.permute.xlu1 %2675 }
 0x137   :  { %v2711_v47 = vpop.permute.xlu2 %2710  ;;  %v2671_v19 = vpop.permute.xlu0 %2670 }
 0x138   :  { %v2713_v36 = vunpack.i.h.bf16 %v2711_v47  ;;  %v2712_v45 = vunpack.i.l.bf16 %v2711_v47  ;;  %v2673_v48 = vunpack.i.h.bf16 %v2671_v19  ;;  %v2672_v13 = vunpack.i.l.bf16 %v2671_v19 }
 0x139   :  { %v2683_v19 = vunpack.i.h.bf16 %v4039_v33 }
 0x13a   :  { %v966_v23 = vsel %vm241_vm0, %v3900_v24, %v2673_v48  ;;  %v965_v54 = vsel %vm241_vm0, %v308_v43, %v2672_v13 }
 0x13b   :  { %v4073_v26 = vsel %vm973_vm2, %v965_v54, %v2712_v45  ;;  %v4076_v25 = vsel %vm973_vm2, %v966_v23, %v2713_v36  ;;  %v2682_v36 = vunpack.i.l.bf16 %v4039_v33  ;;  %v2662_v45 = vunpack.i.l.bf16 %v4049_v12  ;;  %v379_v23 = vld [vmem:[#allocation2 + $0x121] sm:$0xff] }
 0x13c   :  { %2900 = vrot.lane.b32.xlu1 %v5386_v50, %s3304_s14  ;;  %v970_v54 = vsel %vm241_vm0, %v3942_v30, %v2683_v19  ;;  %v412_v19 = vld [vmem:[#allocation2 + $0x130] sm:$0xff] }
 0x13d   :  { %2890 = vrot.lane.b32.xlu2 %v2889_v3, %s3306_s17  ;;  %2880 = vrot.lane.b32.xlu0 %v2879_v63, %s3307_s18 }
 0x13e   :  { %v4084_v24 = vpop.permute.xlu1 %2690 }
 0x13f   :  { %v2726_v51 = vpop.permute.xlu2 %2725 }
 0x140   :  { %v2728_v31 = vunpack.i.h.bf16 %v2726_v51  ;;  %v2727_v40 = vunpack.i.l.bf16 %v2726_v51 }
 0x144   :  { %2915 = vrot.lane.b32.xlu1 %v3889_v29, %s3306_s17 }
 0x145   :  { %2905 = vrot.lane.b32.xlu2 %v2904_v39, %s3307_s18  ;;  %2895 = vrot.lane.b32.xlu0 %v5387_v27, %s3305_s16  ;;  %v5389_v39 = vpack.i.bf16 %v3782_v2, %v3791_v9 }
 0x146   :  { %v2706_v17 = vpop.permute.xlu1 %2705 }
 0x147   :  { %v2708_v11 = vunpack.i.h.bf16 %v2706_v17  ;;  %v2707_v55 = vunpack.i.l.bf16 %v2706_v17  ;;  %v4097_v56 = vpop.permute.xlu2 %2740  ;;  %v2686_v59 = vpop.permute.xlu0 %2685  ;;  %v1104_v17 = vld [vmem:[%s5374_s1 + $0x10] sm:$0x3] }
 0x148   :  { %v2688_v29 = vunpack.i.h.bf16 %v2686_v59  ;;  %v2687_v6 = vunpack.i.l.bf16 %v2686_v59  ;;  %v1118_v9 = vunpack.c.l.b16 %v1104_v17 }
 0x149   :  { %v4104_v0 = vsel %vm973_vm2, %v963_v22, %v2707_v55  ;;  %v4107_v4 = vsel %vm973_vm2, %v964_v62, %v2708_v11  ;;  %v395_v55 = vld [vmem:[#allocation2 + $0x122] sm:$0xff] }
 0x14a   :  { %v972_v20 = vsel %vm241_vm0, %v3921_v61, %v2688_v29  ;;  %v971_v47 = vsel %vm241_vm0, %v3945_v49, %v2687_v6  ;;  %v2663_v61 = vunpack.i.h.bf16 %v4049_v12  ;;  %v5388_v49 = vpack.i.bf16 %v3778_v32, %v3789_v28 }
 0x14b   :  { %v4116_v38 = vsel %vm973_vm2, %v971_v47, %v2727_v40  ;;  %v4119_v43 = vsel %vm973_vm2, %v972_v20, %v2728_v31  ;;  %v969_v12 = vsel %vm241_vm0, %v3925_v21, %v2682_v36  ;;  %v961_v28 = vsel %vm241_vm0, %v3881_v7, %v2662_v45  ;;  %v2622_v31 = vld [vmem:[%s5374_s1 + $0x8] sm:$0xff] }
 0x14c   :  { %2930 = vrot.lane.b32.xlu1 %v2929_v58, %s3307_s18  ;;  %v962_v32 = vsel %vm241_vm0, %v3910_v44, %v2663_v61  ;;  %v2944_v21 = vpack.i.bf16 %v379_v23, %v3852_v57  ;;  %v2678_v44 = vunpack.i.h.bf16 %v4066_v5  ;;  %v2677_v7 = vunpack.i.l.bf16 %v4066_v5  ;;  %v428_v57 = vld [vmem:[#allocation2 + $0x131] sm:$0xff]  ;;  %v2621_v61 = vld [vmem:[%s5374_s1] sm:$0xff] }
 0x14d   :  { %2920 = vrot.lane.b32.xlu2 %v5388_v49, %s3305_s16  ;;  %2910 = vrot.lane.b32.xlu0 %v3857_v60, %s3308_s19  ;;  %v2959_v22 = vpack.i.bf16 %v428_v57, %v379_v23  ;;  %v2949_v29 = vpack.i.bf16 %v395_v55, %v3883_v18  ;;  %v1121_v6 = vpack.c.b16 %v1118_v9, %v1118_v9  ;;  %v444_v58 = vld [vmem:[#allocation2 + $0x132] sm:$0xff] }
 0x14e   :  { %v2721_v48 = vpop.permute.xlu1 %2720  ;;  %v967_v2 = vsel %vm241_vm0, %v3902_v16, %v2677_v7  ;;  %v2964_v45 = vpack.i.bf16 %v444_v58, %v395_v55  ;;  %v2954_v49 = vpack.i.bf16 %v412_v19, %v3923_v52  ;;  %v2652_v7 = vunpack.i.l.bf16 %v3995_v1 }
 0x14f   :  { %v2723_v13 = vunpack.i.h.bf16 %v2721_v48  ;;  %v2722_v53 = vunpack.i.l.bf16 %v2721_v48  ;;  %v4132_v8 = vpop.permute.xlu2 %2755  ;;  %v2701_v33 = vpop.permute.xlu0 %2700 }
 0x150   :  { %v2703_v3 = vunpack.i.h.bf16 %v2701_v33  ;;  %v2702_v63 = vunpack.i.l.bf16 %v2701_v33 }
 0x151   :  { %v4143_v60 = vsel %vm973_vm2, %v969_v12, %v2722_v53  ;;  %v4146_v50 = vsel %vm973_vm2, %v970_v54, %v2723_v13 }
 0x152   :  { %v4149_v51 = vsel %vm973_vm2, %v962_v32, %v2703_v3  ;;  %v4152_v30 = vsel %vm973_vm2, %v961_v28, %v2702_v63 }
 0x154   :  { %2945 = vrot.lane.b32.xlu1 %v2944_v21, %s3305_s16 }
 0x155   :  { %2935 = vrot.lane.b32.xlu2 %v3787_v14, %s3308_s19  ;;  %2925 = vrot.lane.b32.xlu0 %v5389_v39, %s3304_s14  ;;  %v968_v14 = vsel %vm241_vm0, %v3931_v15, %v2678_v44  ;;  %v1151_v15 = vsel %vm1149_vm3, %v1121_v6, 0  ;;  %v2693_v39 = vunpack.i.h.bf16 %v4084_v24  ;;  %vm2208_vm3 = vcmask 457728  }
 0x156   :  { %v4164_v46 = vpop.permute.xlu1 %2735  ;;  %1158 = vmatpush.bf16.msra.mxu0 %v1151_v15  ;;  %2627 = vmatpush.bf16.msra.mxu3 %v1151_v15 }
 0x157   :  { %v4166_v41 = vpop.permute.xlu2 %2770  ;;  %v2716_v27 = vpop.permute.xlu0 %2715  ;;  %v2737_v19 = vunpack.i.l.bf16 %v4164_v46 }
 0x158   :  { %v2718_v11 = vunpack.i.h.bf16 %v2716_v27  ;;  %v2717_v5 = vunpack.i.l.bf16 %v2716_v27  ;;  %v2692_v27 = vunpack.i.l.bf16 %v4084_v24 }
 0x15a   :  { %v4176_v59 = vsel %vm973_vm2, %v968_v14, %v2718_v11  ;;  %v4179_v62 = vsel %vm973_vm2, %v967_v2, %v2717_v5  ;;  %1159 = vmatpush.bf16.msra.mxu0 %v2622_v31  ;;  %2628 = vmatpush.bf16.msra.mxu3 %v2622_v31 }
 0x15c   :  { %2960 = vrot.lane.b32.xlu1 %v2959_v22, %s3308_s19  ;;  %v2773_v22 = vunpack.i.h.bf16 %v4166_v41 }
 0x15d   :  { %2950 = vrot.lane.b32.xlu2 %v2949_v29, %s3304_s14  ;;  %2940 = vrot.lane.b32.xlu0 %v3893_v10, %s3306_s17  ;;  %v2772_v29 = vunpack.i.l.bf16 %v4166_v41 }
 0x15e   :  { %v2751_v16 = vpop.permute.xlu1 %2750  ;;  %1160 = vmatpush.bf16.msra.mxu0 %v2621_v61  ;;  %2629 = vmatpush.bf16.msra.mxu3 %v2621_v61 }
 0x15f   :  { %v2753_v40 = vunpack.i.h.bf16 %v2751_v16  ;;  %v2752_v20 = vunpack.i.l.bf16 %v2751_v16  ;;  %v4189_v47 = vpop.permute.xlu2 %2785  ;;  %v2731_v18 = vpop.permute.xlu0 %2730 }
 0x160   :  { %v2733_v57 = vunpack.i.h.bf16 %v2731_v18  ;;  %v2732_v17 = vunpack.i.l.bf16 %v2731_v18  ;;  %v2788_v18 = vunpack.i.h.bf16 %v4189_v47  ;;  %v2787_v58 = vunpack.i.l.bf16 %v4189_v47 }
 0x161   :  { %v4193_v36 = vsel %vm990_vm4, %v4073_v26, %v2752_v20  ;;  %v4197_v10 = vsel %vm990_vm4, %v4076_v25, %v2753_v40  ;;  %v2738_v20 = vunpack.i.h.bf16 %v4164_v46 }
 0x165   :  { %2965 = vrot.lane.b32.xlu2 %v2964_v45, %s3306_s17  ;;  %2955 = vrot.lane.b32.xlu0 %v2954_v49, %s3307_s18 }
 0x166   :  { %v2766_v48 = vpop.permute.xlu1 %2765 }
 0x167   :  { %v2768_v26 = vunpack.i.h.bf16 %v2766_v48  ;;  %v2767_v13 = vunpack.i.l.bf16 %v2766_v48  ;;  %v2746_v25 = vpop.permute.xlu0 %2745  ;;  %v4213_v52 = vpop.permute.xlu2 %2800 }
 0x168   :  { %v2748_v53 = vunpack.i.h.bf16 %v2746_v25  ;;  %v2747_v33 = vunpack.i.l.bf16 %v2746_v25 }
 0x169   :  { %v4207_v23 = vsel %vm990_vm4, %v4116_v38, %v2767_v13  ;;  %v4211_v54 = vsel %vm990_vm4, %v4119_v43, %v2768_v26 }
 0x16a   :  { %v4217_v12 = vsel %vm990_vm4, %v4107_v4, %v2748_v53  ;;  %v4221_v3 = vsel %vm990_vm4, %v4104_v0, %v2747_v33  ;;  %v2653_v4 = vunpack.i.h.bf16 %v3995_v1  ;;  %v300_v0 = vld [vmem:[#allocation2] sm:$0xff] }
 0x16b   :  { %v957_v5 = vsel %vm241_vm0, %v300_v0, %v2652_v7 }
 0x16c   :  { %v974_v14 = vsel %vm973_vm2, %v957_v5, %v2692_v27  ;;  %v2802_v27 = vunpack.i.l.bf16 %v4213_v52 }
 0x16d   :  { %v991_v2 = vsel %vm990_vm4, %v974_v14, %v2732_v17 }
 0x16e   :  { %v2781_v63 = vpop.permute.xlu1 %2780  ;;  %v1008_v6 = vsel %vm1007_vm5, %v991_v2, %v2772_v29 }
 0x16f   :  { %v2761_v32 = vpop.permute.xlu0 %2760  ;;  %v4231_v44 = vpop.permute.xlu2 %2815  ;;  %v2783_v9 = vunpack.i.h.bf16 %v2781_v63  ;;  %v2782_v24 = vunpack.i.l.bf16 %v2781_v63 }
 0x170   :  { %v2763_v28 = vunpack.i.h.bf16 %v2761_v32  ;;  %v2762_v21 = vunpack.i.l.bf16 %v2761_v32  ;;  %v2817_v14 = vunpack.i.l.bf16 %v4231_v44 }
 0x171   :  { %v1025_v16 = vsel %vm1024_vm6, %v1008_v6, %v2782_v24 }
 0x172   :  { %v4225_v38 = vsel %vm990_vm4, %v4146_v50, %v2763_v28  ;;  %v4229_v43 = vsel %vm990_vm4, %v4143_v60, %v2762_v21  ;;  %v958_v60 = vsel %vm241_vm0, %v3906_v42, %v2653_v4  ;;  %v1042_v26 = vsel %vm1041_vm7, %v1025_v16, %v2787_v58 }
 0x173   :  { %v975_v55 = vsel %vm973_vm2, %v958_v60, %v2693_v39  ;;  %v993_v28 = vsel %vm990_vm4, %v4056_v35, %v2737_v19  ;;  %v994_v21 = vsel %vm990_vm4, %v4059_v37, %v2738_v20  ;;  %v2803_v39 = vunpack.i.h.bf16 %v4213_v52 }
 0x174   :  { %v992_v1 = vsel %vm990_vm4, %v975_v55, %v2733_v57  ;;  %v2818_v55 = vunpack.i.h.bf16 %v4231_v44  ;;  %v2743_v16 = vunpack.i.h.bf16 %v4097_v56  ;;  %vm2174_vm0 = vcmask 326656  }
 0x175   :  { %v1009_v42 = vsel %vm1007_vm5, %v992_v1, %v2773_v22 }
 0x176   :  { %v2796_v11 = vpop.permute.xlu1 %2795  ;;  %v1026_v31 = vsel %vm1024_vm6, %v1009_v42, %v2783_v9  ;;  %v996_v58 = vsel %vm990_vm4, %v4149_v51, %v2743_v16 }
 0x177   :  { %v2776_v50 = vpop.permute.xlu0 %2775  ;;  %v4248_v15 = vpop.permute.xlu2 %2830  ;;  %v2798_v49 = vunpack.i.h.bf16 %v2796_v11  ;;  %v2797_v48 = vunpack.i.l.bf16 %v2796_v11  ;;  %v1043_v13 = vsel %vm1041_vm7, %v1026_v31, %v2788_v18  ;;  %v2742_v31 = vunpack.i.l.bf16 %v4097_v56 }
 0x178   :  { %v2778_v25 = vunpack.i.h.bf16 %v2776_v50  ;;  %v2777_v53 = vunpack.i.l.bf16 %v2776_v50 }
 0x179   :  { %v995_v18 = vsel %vm990_vm4, %v4152_v30, %v2742_v31  ;;  %v2832_v30 = vunpack.i.l.bf16 %v4248_v15 }
 0x17a   :  { %v1010_v4 = vsel %vm1007_vm5, %v993_v28, %v2777_v53  ;;  %v1011_v7 = vsel %vm1007_vm5, %v994_v21, %v2778_v25 }
 0x17b   :  { %v1027_v60 = vsel %vm1024_vm6, %v1010_v4, %v2802_v27  ;;  %v1028_v37 = vsel %vm1024_vm6, %v1011_v7, %v2803_v39  ;;  %v2758_v27 = vunpack.i.h.bf16 %v4132_v8 }
 0x17e   :  { %v2811_v40 = vpop.permute.xlu1 %2810 }
 0x17f   :  { %v2791_v41 = vpop.permute.xlu0 %2790  ;;  %v2846_v57 = vpop.permute.xlu2 %2845  ;;  %v2813_v5 = vunpack.i.h.bf16 %v2811_v40  ;;  %v2812_v35 = vunpack.i.l.bf16 %v2811_v40 }
 0x180   :  { %v2793_v61 = vunpack.i.h.bf16 %v2791_v41  ;;  %v2792_v45 = vunpack.i.l.bf16 %v2791_v41 }
 0x182   :  { %v1059_v33 = vsel %vm1058_vm8, %v1042_v26, %v2792_v45  ;;  %v1060_v63 = vsel %vm1058_vm8, %v1043_v13, %v2793_v61  ;;  %v2833_v26 = vunpack.i.h.bf16 %v4248_v15  ;;  %v2848_v15 = vunpack.i.h.bf16 %v2846_v57 }
 0x183   :  { %v1076_v47 = vsel %vm1075_vm9, %v1059_v33, %v2797_v48  ;;  %v1077_v32 = vsel %vm1075_vm9, %v1060_v63, %v2798_v49 }
 0x184   :  { %v1092_v46 = vpack.c.bf16 %v1077_v32, %v1076_v47 }
 0x186   :  { %2589 = vmatmul.msk.bf16.vlgmr.msra.gmra.mxu0 %vm1124_vm10, %v1092_v46  ;;  %v2826_v0 = vpop.permute.xlu1 %2825 }
 0x187   :  { %v2806_v17 = vpop.permute.xlu0 %2805  ;;  %v2861_v20 = vpop.permute.xlu2 %2860  ;;  %v2828_v61 = vunpack.i.h.bf16 %v2826_v0  ;;  %v2827_v45 = vunpack.i.l.bf16 %v2826_v0  ;;  %v2847_v0 = vunpack.i.l.bf16 %v2846_v57 }
 0x188   :  { %v2808_v11 = vunpack.i.h.bf16 %v2806_v17  ;;  %v2807_v50 = vunpack.i.l.bf16 %v2806_v17  ;;  %v2757_v17 = vunpack.i.l.bf16 %v4132_v8 }
 0x18a   :  { %v1044_v1 = vsel %vm1041_vm7, %v1027_v60, %v2807_v50  ;;  %v1045_v2 = vsel %vm1041_vm7, %v1028_v37, %v2808_v11  ;;  %v1002_v60 = vsel %vm990_vm4, %v4176_v59, %v2758_v27  ;;  %v2862_v59 = vunpack.i.l.bf16 %v2861_v20 }
 0x18b   :  { %v1061_v52 = vsel %vm1058_vm8, %v1044_v1, %v2812_v35  ;;  %v1062_v9 = vsel %vm1058_vm8, %v1045_v2, %v2813_v5  ;;  %v1001_v35 = vsel %vm990_vm4, %v4179_v62, %v2757_v17  ;;  %vm2225_vm4 = vcmask 523264  }
 0x18c   :  { %v1078_v24 = vsel %vm1075_vm9, %v1061_v52, %v2817_v14  ;;  %v1079_v22 = vsel %vm1075_vm9, %v1062_v9, %v2818_v55  ;;  %v1018_v37 = vsel %vm1007_vm5, %v1001_v35, %v2847_v0  ;;  %v1019_v55 = vsel %vm1007_vm5, %v1002_v60, %v2848_v15 }
 0x18d   :  { %v1093_v29 = vpack.c.bf16 %v1079_v22, %v1078_v24  ;;  %v2863_v24 = vunpack.i.h.bf16 %v2861_v20 }
 0x18e   :  { %v2841_v6 = vpop.permute.xlu1 %2840 }
 0x18f   :  { %v2821_v42 = vpop.permute.xlu0 %2820  ;;  %v2843_v53 = vunpack.i.h.bf16 %v2841_v6  ;;  %v2842_v33 = vunpack.i.l.bf16 %v2841_v6  ;;  %v2876_v28 = vpop.permute.xlu2 %2875 }
 0x190   :  { %v2823_v44 = vunpack.i.h.bf16 %v2821_v42  ;;  %v2822_v40 = vunpack.i.l.bf16 %v2821_v42 }
 0x192   :  { %v1012_v41 = vsel %vm1007_vm5, %v995_v18, %v2822_v40  ;;  %v1013_v19 = vsel %vm1007_vm5, %v996_v58, %v2823_v44 }
 0x193   :  { %v1029_v49 = vsel %vm1024_vm6, %v1012_v41, %v2827_v45  ;;  %v1030_v48 = vsel %vm1024_vm6, %v1013_v19, %v2828_v61  ;;  %v2878_v61 = vunpack.i.h.bf16 %v2876_v28  ;;  %v2877_v45 = vunpack.i.l.bf16 %v2876_v28 }
 0x194   :  { %v1046_v63 = vsel %vm1041_vm7, %v1029_v49, %v2832_v30  ;;  %v1047_v47 = vsel %vm1041_vm7, %v1030_v48, %v2833_v26 }
 0x196   :  { %2590 = vmatmul.msk.bf16.gmra.mxu0 %vm1124_vm10, %v1093_v29  ;;  %v2856_v56 = vpop.permute.xlu1 %2855 }
 0x197   :  { %v2836_v13 = vpop.permute.xlu0 %2835  ;;  %v2858_v1 = vunpack.i.h.bf16 %v2856_v56  ;;  %v2857_v2 = vunpack.i.l.bf16 %v2856_v56  ;;  %v2891_v8 = vpop.permute.xlu2 %2890 }
 0x198   :  { %v2838_v25 = vunpack.i.h.bf16 %v2836_v13  ;;  %v2837_v51 = vunpack.i.l.bf16 %v2836_v13 }
 0x19a   :  { %v1063_v32 = vsel %vm1058_vm8, %v1046_v63, %v2837_v51  ;;  %v1064_v46 = vsel %vm1058_vm8, %v1047_v47, %v2838_v25 }
 0x19b   :  { %v1080_v21 = vsel %vm1075_vm9, %v1063_v32, %v2842_v33  ;;  %v1081_v4 = vsel %vm1075_vm9, %v1064_v46, %v2843_v53  ;;  %v2893_v53 = vunpack.i.h.bf16 %v2891_v8  ;;  %v2892_v33 = vunpack.i.l.bf16 %v2891_v8 }
 0x19c   :  { %v1094_v7 = vpack.c.bf16 %v1081_v4, %v1080_v21 }
 0x19e   :  { %v2871_v39 = vpop.permute.xlu1 %2870 }
 0x19f   :  { %v2851_v11 = vpop.permute.xlu0 %2850  ;;  %v2873_v31 = vunpack.i.h.bf16 %v2871_v39  ;;  %v2872_v44 = vunpack.i.l.bf16 %v2871_v39  ;;  %v2906_v49 = vpop.permute.xlu2 %2905 }
 0x1a0   :  { %v2853_v50 = vunpack.i.h.bf16 %v2851_v11  ;;  %v2852_v5 = vunpack.i.l.bf16 %v2851_v11  ;;  %v2908_v35 = vunpack.i.h.bf16 %v2906_v49  ;;  %v2907_v60 = vunpack.i.l.bf16 %v2906_v49 }
 0x1a1   :  { %v1014_v41 = vsel %vm1007_vm5, %v4221_v3, %v2872_v44  ;;  %v1015_v20 = vsel %vm1007_vm5, %v4217_v12, %v2873_v31 }
 0x1a2   :  { %v1035_v57 = vsel %vm1024_vm6, %v1018_v37, %v2852_v5  ;;  %v1036_v14 = vsel %vm1024_vm6, %v1019_v55, %v2853_v50  ;;  %v1031_v25 = vsel %vm1024_vm6, %v1014_v41, %v2877_v45  ;;  %v1032_v51 = vsel %vm1024_vm6, %v1015_v20, %v2878_v61 }
 0x1a3   :  { %v1052_v52 = vsel %vm1041_vm7, %v1035_v57, %v2857_v2  ;;  %v1053_v9 = vsel %vm1041_vm7, %v1036_v14, %v2858_v1 }
 0x1a4   :  { %v1069_v42 = vsel %vm1058_vm8, %v1052_v52, %v2862_v59  ;;  %v1070_v16 = vsel %vm1058_vm8, %v1053_v9, %v2863_v24 }
 0x1a6   :  { %2591 = vmatmul.msk.bf16.gmra.mxu0 %vm1124_vm10, %v1094_v7  ;;  %v2886_v62 = vpop.permute.xlu1 %2885 }
 0x1a7   :  { %v2866_v22 = vpop.permute.xlu0 %2865  ;;  %v2888_v30 = vunpack.i.h.bf16 %v2886_v62  ;;  %v2887_v13 = vunpack.i.l.bf16 %v2886_v62  ;;  %v2921_v0 = vpop.permute.xlu2 %2920 }
 0x1a8   :  { %v2868_v29 = vunpack.i.h.bf16 %v2866_v22  ;;  %v2867_v6 = vunpack.i.l.bf16 %v2866_v22  ;;  %v2923_v22 = vunpack.i.h.bf16 %v2921_v0 }
 0x1aa   :  { %v1086_v40 = vsel %vm1075_vm9, %v1069_v42, %v2867_v6  ;;  %v1087_v18 = vsel %vm1075_vm9, %v1070_v16, %v2868_v29  ;;  %v2922_v29 = vunpack.i.l.bf16 %v2921_v0  ;;  %v1017_v44 = vsel %vm1007_vm5, %v4197_v10, %v2923_v22 }
 0x1ab   :  { %v1097_v58 = vpack.c.bf16 %v1087_v18, %v1086_v40 }
 0x1ac   :  { %v1016_v31 = vsel %vm1007_vm5, %v4193_v36, %v2922_v29 }
 0x1ad   :  { %2594 = vmatmul.msk.bf16.vlgmr.msra.gmra.mxu3 %vm1124_vm10, %v1097_v58 }
 0x1ae   :  { %v2901_v19 = vpop.permute.xlu1 %2900 }
 0x1af   :  { %v2881_v48 = vpop.permute.xlu0 %2880  ;;  %v2903_v17 = vunpack.i.h.bf16 %v2901_v19  ;;  %v2902_v11 = vunpack.i.l.bf16 %v2901_v19  ;;  %v2936_v9 = vpop.permute.xlu2 %2935 }
 0x1b0   :  { %v2883_v56 = vunpack.i.h.bf16 %v2881_v48  ;;  %v2882_v26 = vunpack.i.l.bf16 %v2881_v48  ;;  %v2938_v49 = vunpack.i.h.bf16 %v2936_v9  ;;  %v2937_v48 = vunpack.i.l.bf16 %v2936_v9 }
 0x1b2   :  { %v1048_v3 = vsel %vm1041_vm7, %v1031_v25, %v2882_v26  ;;  %v1049_v63 = vsel %vm1041_vm7, %v1032_v51, %v2883_v56 }
 0x1b3   :  { %v1065_v12 = vsel %vm1058_vm8, %v1048_v3, %v2887_v13  ;;  %v1066_v47 = vsel %vm1058_vm8, %v1049_v63, %v2888_v30 }
 0x1b4   :  { %v1082_v32 = vsel %vm1075_vm9, %v1065_v12, %v2892_v33  ;;  %v1083_v46 = vsel %vm1075_vm9, %v1066_v47, %v2893_v53 }
 0x1b5   :  { %v1095_v28 = vpack.c.bf16 %v1083_v46, %v1082_v32 }
 0x1b6   :  { %v2916_v4 = vpop.permute.xlu1 %2915 }
 0x1b7   :  { %v2896_v21 = vpop.permute.xlu0 %2895  ;;  %2592 = vmatmul.msk.bf16.gmra.mxu0 %vm1124_vm10, %v1095_v28  ;;  %v2918_v14 = vunpack.i.h.bf16 %v2916_v4  ;;  %v2917_v1 = vunpack.i.l.bf16 %v2916_v4  ;;  %v2951_v19 = vpop.permute.xlu2 %2950 }
 0x1b8   :  { %v2898_v7 = vunpack.i.h.bf16 %v2896_v21  ;;  %v2897_v15 = vunpack.i.l.bf16 %v2896_v21  ;;  %v2953_v47 = vunpack.i.h.bf16 %v2951_v19  ;;  %v2952_v32 = vunpack.i.l.bf16 %v2951_v19 }
 0x1ba   :  { %v1020_v39 = vsel %vm1007_vm5, %v4229_v43, %v2897_v15  ;;  %v1021_v27 = vsel %vm1007_vm5, %v4225_v38, %v2898_v7 }
 0x1bb   :  { %v1037_v50 = vsel %vm1024_vm6, %v1020_v39, %v2902_v11  ;;  %v1038_v5 = vsel %vm1024_vm6, %v1021_v27, %v2903_v17 }
 0x1bc   :  { %v1054_v2 = vsel %vm1041_vm7, %v1037_v50, %v2907_v60  ;;  %v1055_v43 = vsel %vm1041_vm7, %v1038_v5, %v2908_v35 }
 0x1be   :  { %v2931_v8 = vpop.permute.xlu1 %2930 }
 0x1bf   :  { %v2911_v37 = vpop.permute.xlu0 %2910  ;;  %v2933_v58 = vunpack.i.h.bf16 %v2931_v8  ;;  %v2932_v41 = vunpack.i.l.bf16 %v2931_v8  ;;  %v2966_v46 = vpop.permute.xlu2 %2965 }
 0x1c0   :  { %v2913_v55 = vunpack.i.h.bf16 %v2911_v37  ;;  %v2912_v57 = vunpack.i.l.bf16 %v2911_v37  ;;  %v2968_v27 = vunpack.i.h.bf16 %v2966_v46  ;;  %v2967_v17 = vunpack.i.l.bf16 %v2966_v46 }
 0x1c2   :  { %v1071_v38 = vsel %vm1058_vm8, %v1054_v2, %v2912_v57  ;;  %v1072_v52 = vsel %vm1058_vm8, %v1055_v43, %v2913_v55 }
 0x1c3   :  { %v1088_v62 = vsel %vm1075_vm9, %v1071_v38, %v2917_v1  ;;  %v1089_v24 = vsel %vm1075_vm9, %v1072_v52, %v2918_v14  ;;  %v4373_v38 = vld [vmem:[%s5375_s2] ss:$0 sm:$0xff] }
 0x1c4   :  { %v1098_v59 = vpack.c.bf16 %v1089_v24, %v1088_v62 }
 0x1c6   :  { %2595 = vmatmul.msk.bf16.gmra.mxu3 %vm1124_vm10, %v1098_v59  ;;  %v2946_v20 = vpop.permute.xlu1 %2945 }
 0x1c7   :  { %v2926_v6 = vpop.permute.xlu0 %2925  ;;  %v2948_v13 = vunpack.i.h.bf16 %v2946_v20  ;;  %v2947_v25 = vunpack.i.l.bf16 %v2946_v20 }
 0x1c8   :  { %v2928_v42 = vunpack.i.h.bf16 %v2926_v6  ;;  %v2927_v16 = vunpack.i.l.bf16 %v2926_v6 }
 0x1c9   :  { %v1022_v3 = vsel %vm1007_vm5, %v4207_v23, %v2947_v25  ;;  %v1023_v63 = vsel %vm1007_vm5, %v4211_v54, %v2948_v13 }
 0x1ca   :  { %v1033_v40 = vsel %vm1024_vm6, %v1016_v31, %v2927_v16  ;;  %v1034_v18 = vsel %vm1024_vm6, %v1017_v44, %v2928_v42  ;;  %v1039_v0 = vsel %vm1024_vm6, %v1022_v3, %v2952_v32  ;;  %v1040_v39 = vsel %vm1024_vm6, %v1023_v63, %v2953_v47 }
 0x1cb   :  { %v1050_v61 = vsel %vm1041_vm7, %v1033_v40, %v2932_v41  ;;  %v1051_v45 = vsel %vm1041_vm7, %v1034_v18, %v2933_v58  ;;  %vm2290_vm6 = vcmask 588800  }
 0x1cc   :  { %v1067_v30 = vsel %vm1058_vm8, %v1050_v61, %v2937_v48  ;;  %v1068_v10 = vsel %vm1058_vm8, %v1051_v45, %v2938_v49 }
 0x1ce   :  { %v2961_v12 = vpop.permute.xlu1 %2960 }
 0x1cf   :  { %v2941_v56 = vpop.permute.xlu0 %2940  ;;  %v2963_v7 = vunpack.i.h.bf16 %v2961_v12  ;;  %v2962_v15 = vunpack.i.l.bf16 %v2961_v12 }
 0x1d0   :  { %v2943_v26 = vunpack.i.h.bf16 %v2941_v56  ;;  %v2942_v36 = vunpack.i.l.bf16 %v2941_v56 }
 0x1d2   :  { %v1084_v51 = vsel %vm1075_vm9, %v1067_v30, %v2942_v36  ;;  %v1085_v53 = vsel %vm1075_vm9, %v1068_v10, %v2943_v26 }
 0x1d3   :  { %v1096_v33 = vpack.c.bf16 %v1085_v53, %v1084_v51 }
 0x1d5   :  { %2593 = vmatmul.msk.bf16.gmra.mxu0 %vm1124_vm10, %v1096_v33 }
 0x1d7   :  { %v2956_v28 = vpop.permute.xlu0 %2955 }
 0x1d8   :  { %v2958_v21 = vunpack.i.h.bf16 %v2956_v28  ;;  %v2957_v4 = vunpack.i.l.bf16 %v2956_v28 }
 0x1da   :  { %v1056_v23 = vsel %vm1041_vm7, %v1039_v0, %v2957_v4  ;;  %v1057_v11 = vsel %vm1041_vm7, %v1040_v39, %v2958_v21 }
 0x1db   :  { %v1073_v54 = vsel %vm1058_vm8, %v1056_v23, %v2962_v15  ;;  %v1074_v50 = vsel %vm1058_vm8, %v1057_v11, %v2963_v7 }
 0x1dc   :  { %v1090_v5 = vsel %vm1075_vm9, %v1073_v54, %v2967_v17  ;;  %v1091_v35 = vsel %vm1075_vm9, %v1074_v50, %v2968_v27 }
 0x1dd   :  { %v1099_v60 = vpack.c.bf16 %v1091_v35, %v1090_v5 }
 0x1df   :  { %2596 = vmatmul.msk.bf16.gmra.mxu3 %vm1124_vm10, %v1099_v60 }
 0x203   :  { %v1162_v37 = vpop.f32.mrf.mxu0 }
 0x204   :  { %v4379_v9 = vadd.f32 %v4373_v38, %v1162_v37 }
 0x206   :  { %v1240_v29 = vmul.f32 %v4379_v9, %v4379_v9  ;;  %v1202_v44 = vsel %vm973_vm2, %v4379_v9, 0.0 }
 0x208   :  { %v1256_v20 = vsel %vm973_vm2, %v1240_v29, 0.0 }
 0x20b   :  { %v1164_v55 = vpop.f32.mrf.mxu0 }
 0x20c   :  { %v4376_v52 = vadd.f32 %v4373_v38, %v1164_v55 }
 0x20e   :  { %v1241_v59 = vmul.f32 %v4376_v52, %v4376_v52  ;;  %v1203_v42 = vsel %vm973_vm2, %v4376_v52, 0.0 }
 0x20f   :  { %v1204_v19 = vadd.f32 %v1203_v42, %v1202_v44 }
 0x210   :  { %v1257_v40 = vsel %vm973_vm2, %v1241_v59, 0.0 }
 0x211   :  { %v1258_v56 = vadd.f32 %v1257_v40, %v1256_v20 }
 0x213   :  { %v1167_v57 = vpop.f32.mrf.mxu0 }
 0x214   :  { %v4382_v62 = vadd.f32 %v4373_v38, %v1167_v57 }
 0x216   :  { %v1242_v16 = vmul.f32 %v4382_v62, %v4382_v62  ;;  %v1205_v18 = vsel %vm973_vm2, %v4382_v62, 0.0 }
 0x217   :  { %v1206_v26 = vadd.f32 %v1205_v18, %v1204_v19 }
 0x218   :  { %v1259_v61 = vsel %vm973_vm2, %v1242_v16, 0.0 }
 0x219   :  { %v1260_v51 = vadd.f32 %v1259_v61, %v1258_v56 }
 0x21b   :  { %v1169_v14 = vpop.f32.mrf.mxu0 }
 0x21c   :  { %v4387_v22 = vadd.f32 %v4373_v38, %v1169_v14 }
 0x21e   :  { %v1243_v58 = vmul.f32 %v4387_v22, %v4387_v22  ;;  %v1207_v45 = vsel %vm973_vm2, %v4387_v22, 0.0 }
 0x21f   :  { %v1208_v53 = vadd.f32 %v1207_v45, %v1206_v26 }
 0x220   :  { %v1261_v30 = vsel %vm973_vm2, %v1243_v58, 0.0 }
 0x221   :  { %v1262_v32 = vadd.f32 %v1261_v30, %v1260_v51 }
 0x223   :  { %v1172_v1 = vpop.f32.mrf.mxu0 }
 0x224   :  { %v4396_v31 = vadd.f32 %v4373_v38, %v1172_v1 }
 0x226   :  { %v1244_v49 = vmul.f32 %v4396_v31, %v4396_v31  ;;  %v1209_v10 = vsel %vm973_vm2, %v4396_v31, 0.0 }
 0x227   :  { %v1210_v46 = vadd.f32 %v1209_v10, %v1208_v53 }
 0x228   :  { %v1263_v3 = vsel %vm973_vm2, %v1244_v49, 0.0 }
 0x229   :  { %v1264_v7 = vadd.f32 %v1263_v3, %v1262_v32 }
 0x22b   :  { %v1174_v2 = vpop.f32.mrf.mxu0 }
 0x22c   :  { %v4406_v41 = vadd.f32 %v4373_v38, %v1174_v2 }
 0x22e   :  { %v1245_v13 = vmul.f32 %v4406_v41, %v4406_v41  ;;  %v1211_v63 = vsel %vm973_vm2, %v4406_v41, 0.0 }
 0x22f   :  { %v1212_v15 = vadd.f32 %v1211_v63, %v1210_v46 }
 0x230   :  { %v1187_v43 = vpop.f32.mrf.mxu3  ;;  %v1265_v28 = vsel %vm973_vm2, %v1245_v13, 0.0 }
 0x231   :  { %v1266_v17 = vadd.f32 %v1265_v28, %v1264_v7  ;;  %v4444_v11 = vadd.f32 %v4373_v38, %v1187_v43 }
 0x233   :  { %v1250_v43 = vmul.f32 %v4444_v11, %v4444_v11  ;;  %v1221_v42 = vsel %vm973_vm2, %v4444_v11, 0.0 }
 0x234   :  { %v1177_v8 = vpop.f32.mrf.mxu0 }
 0x235   :  { %v4415_v48 = vadd.f32 %v4373_v38, %v1177_v8  ;;  %v1275_v58 = vsel %vm973_vm2, %v1250_v43, 0.0 }
 0x237   :  { %v1246_v12 = vmul.f32 %v4415_v48, %v4415_v48  ;;  %v1213_v21 = vsel %vm973_vm2, %v4415_v48, 0.0 }
 0x238   :  { %v1189_v24 = vpop.f32.mrf.mxu3  ;;  %v1214_v23 = vadd.f32 %v1213_v21, %v1212_v15 }
 0x239   :  { %v1267_v0 = vsel %vm973_vm2, %v1246_v12, 0.0  ;;  %v4450_v55 = vadd.f32 %v4373_v38, %v1189_v24 }
 0x23a   :  { %v1268_v5 = vadd.f32 %v1267_v0, %v1266_v17 }
 0x23b   :  { %v1251_v16 = vmul.f32 %v4450_v55, %v4450_v55  ;;  %v1223_v20 = vsel %vm973_vm2, %v4450_v55, 0.0 }
 0x23c   :  { %v1179_v6 = vpop.f32.mrf.mxu0 }
 0x23d   :  { %v4423_v25 = vadd.f32 %v4373_v38, %v1179_v6  ;;  %v1277_v26 = vsel %vm973_vm2, %v1251_v16, 0.0 }
 0x23f   :  { %v1247_v4 = vmul.f32 %v4423_v25, %v4423_v25  ;;  %v1215_v39 = vsel %vm973_vm2, %v4423_v25, 0.0 }
 0x240   :  { %v1216_v35 = vadd.f32 %v1215_v39, %v1214_v23 }
 0x241   :  { %v1269_v54 = vsel %vm973_vm2, %v1247_v4, 0.0 }
 0x242   :  { %v1270_v1 = vadd.f32 %v1269_v54, %v1268_v5 }
 0x249   :  { %v1192_v36 = vpop.f32.mrf.mxu3 }
 0x24a   :  { %v4459_v8 = vadd.f32 %v4373_v38, %v1192_v36 }
 0x24c   :  { %v1252_v19 = vmul.f32 %v4459_v8, %v4459_v8  ;;  %v1225_v36 = vsel %vm973_vm2, %v4459_v8, 0.0 }
 0x24e   :  { %v1279_v13 = vsel %vm973_vm2, %v1252_v19, 0.0 }
 0x251   :  { %v1194_v60 = vpop.f32.mrf.mxu3 }
 0x252   :  { %v1182_v33 = vpop.f32.mrf.mxu0  ;;  %v4476_v61 = vadd.f32 %v4373_v38, %v1194_v60 }
 0x253   :  { %v4431_v47 = vadd.f32 %v4373_v38, %v1182_v33 }
 0x254   :  { %v1253_v51 = vmul.f32 %v4476_v61, %v4476_v61  ;;  %v1227_v3 = vsel %vm973_vm2, %v4476_v61, 0.0 }
 0x255   :  { %v1248_v27 = vmul.f32 %v4431_v47, %v4431_v47  ;;  %v1217_v50 = vsel %vm973_vm2, %v4431_v47, 0.0 }
 0x256   :  { %v1218_v2 = vadd.f32 %v1217_v50, %v1216_v35  ;;  %v1281_v12 = vsel %vm973_vm2, %v1253_v51, 0.0 }
 0x257   :  { %v1271_v57 = vsel %vm973_vm2, %v1248_v27, 0.0 }
 0x258   :  { %v1272_v29 = vadd.f32 %v1271_v57, %v1270_v1 }
 0x25a   :  { %v1184_v37 = vpop.f32.mrf.mxu0 }
 0x25b   :  { %v4454_v14 = vadd.f32 %v4373_v38, %v1184_v37 }
 0x25d   :  { %v1219_v59 = vsel %vm973_vm2, %v4454_v14, 0.0  ;;  %v1249_v24 = vmul.f32 %v4454_v14, %v4454_v14 }
 0x25e   :  { %v1220_v6 = vadd.f32 %v1219_v59, %v1218_v2 }
 0x25f   :  { %v1273_v44 = vsel %vm973_vm2, %v1249_v24, 0.0 }
 0x260   :  { %v1222_v40 = vadd.f32 %v1221_v42, %v1220_v6  ;;  %v1274_v18 = vadd.f32 %v1273_v44, %v1272_v29 }
 0x262   :  { %v1224_v45 = vadd.f32 %v1223_v20, %v1222_v40  ;;  %v1276_v49 = vadd.f32 %v1275_v58, %v1274_v18  ;;  %v1197_v56 = vpop.f32.mrf.mxu3 }
 0x263   :  { %v4485_v53 = vadd.f32 %v4373_v38, %v1197_v56 }
 0x264   :  { %v1278_v30 = vadd.f32 %v1277_v26, %v1276_v49  ;;  %v1226_v10 = vadd.f32 %v1225_v36, %v1224_v45 }
 0x265   :  { %v1254_v32 = vmul.f32 %v4485_v53, %v4485_v53  ;;  %v1229_v21 = vsel %vm973_vm2, %v4485_v53, 0.0 }
 0x266   :  { %v1280_v33 = vadd.f32 %v1279_v13, %v1278_v30  ;;  %v1228_v63 = vadd.f32 %v1227_v3, %v1226_v10 }
 0x267   :  { %v1283_v15 = vsel %vm973_vm2, %v1254_v32, 0.0 }
 0x268   :  { %v1282_v46 = vadd.f32 %v1281_v12, %v1280_v33  ;;  %v1230_v7 = vadd.f32 %v1229_v21, %v1228_v63 }
 0x26a   :  { %v1199_v28 = vpop.f32.mrf.mxu3  ;;  %v1284_v27 = vadd.f32 %v1283_v15, %v1282_v46 }
 0x26b   :  { %v4495_v4 = vadd.f32 %v4373_v38, %v1199_v28 }
 0x26d   :  { %v1231_v0 = vsel %vm973_vm2, %v4495_v4, 0.0  ;;  %v1255_v39 = vmul.f32 %v4495_v4, %v4495_v4 }
 0x26e   :  { %v1232_v17 = vadd.f32 %v1231_v0, %v1230_v7 }
 0x26f   :  { %v1285_v23 = vsel %vm973_vm2, %v1255_v39, 0.0 }
 0x270   :  { %v1233_v54 = vrot.slane %v1232_v17, 4  ;;  %v1286_v50 = vadd.f32 %v1285_v23, %v1284_v27 }
 0x272   :  { %v1234_v5 = vadd.f32 %v1233_v54, %v1232_v17  ;;  %v1287_v35 = vrot.slane %v1286_v50, 4 }
 0x274   :  { %v1235_v60 = vrot.slane %v1234_v5, 2  ;;  %v1288_v38 = vadd.f32 %v1287_v35, %v1286_v50 }
 0x276   :  { %v1236_v37 = vadd.f32 %v1235_v60, %v1234_v5  ;;  %v1289_v57 = vrot.slane %v1288_v38, 2 }
 0x278   :  { %v1237_v1 = vrot.slane %v1236_v37, 1  ;;  %v1290_v2 = vadd.f32 %v1289_v57, %v1288_v38 }
 0x27a   :  { %v1238_v43 = vadd.f32 %v1237_v1, %v1236_v37  ;;  %v1291_v59 = vrot.slane %v1290_v2, 1 }
 0x27c   :  { %v4503_v24 = vmul.f32 0.0078125, %v1238_v43  ;;  %v1292_v29 = vadd.f32 %v1291_v59, %v1290_v2 }
 0x27e   :  { %v1293_v6 = vmul.f32 0.0078125, %v1292_v29  ;;  %v1294_v42 = vmul.f32 %v4503_v24, %v4503_v24  ;;  %v1311_v19 = vsub.f32 %v4495_v4, %v4503_v24  ;;  %v1299_v49 = vsub.f32 %v4387_v22, %v4503_v24 }
 0x27f   :  { %v1300_v56 = vsub.f32 %v4396_v31, %v4503_v24  ;;  %v1297_v26 = vsub.f32 %v4376_v52, %v4503_v24  ;;  %v1298_v36 = vsub.f32 %v4382_v62, %v4503_v24  ;;  %v1296_v30 = vsub.f32 %v4379_v9, %v4503_v24  ;;  %v3290_v52 = vld [vmem:[%s5376_s3] ss:$0 sm:$0xff] }
 0x280   :  { %v1295_v16 = vsub.f32 %v1293_v6, %v1294_v42  ;;  %v1305_v34 = vsub.f32 %v4454_v14, %v4503_v24  ;;  %v1306_v22 = vsub.f32 %v4444_v11, %v4503_v24  ;;  %v1304_v31 = vsub.f32 %v4431_v47, %v4503_v24 }
 0x281   :  { %v1301_v62 = vsub.f32 %v4406_v41, %v4503_v24  ;;  %v1302_v9 = vsub.f32 %v4415_v48, %v4503_v24  ;;  %v1309_v14 = vsub.f32 %v4476_v61, %v4503_v24  ;;  %v1310_v11 = vsub.f32 %v4485_v53, %v4503_v24  ;;  %v4585_v48 = vld [vmem:[%s5377_s4] ss:$0 sm:$0xff]  ;;  %s3309_s4 = smov 40  }
 0x282   :  { %v1312_v44 = vadd.f32 1e-05, %v1295_v16  ;;  %v1307_v47 = vsub.f32 %v4450_v55, %v4503_v24  ;;  %v1308_v51 = vsub.f32 %v4459_v8, %v4503_v24  ;;  %v1303_v33 = vsub.f32 %v4423_v25, %v4503_v24 }
 0x284   :  { %3295 = vrsqrt.f32 %v1312_v44  ;;  %vm1319_vm13 = vweird.f32 %v1312_v44 }
 0x28a   :  { %v3296_v40 = vpop.eup %3295 }
 0x28b   :  { %v1314_v18 = vmul.f32 %v3296_v40, %v1312_v44  ;;  %vm1320_vm12 = vweird.f32 %v3296_v40 }
 0x28c   :  { %vm1321_vm14 = vmor %vm1319_vm13, %vm1320_vm12 }
 0x28d   :  { %v1315_v58 = vmul.f32 %v3296_v40, %v1314_v18 }
 0x28f   :  { %v1316_v20 = vmul.f32 0.5, %v1315_v58 }
 0x291   :  { %v1317_v45 = vsub.f32 1.5, %v1316_v20 }
 0x293   :  { %v1318_v10 = vmul.f32 %v3296_v40, %v1317_v45 }
 0x295   :  { %v1322_v13 = vsel %vm1321_vm14, %v3296_v40, %v1318_v10 }
 0x296   :  { %v1338_v41 = vmul.f32 %v1322_v13, %v1311_v19  ;;  %v1326_v61 = vmul.f32 %v1322_v13, %v1299_v49  ;;  %v1327_v3 = vmul.f32 %v1322_v13, %v1300_v56  ;;  %v1324_v63 = vmul.f32 %v1322_v13, %v1297_v26 }
 0x297   :  { %v1325_v53 = vmul.f32 %v1322_v13, %v1298_v36  ;;  %v1323_v12 = vmul.f32 %v1322_v13, %v1296_v30  ;;  %v1332_v32 = vmul.f32 %v1322_v13, %v1305_v34  ;;  %v1333_v46 = vmul.f32 %v1322_v13, %v1306_v22 }
 0x298   :  { %v1358_v55 = vmul.f32 %v3290_v52, %v1338_v41  ;;  %v1346_v28 = vmul.f32 %v3290_v52, %v1326_v61  ;;  %v1347_v21 = vmul.f32 %v3290_v52, %v1327_v3  ;;  %v1344_v8 = vmul.f32 %v3290_v52, %v1324_v63  ;;  %v1469_v63 = vld [vmem:[#allocation3 + $0x1] sm:$0xff] }
 0x299   :  { %v1345_v4 = vmul.f32 %v3290_v52, %v1325_v53  ;;  %v1343_v7 = vmul.f32 %v3290_v52, %v1323_v12  ;;  %v1352_v25 = vmul.f32 %v3290_v52, %v1332_v32  ;;  %v1353_v15 = vmul.f32 %v3290_v52, %v1333_v46 }
 0x29a   :  { %v1378_v0 = vadd.f32 %v4585_v48, %v1358_v55  ;;  %v1366_v39 = vadd.f32 %v4585_v48, %v1346_v28  ;;  %v1367_v27 = vadd.f32 %v4585_v48, %v1347_v21  ;;  %v1364_v17 = vadd.f32 %v4585_v48, %v1344_v8 }
 0x29b   :  { %v1365_v23 = vadd.f32 %v4585_v48, %v1345_v4  ;;  %v1363_v54 = vadd.f32 %v4585_v48, %v1343_v7  ;;  %v1372_v50 = vadd.f32 %v4585_v48, %v1352_v25  ;;  %v1373_v5 = vadd.f32 %v4585_v48, %v1353_v15  ;;  %v1477_v15 = vld [vmem:[#allocation3 + $0xa1] sm:$0xff] }
 0x29c   :  { %v1394_v35 = vmax.f32 %v1378_v0, 0.0  ;;  %v1382_v60 = vmax.f32 %v1366_v39, 0.0  ;;  %v1383_v38 = vmax.f32 %v1367_v27, 0.0  ;;  %v1380_v37 = vmax.f32 %v1364_v17, 0.0 }
 0x29d   :  { %v1381_v57 = vmax.f32 %v1365_v23, 0.0  ;;  %v1379_v1 = vmax.f32 %v1363_v54, 0.0  ;;  %v1388_v2 = vmax.f32 %v1372_v50, 0.0  ;;  %v1389_v43 = vmax.f32 %v1373_v5, 0.0 }
 0x29e   :  { %1452 = vst.msk [vmem:[#allocation3 + $0x121] sm:$0xff] %vm973_vm2, %v1394_v35  ;;  %v1331_v59 = vmul.f32 %v1322_v13, %v1304_v31  ;;  %v1328_v24 = vmul.f32 %v1322_v13, %v1301_v62  ;;  %v1329_v29 = vmul.f32 %v1322_v13, %v1302_v9  ;;  %v1336_v6 = vmul.f32 %v1322_v13, %v1309_v14 }
 0x29f   :  { %1440 = vst.msk [vmem:[#allocation3 + $0x41] sm:$0xff] %vm973_vm2, %v1382_v60  ;;  %v1337_v42 = vmul.f32 %v1322_v13, %v1310_v11  ;;  %v1334_v16 = vmul.f32 %v1322_v13, %v1307_v47  ;;  %v1335_v44 = vmul.f32 %v1322_v13, %v1308_v51  ;;  %v1330_v40 = vmul.f32 %v1322_v13, %v1303_v33 }
 0x2a0   :  { %1441 = vst.msk [vmem:[#allocation3 + $0x51] sm:$0xff] %vm973_vm2, %v1383_v38  ;;  %v1351_v18 = vmul.f32 %v3290_v52, %v1331_v59  ;;  %v1348_v58 = vmul.f32 %v3290_v52, %v1328_v24  ;;  %v1349_v20 = vmul.f32 %v3290_v52, %v1329_v29  ;;  %v1356_v19 = vmul.f32 %v3290_v52, %v1336_v6 }
 0x2a1   :  { %1438 = vst.msk [vmem:[#allocation3 + $0x21] sm:$0xff] %vm973_vm2, %v1380_v37  ;;  %v1357_v45 = vmul.f32 %v3290_v52, %v1337_v42  ;;  %v1354_v49 = vmul.f32 %v3290_v52, %v1334_v16  ;;  %v1355_v56 = vmul.f32 %v3290_v52, %v1335_v44  ;;  %v1350_v26 = vmul.f32 %v3290_v52, %v1330_v40 }
 0x2a2   :  { %1439 = vst.msk [vmem:[#allocation3 + $0x31] sm:$0xff] %vm973_vm2, %v1381_v57  ;;  %v1371_v36 = vadd.f32 %v4585_v48, %v1351_v18  ;;  %v1368_v30 = vadd.f32 %v4585_v48, %v1348_v58  ;;  %v1369_v34 = vadd.f32 %v4585_v48, %v1349_v20  ;;  %v1376_v10 = vadd.f32 %v4585_v48, %v1356_v19  ;;  %v1485_v57 = vld [vmem:[#allocation3 + $0x2] sm:$0xff] }
 0x2a3   :  { %1437 = vst.msk [vmem:[#allocation3 + $0x11] sm:$0xff] %vm973_vm2, %v1379_v1  ;;  %v1377_v22 = vadd.f32 %v4585_v48, %v1357_v45  ;;  %v1374_v31 = vadd.f32 %v4585_v48, %v1354_v49  ;;  %v1375_v14 = vadd.f32 %v4585_v48, %v1355_v56  ;;  %v1370_v51 = vadd.f32 %v4585_v48, %v1350_v26  ;;  %v1493_v56 = vld [vmem:[#allocation3 + $0xa2] sm:$0xff] }
 0x2a4   :  { %1446 = vst.msk [vmem:[#allocation3 + $0xc1] sm:$0xff] %vm973_vm2, %v1388_v2  ;;  %v1387_v62 = vmax.f32 %v1371_v36, 0.0  ;;  %v1384_v52 = vmax.f32 %v1368_v30, 0.0  ;;  %v1385_v9 = vmax.f32 %v1369_v34, 0.0  ;;  %v1392_v11 = vmax.f32 %v1376_v10, 0.0 }
 0x2a5   :  { %1447 = vst.msk [vmem:[#allocation3 + $0xd1] sm:$0xff] %vm973_vm2, %v1389_v43  ;;  %v1393_v47 = vmax.f32 %v1377_v22, 0.0  ;;  %v1390_v41 = vmax.f32 %v1374_v31, 0.0  ;;  %v1391_v53 = vmax.f32 %v1375_v14, 0.0  ;;  %v1386_v46 = vmax.f32 %v1370_v51, 0.0 }
 0x2a6   :  { %v4610_v13 = vld [vmem:[#allocation3 + $0x41] sm:$0xff]  ;;  %1445 = vst.msk [vmem:[#allocation3 + $0xb1] sm:$0xff] %vm973_vm2, %v1387_v62 }
 0x2a7   :  { %v4614_v33 = vld [vmem:[#allocation3 + $0x51] sm:$0xff]  ;;  %1442 = vst.msk [vmem:[#allocation3 + $0x61] sm:$0xff] %vm973_vm2, %v1384_v52  ;;  %v1489_v6 = vld [vmem:[#allocation3 + $0x42] sm:$0xff] }
 0x2a8   :  { %v4619_v61 = vpack.i.bf16 %v4614_v33, %v4610_v13  ;;  %v4621_v3 = vld [vmem:[#allocation3 + $0x21] sm:$0xff]  ;;  %1443 = vst.msk [vmem:[#allocation3 + $0x71] sm:$0xff] %vm973_vm2, %v1385_v9  ;;  %v4641_v28 = vld [vmem:[#allocation3 + $0x52] sm:$0xff] }
 0x2a9   :  { %v4624_v12 = vld [vmem:[#allocation3 + $0x31] sm:$0xff]  ;;  %1450 = vst.msk [vmem:[#allocation3 + $0x101] sm:$0xff] %vm973_vm2, %v1392_v11  ;;  %v1487_v16 = vld [vmem:[#allocation3 + $0x22] sm:$0xff]  ;;  %v3019_v40 = vpack.i.bf16 %v4641_v28, %v1489_v6 }
 0x2aa   :  { %2980 = vrot.lane.b32.xlu2 %v4619_v61, %s3302_s15  ;;  %v4631_v48 = vpack.i.bf16 %v4624_v12, %v4621_v3  ;;  %v4633_v32 = vld [vmem:[#allocation3 + $0x11] sm:$0xff]  ;;  %1451 = vst.msk [vmem:[#allocation3 + $0x111] sm:$0xff] %vm973_vm2, %v1393_v47  ;;  %v3109_v21 = vpack.i.bf16 %v4610_v13, %v4624_v12  ;;  %v4721_v22 = vld [vmem:[#allocation3 + $0x20] sm:$0xff] }
 0x2ab   :  { %v2969_v55 = vpack.i.bf16 %v4633_v32, %v1469_v63  ;;  %1448 = vst.msk [vmem:[#allocation3 + $0xe1] sm:$0xff] %vm973_vm2, %v1390_v41  ;;  %v4646_v8 = vld [vmem:[#allocation3 + $0xc1] sm:$0xff]  ;;  %v1486_v1 = vld [vmem:[#allocation3 + $0x12] sm:$0xff]  ;;  %v3049_v31 = vpack.i.bf16 %v4621_v3, %v4633_v32 }
 0x2ac   :  { %2975 = vrot.lane.b32.xlu1 %v4631_v48, %s3302_s15  ;;  %1449 = vst.msk [vmem:[#allocation3 + $0xf1] sm:$0xff] %vm973_vm2, %v1391_v53  ;;  %v4648_v4 = vld [vmem:[#allocation3 + $0xd1] sm:$0xff]  ;;  %v3009_v43 = vpack.i.bf16 %v1486_v1, %v1485_v57  ;;  %v1495_v19 = vld [vmem:[#allocation3 + $0xc2] sm:$0xff]  ;;  %v3054_v34 = vpack.i.bf16 %v1487_v16, %v1486_v1 }
 0x2ad   :  { %2970 = vrot.lane.b32.xlu0 %v2969_v55, %s3302_s15  ;;  %1444 = vst.msk [vmem:[#allocation3 + $0x81] sm:$0xff] %vm973_vm2, %v1386_v46  ;;  %v4655_v0 = vld [vmem:[#allocation3 + $0xb1] sm:$0xff]  ;;  %v4663_v17 = vpack.i.bf16 %v4648_v4, %v4646_v8  ;;  %v4740_v47 = vld [vmem:[#allocation3 + $0xc0] sm:$0xff] }
 0x2ae   :  { %v4650_v7 = vld [vmem:[#allocation3 + $0x61] sm:$0xff]  ;;  %v2989_v50 = vpack.i.bf16 %v4655_v0, %v1477_v15  ;;  %v1488_v44 = vld [vmem:[#allocation3 + $0x32] sm:$0xff]  ;;  %v3079_v51 = vpack.i.bf16 %v4646_v8, %v4655_v0 }
 0x2af   :  { %v4652_v25 = vld [vmem:[#allocation3 + $0x62] sm:$0xff]  ;;  %v3169_v39 = vpack.i.bf16 %v4650_v7, %v4614_v33  ;;  %v4665_v23 = vld [vmem:[#allocation3 + $0x71] sm:$0xff]  ;;  %v3014_v18 = vpack.i.bf16 %v1488_v44, %v1487_v16  ;;  %v3114_v53 = vpack.i.bf16 %v1489_v6, %v1488_v44 }
 0x2b0   :  { %v3174_v27 = vpack.i.bf16 %v4652_v25, %v4641_v28  ;;  %v4667_v54 = vld [vmem:[#allocation3 + $0x101] sm:$0xff]  ;;  %v4676_v35 = vpack.i.bf16 %v4665_v23, %v4650_v7  ;;  %v4702_v29 = vld [vmem:[#allocation3 + $0x72] sm:$0xff] }
 0x2b1   :  { %v4687_v2 = vld [vmem:[#allocation3 + $0x111] sm:$0xff]  ;;  %v4706_v42 = vpack.i.bf16 %v4702_v29, %v4652_v25  ;;  %v1546_v25 = vld [vmem:[#allocation3 + $0x102] sm:$0xff] }
 0x2b2   :  { %2995 = vrot.lane.b32.xlu2 %v4663_v17, %s3302_s15  ;;  %v4672_v5 = vld [vmem:[#allocation3 + $0xe1] sm:$0xff]  ;;  %v4691_v59 = vpack.i.bf16 %v4687_v2, %v4667_v54  ;;  %v1496_v45 = vld [vmem:[#allocation3 + $0xd2] sm:$0xff] }
 0x2b3   :  { %v4678_v60 = vld [vmem:[#allocation3 + $0xf1] sm:$0xff]  ;;  %v3139_v38 = vpack.i.bf16 %v4672_v5, %v4648_v4  ;;  %v1497_v58 = vld [vmem:[#allocation3 + $0xe2] sm:$0xff]  ;;  %v3034_v36 = vpack.i.bf16 %v1496_v45, %v1495_v19 }
 0x2b4   :  { %2990 = vrot.lane.b32.xlu1 %v2989_v50, %s3302_s15  ;;  %v3199_v37 = vpack.i.bf16 %v4667_v54, %v4678_v60  ;;  %v4696_v24 = vpack.i.bf16 %v4678_v60, %v4672_v5  ;;  %v4713_v20 = vld [vmem:[#allocation3 + $0xf2] sm:$0xff]  ;;  %v3144_v8 = vpack.i.bf16 %v1497_v58, %v1496_v45  ;;  %v4775_v15 = vld [vmem:[#allocation3 + $0xe0] sm:$0xff] }
 0x2b5   :  { %2985 = vrot.lane.b32.xlu0 %v4676_v35, %s3302_s15  ;;  %v3039_v49 = vpack.i.bf16 %v4713_v20, %v1497_v58  ;;  %v1494_v26 = vld [vmem:[#allocation3 + $0xb2] sm:$0xff]  ;;  %v1506_v4 = vld [vmem:[#allocation3 + $0x60] sm:$0xff] }
 0x2b6   :  { %v3029_v30 = vpack.i.bf16 %v1494_v26, %v1493_v56  ;;  %v4719_v10 = vld [vmem:[#allocation3 + $0x10] sm:$0xff]  ;;  %v3084_v14 = vpack.i.bf16 %v1495_v19, %v1494_v26  ;;  %v2258_v57 = vld [vmem:[%s5378_s5 + $0x20] sm:$0xf] }
 0x2b7   :  { %v3044_v62 = vpack.i.bf16 %v4721_v22, %v4719_v10  ;;  %v4730_v52 = vld [vmem:[#allocation3 + $0x30] sm:$0xff]  ;;  %v2280_v1 = vunpack.c.l.b16 %v2258_v57 }
 0x2b8   :  { %v3059_v9 = vpack.i.bf16 %v4730_v52, %v4721_v22  ;;  %v4738_v11 = vld [vmem:[#allocation3 + $0xb0] sm:$0xff] }
 0x2b9   :  { %v3074_v41 = vpack.i.bf16 %v4740_v47, %v4738_v11  ;;  %v4749_v3 = vld [vmem:[#allocation3 + $0xd0] sm:$0xff]  ;;  %v2285_v6 = vpack.c.b16 %v2280_v1, %v2280_v1 }
 0x2ba   :  { %3010 = vrot.lane.b32.xlu2 %v3009_v43, %s3305_s16  ;;  %v3089_v63 = vpack.i.bf16 %v4749_v3, %v4740_v47  ;;  %v4767_v46 = vld [vmem:[#allocation3 + $0x50] sm:$0xff]  ;;  %v3134_v13 = vpack.i.bf16 %v4775_v15, %v4749_v3 }
 0x2bb   :  { %v4809_v5 = vld [vmem:[#allocation3 + $0x70] sm:$0xff]  ;;  %v2317_v44 = vsel %vm2315_vm15, %v2285_v6, 0 }
 0x2bc   :  { %3005 = vrot.lane.b32.xlu1 %v4691_v59, %s3302_s15  ;;  %2322 = vmatpush.bf16.msra.mxu1 %v2317_v44  ;;  %v1573_v57 = vld [vmem:[#allocation3 + $0x91] sm:$0xff] }
 0x2bd   :  { %3000 = vrot.lane.b32.xlu0 %v4696_v24, %s3302_s15  ;;  %2630 = vmatpush.bf16.msra.mxu2 %v2317_v44 }
 0x2c2   :  { %3025 = vrot.lane.b32.xlu2 %v4706_v42, %s3305_s16 }
 0x2c4   :  { %3020 = vrot.lane.b32.xlu1 %v3019_v40, %s3305_s16 }
 0x2c5   :  { %3015 = vrot.lane.b32.xlu0 %v3014_v18, %s3305_s16 }
 0x2ca   :  { %3040 = vrot.lane.b32.xlu2 %v3039_v49, %s3305_s16 }
 0x2cc   :  { %3035 = vrot.lane.b32.xlu1 %v3034_v36, %s3305_s16 }
 0x2cd   :  { %3030 = vrot.lane.b32.xlu0 %v3029_v30, %s3305_s16  ;;  %v1540_v30 = vld [vmem:[#allocation3 + $0x82] sm:$0xff] }
 0x2d2   :  { %3055 = vrot.lane.b32.xlu2 %v3054_v34, %s3309_s4  ;;  %v2625_v34 = vld [vmem:[%s5378_s5 + $0x10] sm:$0xff] }
 0x2d4   :  { %3050 = vrot.lane.b32.xlu1 %v3049_v31, %s3306_s17 }
 0x2d5   :  { %3045 = vrot.lane.b32.xlu0 %v3044_v62, %s3307_s18 }
 0x2da   :  { %3070 = vrot.lane.b32.xlu2 %v3014_v18, %s3310_s29 }
 0x2dc   :  { %3065 = vrot.lane.b32.xlu1 %v4631_v48, %s3311_s30  ;;  %v4757_v48 = vld [vmem:[#allocation3 + $0x40] sm:$0xff] }
 0x2dd   :  { %3060 = vrot.lane.b32.xlu0 %v3059_v9, %s3312_s10  ;;  %v3104_v32 = vpack.i.bf16 %v4757_v48, %v4730_v52  ;;  %v3119_v55 = vpack.i.bf16 %v4767_v46, %v4757_v48  ;;  %v1524_v9 = vld [vmem:[#allocation3 + $0x81] sm:$0xff] }
 0x2de   :  { %v3244_v44 = vpack.i.bf16 %v1573_v57, %v1524_v9 }
 0x2e2   :  { %3085 = vrot.lane.b32.xlu2 %v3084_v14, %s3309_s4 }
 0x2e4   :  { %3080 = vrot.lane.b32.xlu1 %v3079_v51, %s3306_s17 }
 0x2e5   :  { %3075 = vrot.lane.b32.xlu0 %v3074_v41, %s3307_s18  ;;  %v3234_v41 = vpack.i.bf16 %v1540_v30, %v4702_v29 }
 0x2ea   :  { %3100 = vrot.lane.b32.xlu2 %v3034_v36, %s3310_s29 }
 0x2ec   :  { %3095 = vrot.lane.b32.xlu1 %v4663_v17, %s3311_s30  ;;  %v3164_v17 = vpack.i.bf16 %v1506_v4, %v4767_v46 }
 0x2ed   :  { %3090 = vrot.lane.b32.xlu0 %v3089_v63, %s3312_s10 }
 0x2f2   :  { %3115 = vrot.lane.b32.xlu2 %v3114_v53, %s3309_s4 }
 0x2f4   :  { %3110 = vrot.lane.b32.xlu1 %v3109_v21, %s3306_s17 }
 0x2f5   :  { %3105 = vrot.lane.b32.xlu0 %v3104_v32, %s3307_s18 }
 0x2fa   :  { %3130 = vrot.lane.b32.xlu2 %v3019_v40, %s3310_s29 }
 0x2fc   :  { %3125 = vrot.lane.b32.xlu1 %v4619_v61, %s3311_s30  ;;  %v4787_v61 = vld [vmem:[#allocation3 + $0xf0] sm:$0xff] }
 0x2fd   :  { %3120 = vrot.lane.b32.xlu0 %v3119_v55, %s3312_s10  ;;  %v3149_v21 = vpack.i.bf16 %v4787_v61, %v4775_v15 }
 0x302   :  { %3145 = vrot.lane.b32.xlu2 %v3144_v8, %s3309_s4  ;;  %v3229_v8 = vpack.i.bf16 %v1524_v9, %v4665_v23  ;;  %v1589_v23 = vld [vmem:[#allocation3 + $0x92] sm:$0xff] }
 0x303   :  { %v3249_v1 = vpack.i.bf16 %v1589_v23, %v1540_v30  ;;  %v1453_v30 = vld [vmem:[#allocation3] sm:$0xff]  ;;  %v1565_v9 = vld [vmem:[#allocation3 + $0x130] sm:$0xff] }
 0x304   :  { %3140 = vrot.lane.b32.xlu1 %v3139_v38, %s3306_s17  ;;  %v4784_v12 = vpop.permute.xlu2 %2980  ;;  %v3179_v38 = vpack.i.bf16 %v4809_v5, %v1506_v4 }
 0x305   :  { %3135 = vrot.lane.b32.xlu0 %v3134_v13, %s3307_s18  ;;  %v2624_v13 = vld [vmem:[%s5378_s5 + $0x8] sm:$0xff] }
 0x30a   :  { %3160 = vrot.lane.b32.xlu2 %v3039_v49, %s3310_s29  ;;  %v2626_v49 = vld [vmem:[%s5378_s5 + $0x18] sm:$0xff] }
 0x30b   :  { %2323 = vmatpush.bf16.msra.mxu1 %v2626_v49  ;;  %2631 = vmatpush.bf16.msra.mxu2 %v2626_v49 }
 0x30c   :  { %3155 = vrot.lane.b32.xlu1 %v4696_v24, %s3311_s30  ;;  %v4794_v0 = vpop.permute.xlu2 %2995  ;;  %v4835_v24 = vld [vmem:[#allocation3 + $0x112] sm:$0xff] }
 0x30d   :  { %3150 = vrot.lane.b32.xlu0 %v3149_v21, %s3312_s10  ;;  %v4840_v58 = vpack.i.bf16 %v4835_v24, %v1546_v25 }
 0x30f   :  { %2324 = vmatpush.bf16.msra.mxu1 %v2625_v34  ;;  %2632 = vmatpush.bf16.msra.mxu2 %v2625_v34  ;;  %v1581_v34 = vld [vmem:[#allocation3 + $0x131] sm:$0xff] }
 0x312   :  { %3175 = vrot.lane.b32.xlu2 %v3174_v27, %s3309_s4  ;;  %v4822_v27 = vld [vmem:[#allocation3 + $0x100] sm:$0xff] }
 0x313   :  { %2325 = vmatpush.bf16.msra.mxu1 %v2624_v13  ;;  %2633 = vmatpush.bf16.msra.mxu2 %v2624_v13 }
 0x314   :  { %3170 = vrot.lane.b32.xlu1 %v3169_v39, %s3306_s17  ;;  %v4806_v50 = vpop.permute.xlu2 %3010  ;;  %v3204_v39 = vpack.i.bf16 %v1546_v25, %v4713_v20  ;;  %v4842_v20 = vld [vmem:[#allocation3 + $0x110] sm:$0xff] }
 0x315   :  { %3165 = vrot.lane.b32.xlu0 %v3164_v17, %s3307_s18  ;;  %v3209_v45 = vpack.i.bf16 %v4842_v20, %v4822_v27  ;;  %v2623_v17 = vld [vmem:[%s5378_s5] sm:$0xff] }
 0x317   :  { %2326 = vmatpush.bf16.msra.mxu1 %v2623_v17  ;;  %2634 = vmatpush.bf16.msra.mxu2 %v2623_v17 }
 0x31a   :  { %3190 = vrot.lane.b32.xlu2 %v4706_v42, %s3310_s29 }
 0x31c   :  { %3185 = vrot.lane.b32.xlu1 %v4676_v35, %s3311_s30  ;;  %v3026_v28 = vpop.permute.xlu2 %3025  ;;  %v3194_v35 = vpack.i.bf16 %v4822_v27, %v4787_v61 }
 0x31d   :  { %3180 = vrot.lane.b32.xlu0 %v3179_v38, %s3312_s10  ;;  %v3028_v54 = vunpack.i.h.bf16 %v3026_v28  ;;  %v3027_v60 = vunpack.i.l.bf16 %v3026_v28 }
 0x31e   :  { %v4817_v33 = vpop.permute.xlu1 %2975 }
 0x31f   :  { %v4819_v7 = vpop.permute.xlu0 %2970 }
 0x320   :  { %v2972_v49 = vunpack.i.l.bf16 %v4819_v7 }
 0x322   :  { %3205 = vrot.lane.b32.xlu2 %v3204_v39, %s3309_s4 }
 0x324   :  { %3200 = vrot.lane.b32.xlu1 %v3199_v37, %s3306_s17  ;;  %v3041_v43 = vpop.permute.xlu2 %3040 }
 0x325   :  { %3195 = vrot.lane.b32.xlu0 %v3194_v35, %s3307_s18  ;;  %v3043_v63 = vunpack.i.h.bf16 %v3041_v43  ;;  %v3042_v53 = vunpack.i.l.bf16 %v3041_v43  ;;  %v1557_v43 = vld [vmem:[#allocation3 + $0x90] sm:$0xff] }
 0x326   :  { %v4837_v42 = vpop.permute.xlu1 %2990 }
 0x327   :  { %v2986_v16 = vpop.permute.xlu0 %2985 }
 0x328   :  { %v2988_v40 = vunpack.i.h.bf16 %v2986_v16  ;;  %v2987_v18 = vunpack.i.l.bf16 %v2986_v16 }
 0x32a   :  { %v2117_v37 = vsel %vm973_vm2, %v4809_v5, %v2988_v40  ;;  %v2116_v19 = vsel %vm973_vm2, %v1506_v4, %v2987_v18  ;;  %3220 = vrot.lane.b32.xlu2 %v4840_v58, %s3310_s29 }
 0x32b   :  { %v4855_v56 = vsel %vm1007_vm5, %v2116_v19, %v3027_v60  ;;  %v4858_v26 = vsel %vm1007_vm5, %v2117_v37, %v3028_v54  ;;  %v1516_v54 = vld [vmem:[#allocation3 + $0x120] sm:$0xff] }
 0x32c   :  { %3215 = vrot.lane.b32.xlu1 %v4691_v59, %s3311_s30  ;;  %v4863_v36 = vpop.permute.xlu2 %3055  ;;  %v1508_v59 = vld [vmem:[#allocation3 + $0x80] sm:$0xff]  ;;  %v3259_v19 = vpack.i.bf16 %v1516_v54, %v4842_v20 }
 0x32d   :  { %3210 = vrot.lane.b32.xlu0 %v3209_v45, %s3312_s10  ;;  %v3224_v29 = vpack.i.bf16 %v1508_v59, %v4809_v5  ;;  %v3239_v40 = vpack.i.bf16 %v1557_v43, %v1508_v59  ;;  %v2973_v45 = vunpack.i.h.bf16 %v4819_v7  ;;  %v3013_v59 = vunpack.i.h.bf16 %v4806_v50  ;;  %v1597_v43 = vld [vmem:[#allocation3 + $0x132] sm:$0xff] }
 0x32e   :  { %v4868_v31 = vpop.permute.xlu1 %3005  ;;  %v3012_v7 = vunpack.i.l.bf16 %v4806_v50  ;;  %v3058_v23 = vunpack.i.h.bf16 %v4863_v36 }
 0x32f   :  { %v3001_v62 = vpop.permute.xlu0 %3000 }
 0x330   :  { %v3003_v14 = vunpack.i.h.bf16 %v3001_v62  ;;  %v3002_v51 = vunpack.i.l.bf16 %v3001_v62 }
 0x332   :  { %v2123_v32 = vsel %vm973_vm2, %v4787_v61, %v3003_v14  ;;  %v2122_v55 = vsel %vm973_vm2, %v4775_v15, %v3002_v51  ;;  %3235 = vrot.lane.b32.xlu2 %v3234_v41, %s3309_s4  ;;  %v2983_v61 = vunpack.i.h.bf16 %v4784_v12  ;;  %v2982_v15 = vunpack.i.l.bf16 %v4784_v12 }
 0x333   :  { %v4882_v21 = vsel %vm1007_vm5, %v2122_v55, %v3042_v53  ;;  %v4885_v4 = vsel %vm1007_vm5, %v2123_v32, %v3043_v63  ;;  %v2111_v14 = vsel %vm973_vm2, %v4719_v10, %v2973_v45  ;;  %v1548_v32 = vld [vmem:[#allocation3 + $0x122] sm:$0xff]  ;;  %v3274_v55 = vpack.i.bf16 %v1565_v9, %v1516_v54 }
 0x334   :  { %3230 = vrot.lane.b32.xlu1 %v3229_v8, %s3306_s17  ;;  %v4894_v25 = vpop.permute.xlu2 %3070  ;;  %v2115_v12 = vsel %vm973_vm2, %v4767_v46, %v2983_v61  ;;  %v2114_v35 = vsel %vm973_vm2, %v4757_v48, %v2982_v15  ;;  %v1532_v46 = vld [vmem:[#allocation3 + $0x121] sm:$0xff]  ;;  %v3269_v50 = vpack.i.bf16 %v1548_v32, %v4835_v24  ;;  %v2992_v9 = vunpack.i.l.bf16 %v4837_v42 }
 0x335   :  { %3225 = vrot.lane.b32.xlu0 %v3224_v29, %s3307_s18  ;;  %v3264_v60 = vpack.i.bf16 %v1532_v46, %v4687_v2  ;;  %v2110_v2 = vsel %vm973_vm2, %v1453_v30, %v2972_v49  ;;  %v3279_v41 = vpack.i.bf16 %v1581_v34, %v1532_v46  ;;  %v2127_v29 = vsel %vm1007_vm5, %v2111_v14, %v3013_v59  ;;  %v1461_v14 = vld [vmem:[#allocation3 + $0xa0] sm:$0xff] }
 0x336   :  { %v3021_v5 = vpop.permute.xlu1 %3020  ;;  %v3073_v46 = vunpack.i.h.bf16 %v4894_v25  ;;  %v3072_v54 = vunpack.i.l.bf16 %v4894_v25 }
 0x337   :  { %v3023_v38 = vunpack.i.h.bf16 %v3021_v5  ;;  %v3022_v28 = vunpack.i.l.bf16 %v3021_v5  ;;  %v4896_v39 = vpop.permute.xlu0 %3015 }
 0x339   :  { %v4903_v6 = vsel %vm1007_vm5, %v2115_v12, %v3023_v38  ;;  %v4906_v16 = vsel %vm1007_vm5, %v2114_v35, %v3022_v28  ;;  %v3057_v28 = vunpack.i.l.bf16 %v4863_v36 }
 0x33a   :  { %3250 = vrot.lane.b32.xlu2 %v3249_v1, %s3310_s29 }
 0x33c   :  { %3245 = vrot.lane.b32.xlu1 %v3244_v44, %s3311_s30  ;;  %v4916_v37 = vpop.permute.xlu2 %3085 }
 0x33d   :  { %3240 = vrot.lane.b32.xlu0 %v3239_v40, %s3312_s10 }
 0x33e   :  { %v4911_v48 = vpop.permute.xlu1 %3035 }
 0x33f   :  { %v4913_v18 = vpop.permute.xlu0 %3030 }
 0x342   :  { %3265 = vrot.lane.b32.xlu2 %v3264_v60, %s3306_s17 }
 0x344   :  { %3260 = vrot.lane.b32.xlu1 %v3259_v19, %s3307_s18  ;;  %v4933_v61 = vpop.permute.xlu2 %3100  ;;  %v3284_v19 = vpack.i.bf16 %v1597_v43, %v1548_v32 }
 0x345   :  { %3255 = vrot.lane.b32.xlu0 %v4840_v58, %s3305_s16  ;;  %v2126_v58 = vsel %vm1007_vm5, %v2110_v2, %v3012_v7  ;;  %v3102_v43 = vunpack.i.l.bf16 %v4933_v61 }
 0x346   :  { %v3051_v62 = vpop.permute.xlu1 %3050 }
 0x347   :  { %v3046_v51 = vpop.permute.xlu0 %3045  ;;  %v3053_v8 = vunpack.i.h.bf16 %v3051_v62  ;;  %v3052_v13 = vunpack.i.l.bf16 %v3051_v62  ;;  %v2993_v62 = vunpack.i.h.bf16 %v4837_v42  ;;  %v2118_v42 = vsel %vm973_vm2, %v1461_v14, %v2992_v9 }
 0x348   :  { %v3048_v63 = vunpack.i.h.bf16 %v3046_v51  ;;  %v3047_v53 = vunpack.i.l.bf16 %v3046_v51  ;;  %v3033_v51 = vunpack.i.h.bf16 %v4913_v18 }
 0x349   :  { %v2119_v32 = vsel %vm973_vm2, %v4738_v11, %v2993_v62  ;;  %v3087_v11 = vunpack.i.l.bf16 %v4916_v37 }
 0x34a   :  { %3280 = vrot.lane.b32.xlu2 %v3279_v41, %s3311_s30  ;;  %v2142_v10 = vsel %vm1041_vm7, %v2126_v58, %v3047_v53  ;;  %v2143_v15 = vsel %vm1041_vm7, %v2127_v29, %v3048_v63  ;;  %v3032_v41 = vunpack.i.l.bf16 %v4913_v18 }
 0x34b   :  { %v2158_v17 = vsel %vm1075_vm9, %v2142_v10, %v3052_v13  ;;  %v2159_v5 = vsel %vm1075_vm9, %v2143_v15, %v3053_v8 }
 0x34c   :  { %3275 = vrot.lane.b32.xlu1 %v3274_v55, %s3312_s10  ;;  %v2175_v44 = vsel %vm2174_vm0, %v2158_v17, %v3057_v28  ;;  %v2176_v40 = vsel %vm2174_vm0, %v2159_v5, %v3058_v23  ;;  %v4956_v2 = vpop.permute.xlu2 %3115  ;;  %v2135_v55 = vsel %vm1007_vm5, %v2119_v32, %v3033_v51  ;;  %v2134_v8 = vsel %vm1007_vm5, %v2118_v42, %v3032_v41 }
 0x34d   :  { %3270 = vrot.lane.b32.xlu0 %v3269_v50, %s3309_s4  ;;  %v3088_v23 = vunpack.i.h.bf16 %v4916_v37 }
 0x34e   :  { %v3066_v38 = vpop.permute.xlu1 %3065 }
 0x34f   :  { %v3068_v57 = vunpack.i.h.bf16 %v3066_v38  ;;  %v3067_v12 = vunpack.i.l.bf16 %v3066_v38  ;;  %v3061_v35 = vpop.permute.xlu0 %3060 }
 0x350   :  { %v3063_v1 = vunpack.i.h.bf16 %v3061_v35  ;;  %v3062_v24 = vunpack.i.l.bf16 %v3061_v35 }
 0x352   :  { %v2192_v60 = vsel %vm2191_vm1, %v2175_v44, %v3062_v24  ;;  %v2193_v36 = vsel %vm2191_vm1, %v2176_v40, %v3063_v1  ;;  %v3103_v24 = vunpack.i.h.bf16 %v4933_v61  ;;  %v3017_v61 = vunpack.i.l.bf16 %v4896_v39 }
 0x353   :  { %v2209_v45 = vsel %vm2208_vm3, %v2192_v60, %v3067_v12  ;;  %v2210_v49 = vsel %vm2208_vm3, %v2193_v36, %v3068_v57  ;;  %v2978_v36 = vunpack.i.h.bf16 %v4817_v33 }
 0x354   :  { %v2226_v30 = vsel %vm2225_vm4, %v2209_v45, %v3072_v54  ;;  %v2227_v34 = vsel %vm2225_vm4, %v2210_v49, %v3073_v46  ;;  %v3131_v17 = vpop.permute.xlu2 %3130  ;;  %v3018_v49 = vunpack.i.h.bf16 %v4896_v39 }
 0x355   :  { %3285 = vrot.lane.b32.xlu0 %v3284_v19, %s3310_s29  ;;  %v2242_v25 = vpack.c.bf16 %v2227_v34, %v2226_v30  ;;  %v2977_v19 = vunpack.i.l.bf16 %v4817_v33 }
 0x356   :  { %v3081_v59 = vpop.permute.xlu1 %3080 }
 0x357   :  { %v3076_v7 = vpop.permute.xlu0 %3075  ;;  %2613 = vmatmul.msk.bf16.vlgmr.msra.gmra.mxu1 %vm2290_vm6, %v2242_v25  ;;  %v3083_v13 = vunpack.i.h.bf16 %v3081_v59  ;;  %v3082_v58 = vunpack.i.l.bf16 %v3081_v59  ;;  %v2113_v25 = vsel %vm973_vm2, %v4730_v52, %v2978_v36  ;;  %v2112_v14 = vsel %vm973_vm2, %v4721_v22, %v2977_v19 }
 0x358   :  { %v3078_v63 = vunpack.i.h.bf16 %v3076_v7  ;;  %v3077_v53 = vunpack.i.l.bf16 %v3076_v7  ;;  %v2129_v33 = vsel %vm1007_vm5, %v2113_v25, %v3018_v49  ;;  %v2128_v41 = vsel %vm1007_vm5, %v2112_v14, %v3017_v61 }
 0x359   :  { %v3118_v52 = vunpack.i.h.bf16 %v4956_v2  ;;  %v3117_v22 = vunpack.i.l.bf16 %v4956_v2 }
 0x35a   :  { %v2150_v29 = vsel %vm1041_vm7, %v2134_v8, %v3077_v53  ;;  %v2151_v18 = vsel %vm1041_vm7, %v2135_v55, %v3078_v63 }
 0x35b   :  { %v2166_v10 = vsel %vm1075_vm9, %v2150_v29, %v3082_v58  ;;  %v2167_v15 = vsel %vm1075_vm9, %v2151_v18, %v3083_v13 }
 0x35c   :  { %v2183_v35 = vsel %vm2174_vm0, %v2166_v10, %v3087_v11  ;;  %v2184_v1 = vsel %vm2174_vm0, %v2167_v15, %v3088_v23  ;;  %v3146_v51 = vpop.permute.xlu2 %3145  ;;  %v3133_v15 = vunpack.i.h.bf16 %v3131_v17 }
 0x35e   :  { %v3096_v50 = vpop.permute.xlu1 %3095 }
 0x35f   :  { %v3098_v5 = vunpack.i.h.bf16 %v3096_v50  ;;  %v3097_v38 = vunpack.i.l.bf16 %v3096_v50  ;;  %v3091_v28 = vpop.permute.xlu0 %3090  ;;  %v3132_v50 = vunpack.i.l.bf16 %v3131_v17  ;;  %v3038_v17 = vunpack.i.h.bf16 %v4911_v48 }
 0x360   :  { %v3093_v57 = vunpack.i.h.bf16 %v3091_v28  ;;  %v3092_v12 = vunpack.i.l.bf16 %v3091_v28 }
 0x362   :  { %v2200_v44 = vsel %vm2191_vm1, %v2183_v35, %v3092_v12  ;;  %v2201_v40 = vsel %vm2191_vm1, %v2184_v1, %v3093_v57  ;;  %v2998_v12 = vunpack.i.h.bf16 %v4794_v0  ;;  %v2997_v35 = vunpack.i.l.bf16 %v4794_v0 }
 0x363   :  { %v2217_v37 = vsel %vm2208_vm3, %v2200_v44, %v3097_v38  ;;  %v2218_v46 = vsel %vm2208_vm3, %v2201_v40, %v3098_v5 }
 0x364   :  { %v2234_v54 = vsel %vm2225_vm4, %v2217_v37, %v3102_v43  ;;  %v2235_v60 = vsel %vm2225_vm4, %v2218_v46, %v3103_v24  ;;  %v3161_v5 = vpop.permute.xlu2 %3160  ;;  %v3037_v24 = vunpack.i.l.bf16 %v4911_v48  ;;  %v2121_v46 = vsel %vm973_vm2, %v4749_v3, %v2998_v12 }
 0x365   :  { %v2246_v45 = vpack.c.bf16 %v2235_v60, %v2234_v54  ;;  %v2120_v54 = vsel %vm973_vm2, %v4740_v47, %v2997_v35  ;;  %v2137_v60 = vsel %vm1007_vm5, %v2121_v46, %v3038_v17  ;;  %v3148_v3 = vunpack.i.h.bf16 %v3146_v51 }
 0x366   :  { %v3111_v30 = vpop.permute.xlu1 %3110  ;;  %v2136_v0 = vsel %vm1007_vm5, %v2120_v54, %v3037_v24 }
 0x367   :  { %v3106_v34 = vpop.permute.xlu0 %3105  ;;  %2617 = vmatmul.msk.bf16.vlgmr.msra.gmra.mxu2 %vm2290_vm6, %v2246_v45  ;;  %v3113_v59 = vunpack.i.h.bf16 %v3111_v30  ;;  %v3112_v7 = vunpack.i.l.bf16 %v3111_v30 }
 0x368   :  { %v3108_v62 = vunpack.i.h.bf16 %v3106_v34  ;;  %v3107_v9 = vunpack.i.l.bf16 %v3106_v34 }
 0x36a   :  { %v2144_v39 = vsel %vm1041_vm7, %v2128_v41, %v3107_v9  ;;  %v2145_v63 = vsel %vm1041_vm7, %v2129_v33, %v3108_v62  ;;  %v3147_v62 = vunpack.i.l.bf16 %v3146_v51 }
 0x36b   :  { %v2160_v53 = vsel %vm1075_vm9, %v2144_v39, %v3112_v7  ;;  %v2161_v32 = vsel %vm1075_vm9, %v2145_v63, %v3113_v59  ;;  %v3163_v7 = vunpack.i.h.bf16 %v3161_v5  ;;  %v3162_v39 = vunpack.i.l.bf16 %v3161_v5 }
 0x36c   :  { %v2177_v18 = vsel %vm2174_vm0, %v2160_v53, %v3117_v22  ;;  %v2178_v10 = vsel %vm2174_vm0, %v2161_v32, %v3118_v52  ;;  %v3176_v49 = vpop.permute.xlu2 %3175 }
 0x36e   :  { %v3126_v42 = vpop.permute.xlu1 %3125 }
 0x36f   :  { %v3128_v55 = vunpack.i.h.bf16 %v3126_v42  ;;  %v3127_v8 = vunpack.i.l.bf16 %v3126_v42  ;;  %v3121_v13 = vpop.permute.xlu0 %3120 }
 0x370   :  { %v3123_v58 = vunpack.i.h.bf16 %v3121_v13  ;;  %v3122_v29 = vunpack.i.l.bf16 %v3121_v13 }
 0x372   :  { %v2194_v23 = vsel %vm2191_vm1, %v2177_v18, %v3122_v29  ;;  %v2195_v11 = vsel %vm2191_vm1, %v2178_v10, %v3123_v58 }
 0x373   :  { %v2211_v38 = vsel %vm2208_vm3, %v2194_v23, %v3127_v8  ;;  %v2212_v2 = vsel %vm2208_vm3, %v2195_v11, %v3128_v55 }
 0x374   :  { %v2228_v28 = vsel %vm2225_vm4, %v2211_v38, %v3132_v50  ;;  %v2229_v57 = vsel %vm2225_vm4, %v2212_v2, %v3133_v15  ;;  %v3191_v8 = vpop.permute.xlu2 %3190  ;;  %v3178_v38 = vunpack.i.h.bf16 %v3176_v49  ;;  %v3177_v2 = vunpack.i.l.bf16 %v3176_v49 }
 0x375   :  { %v2243_v1 = vpack.c.bf16 %v2229_v57, %v2228_v28 }
 0x376   :  { %v3141_v43 = vpop.permute.xlu1 %3140 }
 0x377   :  { %v3136_v44 = vpop.permute.xlu0 %3135  ;;  %2614 = vmatmul.msk.bf16.gmra.mxu1 %vm2290_vm6, %v2243_v1  ;;  %v3143_v36 = vunpack.i.h.bf16 %v3141_v43  ;;  %v3142_v19 = vunpack.i.l.bf16 %v3141_v43  ;;  %v3193_v43 = vunpack.i.h.bf16 %v3191_v8 }
 0x378   :  { %v3138_v40 = vunpack.i.h.bf16 %v3136_v44  ;;  %v3137_v37 = vunpack.i.l.bf16 %v3136_v44  ;;  %v3192_v44 = vunpack.i.l.bf16 %v3191_v8 }
 0x37a   :  { %v2153_v48 = vsel %vm1041_vm7, %v2137_v60, %v3138_v40  ;;  %v2152_v45 = vsel %vm1041_vm7, %v2136_v0, %v3137_v37 }
 0x37b   :  { %v2169_v61 = vsel %vm1075_vm9, %v2153_v48, %v3143_v36  ;;  %v2168_v30 = vsel %vm1075_vm9, %v2152_v45, %v3142_v19 }
 0x37c   :  { %v2185_v41 = vsel %vm2174_vm0, %v2168_v30, %v3147_v62  ;;  %v2186_v59 = vsel %vm2174_vm0, %v2169_v61, %v3148_v3  ;;  %v3206_v17 = vpop.permute.xlu2 %3205 }
 0x37e   :  { %v3156_v34 = vpop.permute.xlu1 %3155 }
 0x37f   :  { %v3158_v9 = vunpack.i.h.bf16 %v3156_v34  ;;  %v3157_v47 = vunpack.i.l.bf16 %v3156_v34  ;;  %v3151_v25 = vpop.permute.xlu0 %3150 }
 0x380   :  { %v3153_v14 = vunpack.i.h.bf16 %v3151_v25  ;;  %v3152_v33 = vunpack.i.l.bf16 %v3151_v25  ;;  %v3208_v25 = vunpack.i.h.bf16 %v3206_v17 }
 0x382   :  { %v2202_v63 = vsel %vm2191_vm1, %v2185_v41, %v3152_v33  ;;  %v2203_v53 = vsel %vm2191_vm1, %v2186_v59, %v3153_v14  ;;  %v3207_v14 = vunpack.i.l.bf16 %v3206_v17 }
 0x383   :  { %v2219_v32 = vsel %vm2208_vm3, %v2202_v63, %v3157_v47  ;;  %v2220_v42 = vsel %vm2208_vm3, %v2203_v53, %v3158_v9 }
 0x384   :  { %v2236_v51 = vsel %vm2225_vm4, %v2219_v32, %v3162_v39  ;;  %v2237_v52 = vsel %vm2225_vm4, %v2220_v42, %v3163_v7  ;;  %v3221_v30 = vpop.permute.xlu2 %3220 }
 0x385   :  { %v2247_v22 = vpack.c.bf16 %v2237_v52, %v2236_v51  ;;  %v3222_v32 = vunpack.i.l.bf16 %v3221_v30 }
 0x386   :  { %v3171_v55 = vpop.permute.xlu1 %3170 }
 0x387   :  { %v3166_v13 = vpop.permute.xlu0 %3165  ;;  %2618 = vmatmul.msk.bf16.gmra.mxu2 %vm2290_vm6, %v2247_v22  ;;  %v3173_v18 = vunpack.i.h.bf16 %v3171_v55  ;;  %v3172_v10 = vunpack.i.l.bf16 %v3171_v55 }
 0x388   :  { %v3168_v58 = vunpack.i.h.bf16 %v3166_v13  ;;  %v3167_v29 = vunpack.i.l.bf16 %v3166_v13 }
 0x38a   :  { %v2147_v15 = vsel %vm1041_vm7, %v4903_v6, %v3168_v58  ;;  %v2146_v50 = vsel %vm1041_vm7, %v4906_v16, %v3167_v29 }
 0x38b   :  { %v2163_v23 = vsel %vm1075_vm9, %v2147_v15, %v3173_v18  ;;  %v2162_v11 = vsel %vm1075_vm9, %v2146_v50, %v3172_v10 }
 0x38c   :  { %v2179_v24 = vsel %vm2174_vm0, %v2162_v11, %v3177_v2  ;;  %v2180_v6 = vsel %vm2174_vm0, %v2163_v23, %v3178_v38  ;;  %v3236_v8 = vpop.permute.xlu2 %3235 }
 0x38e   :  { %v3186_v5 = vpop.permute.xlu1 %3185 }
 0x38f   :  { %v3188_v28 = vunpack.i.h.bf16 %v3186_v5  ;;  %v3187_v57 = vunpack.i.l.bf16 %v3186_v5  ;;  %v3181_v12 = vpop.permute.xlu0 %3180 }
 0x390   :  { %v3183_v35 = vunpack.i.h.bf16 %v3181_v12  ;;  %v3182_v1 = vunpack.i.l.bf16 %v3181_v12 }
 0x392   :  { %v2196_v16 = vsel %vm2191_vm1, %v2179_v24, %v3182_v1  ;;  %v2197_v40 = vsel %vm2191_vm1, %v2180_v6, %v3183_v35 }
 0x393   :  { %v2213_v37 = vsel %vm2208_vm3, %v2196_v16, %v3187_v57  ;;  %v2214_v46 = vsel %vm2208_vm3, %v2197_v40, %v3188_v28  ;;  %v3238_v28 = vunpack.i.h.bf16 %v3236_v8  ;;  %v3237_v57 = vunpack.i.l.bf16 %v3236_v8 }
 0x394   :  { %v2230_v54 = vsel %vm2225_vm4, %v2213_v37, %v3192_v44  ;;  %v2231_v60 = vsel %vm2225_vm4, %v2214_v46, %v3193_v43  ;;  %v3251_v12 = vpop.permute.xlu2 %3250 }
 0x395   :  { %v2244_v0 = vpack.c.bf16 %v2231_v60, %v2230_v54  ;;  %v3253_v44 = vunpack.i.h.bf16 %v3251_v12  ;;  %v3252_v16 = vunpack.i.l.bf16 %v3251_v12  ;;  %v5101_v12 = vld [vmem:[%s5379_s6] ss:$0 sm:$0xff] }
 0x396   :  { %v3201_v36 = vpop.permute.xlu1 %3200 }
 0x397   :  { %v3196_v19 = vpop.permute.xlu0 %3195  ;;  %2615 = vmatmul.msk.bf16.gmra.mxu1 %vm2290_vm6, %v2244_v0  ;;  %v3203_v49 = vunpack.i.h.bf16 %v3201_v36  ;;  %v3202_v61 = vunpack.i.l.bf16 %v3201_v36 }
 0x398   :  { %v3198_v48 = vunpack.i.h.bf16 %v3196_v19  ;;  %v3197_v45 = vunpack.i.l.bf16 %v3196_v19  ;;  %v3008_v19 = vunpack.i.h.bf16 %v4868_v31 }
 0x39a   :  { %v2154_v34 = vsel %vm1041_vm7, %v4882_v21, %v3197_v45  ;;  %v2155_v3 = vsel %vm1041_vm7, %v4885_v4, %v3198_v48  ;;  %v3223_v21 = vunpack.i.h.bf16 %v3221_v30  ;;  %v3007_v48 = vunpack.i.l.bf16 %v4868_v31 }
 0x39b   :  { %v2170_v62 = vsel %vm1075_vm9, %v2154_v34, %v3202_v61  ;;  %v2171_v9 = vsel %vm1075_vm9, %v2155_v3, %v3203_v49  ;;  %v2125_v34 = vsel %vm973_vm2, %v4842_v20, %v3008_v19 }
 0x39c   :  { %v2187_v63 = vsel %vm2174_vm0, %v2170_v62, %v3207_v14  ;;  %v2188_v53 = vsel %vm2174_vm0, %v2171_v9, %v3208_v25  ;;  %v3266_v30 = vpop.permute.xlu2 %3265  ;;  %v2124_v3 = vsel %vm973_vm2, %v4822_v27, %v3007_v48 }
 0x39e   :  { %v3216_v47 = vpop.permute.xlu1 %3215 }
 0x39f   :  { %v3218_v33 = vunpack.i.h.bf16 %v3216_v47  ;;  %v3217_v41 = vunpack.i.l.bf16 %v3216_v47  ;;  %v3211_v59 = vpop.permute.xlu0 %3210 }
 0x3a0   :  { %v3213_v7 = vunpack.i.h.bf16 %v3211_v59  ;;  %v3212_v39 = vunpack.i.l.bf16 %v3211_v59  ;;  %v3268_v59 = vunpack.i.h.bf16 %v3266_v30 }
 0x3a2   :  { %v2204_v4 = vsel %vm2191_vm1, %v2187_v63, %v3212_v39  ;;  %v2205_v42 = vsel %vm2191_vm1, %v2188_v53, %v3213_v7  ;;  %v3267_v7 = vunpack.i.l.bf16 %v3266_v30 }
 0x3a3   :  { %v2221_v51 = vsel %vm2208_vm3, %v2204_v4, %v3217_v41  ;;  %v2222_v52 = vsel %vm2208_vm3, %v2205_v42, %v3218_v33 }
 0x3a4   :  { %v2238_v22 = vsel %vm2225_vm4, %v2221_v51, %v3222_v32  ;;  %v2239_v55 = vsel %vm2225_vm4, %v2222_v52, %v3223_v21  ;;  %v3281_v42 = vpop.permute.xlu2 %3280 }
 0x3a5   :  { %v2248_v13 = vpack.c.bf16 %v2239_v55, %v2238_v22  ;;  %v3283_v22 = vunpack.i.h.bf16 %v3281_v42  ;;  %v3282_v55 = vunpack.i.l.bf16 %v3281_v42 }
 0x3a6   :  { %v3231_v58 = vpop.permute.xlu1 %3230 }
 0x3a7   :  { %v3226_v29 = vpop.permute.xlu0 %3225  ;;  %2619 = vmatmul.msk.bf16.gmra.mxu2 %vm2290_vm6, %v2248_v13  ;;  %v3233_v15 = vunpack.i.h.bf16 %v3231_v58  ;;  %v3232_v50 = vunpack.i.l.bf16 %v3231_v58 }
 0x3a8   :  { %v3228_v18 = vunpack.i.h.bf16 %v3226_v29  ;;  %v3227_v10 = vunpack.i.l.bf16 %v3226_v29 }
 0x3aa   :  { %v2148_v23 = vsel %vm1041_vm7, %v4855_v56, %v3227_v10  ;;  %v2149_v11 = vsel %vm1041_vm7, %v4858_v26, %v3228_v18 }
 0x3ab   :  { %v2164_v5 = vsel %vm1075_vm9, %v2148_v23, %v3232_v50  ;;  %v2165_v38 = vsel %vm1075_vm9, %v2149_v11, %v3233_v15 }
 0x3ac   :  { %v2181_v43 = vsel %vm2174_vm0, %v2164_v5, %v3237_v57  ;;  %v2182_v56 = vsel %vm2174_vm0, %v2165_v38, %v3238_v28 }
 0x3ae   :  { %v3246_v2 = vpop.permute.xlu1 %3245 }
 0x3af   :  { %v3248_v35 = vunpack.i.h.bf16 %v3246_v2  ;;  %v3247_v1 = vunpack.i.l.bf16 %v3246_v2  ;;  %v3241_v17 = vpop.permute.xlu0 %3240 }
 0x3b0   :  { %v3243_v24 = vunpack.i.h.bf16 %v3241_v17  ;;  %v3242_v6 = vunpack.i.l.bf16 %v3241_v17 }
 0x3b2   :  { %v2198_v26 = vsel %vm2191_vm1, %v2181_v43, %v3242_v6  ;;  %v2199_v40 = vsel %vm2191_vm1, %v2182_v56, %v3243_v24 }
 0x3b3   :  { %v2215_v37 = vsel %vm2208_vm3, %v2198_v26, %v3247_v1  ;;  %v2216_v46 = vsel %vm2208_vm3, %v2199_v40, %v3248_v35 }
 0x3b4   :  { %v2232_v54 = vsel %vm2225_vm4, %v2215_v37, %v3252_v16  ;;  %v2233_v60 = vsel %vm2225_vm4, %v2216_v46, %v3253_v44 }
 0x3b5   :  { %v2245_v0 = vpack.c.bf16 %v2233_v60, %v2232_v54 }
 0x3b6   :  { %v3261_v36 = vpop.permute.xlu1 %3260 }
 0x3b7   :  { %v3256_v45 = vpop.permute.xlu0 %3255  ;;  %2616 = vmatmul.msk.bf16.gmra.mxu1 %vm2290_vm6, %v2245_v0  ;;  %v3263_v62 = vunpack.i.h.bf16 %v3261_v36  ;;  %v3262_v9 = vunpack.i.l.bf16 %v3261_v36 }
 0x3b8   :  { %v3258_v49 = vunpack.i.h.bf16 %v3256_v45  ;;  %v3257_v61 = vunpack.i.l.bf16 %v3256_v45 }
 0x3ba   :  { %v2141_v47 = vsel %vm1007_vm5, %v2125_v34, %v3258_v49  ;;  %v2140_v25 = vsel %vm1007_vm5, %v2124_v3, %v3257_v61 }
 0x3bb   :  { %v2157_v31 = vsel %vm1041_vm7, %v2141_v47, %v3263_v62  ;;  %v2156_v14 = vsel %vm1041_vm7, %v2140_v25, %v3262_v9 }
 0x3bc   :  { %v2172_v27 = vsel %vm1075_vm9, %v2156_v14, %v3267_v7  ;;  %v2173_v21 = vsel %vm1075_vm9, %v2157_v31, %v3268_v59 }
 0x3be   :  { %v3276_v33 = vpop.permute.xlu1 %3275 }
 0x3bf   :  { %v3271_v41 = vpop.permute.xlu0 %3270  ;;  %v3278_v20 = vunpack.i.h.bf16 %v3276_v33  ;;  %v3277_v53 = vunpack.i.l.bf16 %v3276_v33 }
 0x3c0   :  { %v3273_v39 = vunpack.i.h.bf16 %v3271_v41  ;;  %v3272_v63 = vunpack.i.l.bf16 %v3271_v41 }
 0x3c2   :  { %v2189_v32 = vsel %vm2174_vm0, %v2172_v27, %v3272_v63  ;;  %v2190_v4 = vsel %vm2174_vm0, %v2173_v21, %v3273_v39 }
 0x3c3   :  { %v2206_v51 = vsel %vm2191_vm1, %v2189_v32, %v3277_v53  ;;  %v2207_v52 = vsel %vm2191_vm1, %v2190_v4, %v3278_v20 }
 0x3c4   :  { %v2223_v29 = vsel %vm2208_vm3, %v2206_v51, %v3282_v55  ;;  %v2224_v18 = vsel %vm2208_vm3, %v2207_v52, %v3283_v22 }
 0x3c7   :  { %v3286_v8 = vpop.permute.xlu0 %3285 }
 0x3c8   :  { %v3288_v13 = vunpack.i.h.bf16 %v3286_v8  ;;  %v3287_v58 = vunpack.i.l.bf16 %v3286_v8 }
 0x3ca   :  { %v2240_v10 = vsel %vm2225_vm4, %v2223_v29, %v3287_v58  ;;  %v2241_v15 = vsel %vm2225_vm4, %v2224_v18, %v3288_v13 }
 0x3cb   :  { %v2249_v50 = vpack.c.bf16 %v2241_v15, %v2240_v10 }
 0x3cd   :  { %2620 = vmatmul.msk.bf16.gmra.mxu2 %vm2290_vm6, %v2249_v50 }
 0x3d4   :  { %v2328_v23 = vpop.f32.mrf.mxu1 }
 0x3d5   :  { %v5107_v1 = vadd.f32 %v5101_v12, %v2328_v23 }
 0x3d7   :  { %v2406_v44 = vmul.f32 %v5107_v1, %v5107_v1  ;;  %v2368_v37 = vsel %vm973_vm2, %v5107_v1, 0.0 }
 0x3d9   :  { %v2422_v36 = vsel %vm973_vm2, %v2406_v44, 0.0 }
 0x3dc   :  { %v2330_v11 = vpop.f32.mrf.mxu1 }
 0x3dd   :  { %v5104_v35 = vadd.f32 %v5101_v12, %v2330_v11 }
 0x3df   :  { %v2407_v43 = vmul.f32 %v5104_v35, %v5104_v35  ;;  %v2369_v16 = vsel %vm973_vm2, %v5104_v35, 0.0 }
 0x3e0   :  { %v2370_v19 = vadd.f32 %v2369_v16, %v2368_v37 }
 0x3e1   :  { %v2423_v46 = vsel %vm973_vm2, %v2407_v43, 0.0 }
 0x3e2   :  { %v2424_v34 = vadd.f32 %v2423_v46, %v2422_v36 }
 0x3ea   :  { %v2348_v38 = vpop.f32.mrf.mxu2 }
 0x3eb   :  { %v5159_v32 = vadd.f32 %v5101_v12, %v2348_v38 }
 0x3ed   :  { %v2414_v29 = vmul.f32 %v5159_v32, %v5159_v32  ;;  %v2383_v50 = vsel %vm973_vm2, %v5159_v32, 0.0 }
 0x3ef   :  { %v2437_v11 = vsel %vm973_vm2, %v2414_v29, 0.0 }
 0x3f2   :  { %v2350_v57 = vpop.f32.mrf.mxu2 }
 0x3f3   :  { %v5172_v18 = vadd.f32 %v5101_v12, %v2350_v57 }
 0x3f4   :  { %v2333_v5 = vpop.f32.mrf.mxu1 }
 0x3f5   :  { %v5110_v6 = vadd.f32 %v5101_v12, %v2333_v5  ;;  %v2415_v5 = vmul.f32 %v5172_v18, %v5172_v18 }
 0x3f7   :  { %v2408_v26 = vmul.f32 %v5110_v6, %v5110_v6  ;;  %v2371_v54 = vsel %vm973_vm2, %v5110_v6, 0.0  ;;  %v2439_v43 = vsel %vm973_vm2, %v2415_v5, 0.0 }
 0x3f8   :  { %v2372_v3 = vadd.f32 %v2371_v54, %v2370_v19 }
 0x3f9   :  { %v2425_v45 = vsel %vm973_vm2, %v2408_v26, 0.0 }
 0x3fa   :  { %v2426_v31 = vadd.f32 %v2425_v45, %v2424_v34 }
 0x3fc   :  { %v2335_v2 = vpop.f32.mrf.mxu1 }
 0x3fd   :  { %v5115_v56 = vadd.f32 %v5101_v12, %v2335_v2 }
 0x3ff   :  { %v2409_v60 = vmul.f32 %v5115_v56, %v5115_v56  ;;  %v2373_v49 = vsel %vm973_vm2, %v5115_v56, 0.0 }
 0x400   :  { %v2374_v14 = vadd.f32 %v2373_v49, %v2372_v3 }
 0x401   :  { %v2427_v9 = vsel %vm973_vm2, %v2409_v60, 0.0 }
 0x402   :  { %v2428_v7 = vadd.f32 %v2427_v9, %v2426_v31 }
 0x40a   :  { %v2353_v17 = vpop.f32.mrf.mxu2 }
 0x40b   :  { %v5181_v38 = vadd.f32 %v5101_v12, %v2353_v17 }
 0x40d   :  { %v2416_v44 = vmul.f32 %v5181_v38, %v5181_v38  ;;  %v2387_v37 = vsel %vm973_vm2, %v5181_v38, 0.0 }
 0x40f   :  { %v2441_v46 = vsel %vm973_vm2, %v2416_v44, 0.0 }
 0x412   :  { %v2355_v62 = vpop.f32.mrf.mxu2 }
 0x413   :  { %v5189_v16 = vadd.f32 %v5101_v12, %v2355_v62 }
 0x414   :  { %v2338_v28 = vpop.f32.mrf.mxu1 }
 0x415   :  { %v5124_v40 = vadd.f32 %v5101_v12, %v2338_v28  ;;  %v2385_v28 = vsel %vm973_vm2, %v5172_v18, 0.0  ;;  %v2417_v54 = vmul.f32 %v5189_v16, %v5189_v16  ;;  %v2389_v19 = vsel %vm973_vm2, %v5189_v16, 0.0 }
 0x417   :  { %v2410_v61 = vmul.f32 %v5124_v40, %v5124_v40  ;;  %v2375_v47 = vsel %vm973_vm2, %v5124_v40, 0.0  ;;  %v2443_v49 = vsel %vm973_vm2, %v2417_v54, 0.0 }
 0x418   :  { %v2376_v39 = vadd.f32 %v2375_v47, %v2374_v14 }
 0x419   :  { %v2429_v33 = vsel %vm973_vm2, %v2410_v61, 0.0 }
 0x41a   :  { %v2430_v53 = vadd.f32 %v2429_v33, %v2428_v7 }
 0x41c   :  { %v2340_v24 = vpop.f32.mrf.mxu1 }
 0x41d   :  { %v5134_v0 = vadd.f32 %v5101_v12, %v2340_v24 }
 0x41f   :  { %v2411_v25 = vmul.f32 %v5134_v0, %v5134_v0  ;;  %v2377_v41 = vsel %vm973_vm2, %v5134_v0, 0.0 }
 0x420   :  { %v2378_v27 = vadd.f32 %v2377_v41, %v2376_v39 }
 0x421   :  { %v2431_v63 = vsel %vm973_vm2, %v2411_v25, 0.0 }
 0x422   :  { %v2432_v51 = vadd.f32 %v2431_v63, %v2430_v53 }
 0x42a   :  { %v2358_v52 = vpop.f32.mrf.mxu2 }
 0x42b   :  { %v5197_v60 = vadd.f32 %v5101_v12, %v2358_v52 }
 0x42d   :  { %v2418_v61 = vmul.f32 %v5197_v60, %v5197_v60  ;;  %v2391_v9 = vsel %vm973_vm2, %v5197_v60, 0.0 }
 0x42f   :  { %v2445_v25 = vsel %vm973_vm2, %v2418_v61, 0.0 }
 0x432   :  { %v2360_v57 = vpop.f32.mrf.mxu2 }
 0x433   :  { %v5205_v34 = vadd.f32 %v5101_v12, %v2360_v57 }
 0x434   :  { %v2343_v48 = vpop.f32.mrf.mxu1 }
 0x435   :  { %v5143_v30 = vadd.f32 %v5101_v12, %v2343_v48  ;;  %v2419_v31 = vmul.f32 %v5205_v34, %v5205_v34  ;;  %v2393_v41 = vsel %vm973_vm2, %v5205_v34, 0.0 }
 0x437   :  { %v2412_v59 = vmul.f32 %v5143_v30, %v5143_v30  ;;  %v2379_v20 = vsel %vm973_vm2, %v5143_v30, 0.0  ;;  %v2447_v63 = vsel %vm973_vm2, %v2419_v31, 0.0 }
 0x438   :  { %v2380_v22 = vadd.f32 %v2379_v20, %v2378_v27 }
 0x439   :  { %v2433_v4 = vsel %vm973_vm2, %v2412_v59, 0.0 }
 0x43a   :  { %v2434_v13 = vadd.f32 %v2433_v4, %v2432_v51 }
 0x43c   :  { %v2345_v21 = vpop.f32.mrf.mxu1 }
 0x43d   :  { %v5163_v42 = vadd.f32 %v5101_v12, %v2345_v21 }
 0x43f   :  { %v2381_v55 = vsel %vm973_vm2, %v5163_v42, 0.0  ;;  %v2413_v8 = vmul.f32 %v5163_v42, %v5163_v42 }
 0x440   :  { %v2382_v58 = vadd.f32 %v2381_v55, %v2380_v22 }
 0x441   :  { %v2435_v10 = vsel %vm973_vm2, %v2413_v8, 0.0 }
 0x442   :  { %v2436_v15 = vadd.f32 %v2435_v10, %v2434_v13  ;;  %v2384_v23 = vadd.f32 %v2383_v50, %v2382_v58 }
 0x444   :  { %v2438_v2 = vadd.f32 %v2437_v11, %v2436_v15  ;;  %v2386_v24 = vadd.f32 %v2385_v28, %v2384_v23 }
 0x446   :  { %v2440_v26 = vadd.f32 %v2439_v43, %v2438_v2  ;;  %v2388_v17 = vadd.f32 %v2387_v37, %v2386_v24 }
 0x448   :  { %v2442_v36 = vadd.f32 %v2441_v46, %v2440_v26  ;;  %v2390_v45 = vadd.f32 %v2389_v19, %v2388_v17 }
 0x44a   :  { %v2444_v62 = vadd.f32 %v2443_v49, %v2442_v36  ;;  %v2392_v47 = vadd.f32 %v2391_v9, %v2390_v45 }
 0x44c   :  { %v2446_v33 = vadd.f32 %v2445_v25, %v2444_v62  ;;  %v2394_v7 = vadd.f32 %v2393_v41, %v2392_v47 }
 0x44e   :  { %v2448_v21 = vadd.f32 %v2447_v63, %v2446_v33 }
 0x450   :  { %v2363_v48 = vpop.f32.mrf.mxu2 }
 0x451   :  { %v5208_v3 = vadd.f32 %v5101_v12, %v2363_v48 }
 0x453   :  { %v2420_v14 = vmul.f32 %v5208_v3, %v5208_v3  ;;  %v2395_v59 = vsel %vm973_vm2, %v5208_v3, 0.0 }
 0x454   :  { %v2396_v27 = vadd.f32 %v2395_v59, %v2394_v7 }
 0x455   :  { %v2449_v20 = vsel %vm973_vm2, %v2420_v14, 0.0 }
 0x456   :  { %v2450_v52 = vadd.f32 %v2449_v20, %v2448_v21 }
 0x458   :  { %v2365_v39 = vpop.f32.mrf.mxu2 }
 0x459   :  { %v5224_v53 = vadd.f32 %v5101_v12, %v2365_v39 }
 0x45b   :  { %v2397_v4 = vsel %vm973_vm2, %v5224_v53, 0.0  ;;  %v2421_v51 = vmul.f32 %v5224_v53, %v5224_v53 }
 0x45c   :  { %v2398_v22 = vadd.f32 %v2397_v4, %v2396_v27 }
 0x45d   :  { %v2451_v55 = vsel %vm973_vm2, %v2421_v51, 0.0 }
 0x45e   :  { %v2399_v8 = vrot.slane %v2398_v22, 4  ;;  %v2452_v13 = vadd.f32 %v2451_v55, %v2450_v52 }
 0x460   :  { %v2400_v58 = vadd.f32 %v2399_v8, %v2398_v22  ;;  %v2453_v29 = vrot.slane %v2452_v13, 4 }
 0x462   :  { %v2401_v10 = vrot.slane %v2400_v58, 2  ;;  %v2454_v15 = vadd.f32 %v2453_v29, %v2452_v13 }
 0x464   :  { %v2402_v12 = vadd.f32 %v2401_v10, %v2400_v58  ;;  %v2455_v50 = vrot.slane %v2454_v15, 2 }
 0x466   :  { %v2403_v23 = vrot.slane %v2402_v12, 1  ;;  %v2456_v11 = vadd.f32 %v2455_v50, %v2454_v15 }
 0x468   :  { %v2404_v5 = vadd.f32 %v2403_v23, %v2402_v12  ;;  %v2457_v2 = vrot.slane %v2456_v11, 1 }
 0x46a   :  { %v5231_v28 = vmul.f32 0.0078125, %v2404_v5  ;;  %v2458_v57 = vadd.f32 %v2457_v2, %v2456_v11 }
 0x46c   :  { %v2459_v24 = vmul.f32 0.0078125, %v2458_v57  ;;  %v2460_v43 = vmul.f32 %v5231_v28, %v5231_v28  ;;  %v2462_v48 = vsub.f32 %v5107_v1, %v5231_v28  ;;  %v2463_v45 = vsub.f32 %v5104_v35, %v5231_v28  ;;  %v5248_v1 = vld [vmem:[%s5380_s7] ss:$0 sm:$0xff] }
 0x46d   :  { %v2464_v49 = vsub.f32 %v5110_v6, %v5231_v28  ;;  %v2465_v61 = vsub.f32 %v5115_v56, %v5231_v28  ;;  %v2466_v9 = vsub.f32 %v5124_v40, %v5231_v28  ;;  %v2467_v35 = vsub.f32 %v5134_v0, %v5231_v28 }
 0x46e   :  { %v2461_v44 = vsub.f32 %v2459_v24, %v2460_v43  ;;  %v2468_v14 = vsub.f32 %v5143_v30, %v5231_v28  ;;  %v2469_v33 = vsub.f32 %v5163_v42, %v5231_v28  ;;  %v2470_v40 = vsub.f32 %v5159_v32, %v5231_v28  ;;  %v5266_v30 = vld [vmem:[%s5381_s8] ss:$0 sm:$0xff] }
 0x46f   :  { %v2471_v41 = vsub.f32 %v5172_v18, %v5231_v28  ;;  %v2472_v42 = vsub.f32 %v5181_v38, %v5231_v28  ;;  %v2473_v32 = vsub.f32 %v5189_v16, %v5231_v28  ;;  %v2474_v27 = vsub.f32 %v5197_v60, %v5231_v28 }
 0x470   :  { %v2478_v26 = vadd.f32 1e-05, %v2461_v44  ;;  %v2475_v21 = vsub.f32 %v5205_v34, %v5231_v28  ;;  %v2476_v52 = vsub.f32 %v5208_v3, %v5231_v28  ;;  %v2477_v34 = vsub.f32 %v5224_v53, %v5231_v28 }
 0x472   :  { %3297 = vrsqrt.f32 %v2478_v26  ;;  %vm2485_vm7 = vweird.f32 %v2478_v26 }
 0x478   :  { %v3298_v37 = vpop.eup %3297 }
 0x479   :  { %v2480_v17 = vmul.f32 %v3298_v37, %v2478_v26  ;;  %vm2486_vm5 = vweird.f32 %v3298_v37 }
 0x47a   :  { %vm2487_vm8 = vmor %vm2485_vm7, %vm2486_vm5 }
 0x47b   :  { %v2481_v46 = vmul.f32 %v3298_v37, %v2480_v17 }
 0x47d   :  { %v2482_v54 = vmul.f32 0.5, %v2481_v46 }
 0x47f   :  { %v2483_v36 = vsub.f32 1.5, %v2482_v54 }
 0x481   :  { %v2484_v19 = vmul.f32 %v3298_v37, %v2483_v36 }
 0x483   :  { %v2488_v62 = vsel %vm2487_vm8, %v3298_v37, %v2484_v19 }
 0x484   :  { %v2489_v47 = vmul.f32 %v2488_v62, %v2462_v48  ;;  %v2490_v25 = vmul.f32 %v2488_v62, %v2463_v45  ;;  %v2491_v31 = vmul.f32 %v2488_v62, %v2464_v49  ;;  %v2492_v6 = vmul.f32 %v2488_v62, %v2465_v61 }
 0x485   :  { %v2493_v56 = vmul.f32 %v2488_v62, %v2466_v9  ;;  %v2494_v59 = vmul.f32 %v2488_v62, %v2467_v35  ;;  %v2495_v7 = vmul.f32 %v2488_v62, %v2468_v14  ;;  %v2496_v18 = vmul.f32 %v2488_v62, %v2469_v33 }
 0x486   :  { %v2509_v39 = vmul.f32 %v5248_v1, %v2489_v47  ;;  %v2510_v0 = vmul.f32 %v5248_v1, %v2490_v25  ;;  %v2511_v63 = vmul.f32 %v5248_v1, %v2491_v31  ;;  %v2512_v20 = vmul.f32 %v5248_v1, %v2492_v6 }
 0x487   :  { %v2497_v4 = vmul.f32 %v2488_v62, %v2470_v40  ;;  %v2513_v51 = vmul.f32 %v5248_v1, %v2493_v56  ;;  %v2498_v22 = vmul.f32 %v2488_v62, %v2471_v41  ;;  %v2499_v38 = vmul.f32 %v2488_v62, %v2472_v42 }
 0x488   :  { %v2514_v55 = vmul.f32 %v5248_v1, %v2494_v59  ;;  %v2515_v16 = vmul.f32 %v5248_v1, %v2495_v7  ;;  %v2529_v8 = vadd.f32 %v5266_v30, %v2509_v39  ;;  %v2530_v13 = vadd.f32 %v5266_v30, %v2510_v0 }
 0x489   :  { %v2531_v60 = vadd.f32 %v5266_v30, %v2511_v63  ;;  %v2500_v58 = vmul.f32 %v2488_v62, %v2473_v32  ;;  %v2516_v29 = vmul.f32 %v5248_v1, %v2496_v18  ;;  %v2532_v3 = vadd.f32 %v5266_v30, %v2512_v20 }
 0x48a   :  { %v2501_v10 = vmul.f32 %v2488_v62, %v2474_v27  ;;  %v2502_v15 = vmul.f32 %v2488_v62, %v2475_v21  ;;  %v2517_v12 = vmul.f32 %v5248_v1, %v2497_v4  ;;  %v2533_v50 = vadd.f32 %v5266_v30, %v2513_v51 }
 0x48b   :  { %v2503_v23 = vmul.f32 %v2488_v62, %v2476_v52  ;;  %v2518_v11 = vmul.f32 %v5248_v1, %v2498_v22  ;;  %v2519_v5 = vmul.f32 %v5248_v1, %v2499_v38  ;;  %v2534_v2 = vadd.f32 %v5266_v30, %v2514_v55 }
 0x48c   :  { %v2535_v53 = vadd.f32 %v5266_v30, %v2515_v16  ;;  %v2545_v28 = vmax.f32 %v2529_v8, 0.0  ;;  %v2546_v57 = vmax.f32 %v2530_v13, 0.0  ;;  %v2547_v24 = vmax.f32 %v2531_v60, 0.0 }
 0x48d   :  { %v2504_v43 = vmul.f32 %v2488_v62, %v2477_v34  ;;  %v2520_v44 = vmul.f32 %v5248_v1, %v2500_v58  ;;  %v2536_v26 = vadd.f32 %v5266_v30, %v2516_v29  ;;  %v2548_v37 = vmax.f32 %v2532_v3, 0.0 }
 0x48e   :  { %v2521_v17 = vmul.f32 %v5248_v1, %v2501_v10  ;;  %v2537_v46 = vadd.f32 %v5266_v30, %v2517_v12  ;;  %v2549_v54 = vmax.f32 %v2533_v50, 0.0  ;;  %2561 = vst.msk [vmem:[%s5382_s9] sm:$0xff] %vm973_vm2, %v2545_v28  ;;  %v2522_v36 = vmul.f32 %v5248_v1, %v2502_v15 }
 0x48f   :  { %v2538_v19 = vadd.f32 %v5266_v30, %v2518_v11  ;;  %v2550_v48 = vmax.f32 %v2534_v2, 0.0  ;;  %2562 = vst.msk [vmem:[%s5382_s9 + $0x8] sm:$0xff] %vm973_vm2, %v2546_v57  ;;  %v2523_v45 = vmul.f32 %v5248_v1, %v2503_v23  ;;  %v2539_v49 = vadd.f32 %v5266_v30, %v2519_v5 }
 0x490   :  { %v2551_v61 = vmax.f32 %v2535_v53, 0.0  ;;  %2563 = vst.msk [vmem:[%s5382_s9 + $0x10] sm:$0xff] %vm973_vm2, %v2547_v24  ;;  %v2524_v62 = vmul.f32 %v5248_v1, %v2504_v43  ;;  %v2540_v9 = vadd.f32 %v5266_v30, %v2520_v44  ;;  %v2552_v47 = vmax.f32 %v2536_v26, 0.0 }
 0x491   :  { %2564 = vst.msk [vmem:[%s5382_s9 + $0x18] sm:$0xff] %vm973_vm2, %v2548_v37  ;;  %v2541_v25 = vadd.f32 %v5266_v30, %v2521_v17  ;;  %v2553_v31 = vmax.f32 %v2537_v46, 0.0  ;;  %v2542_v35 = vadd.f32 %v5266_v30, %v2522_v36  ;;  %v2554_v6 = vmax.f32 %v2538_v19, 0.0 }
 0x492   :  { %2565 = vst.msk [vmem:[%s5382_s9 + $0x20] sm:$0xff] %vm973_vm2, %v2549_v54  ;;  %v2543_v1 = vadd.f32 %v5266_v30, %v2523_v45  ;;  %v2555_v14 = vmax.f32 %v2539_v49, 0.0  ;;  %v2544_v56 = vadd.f32 %v5266_v30, %v2524_v62  ;;  %v2556_v33 = vmax.f32 %v2540_v9, 0.0 }
 0x493   :  { %2566 = vst.msk [vmem:[%s5382_s9 + $0x28] sm:$0xff] %vm973_vm2, %v2550_v48  ;;  %v2557_v40 = vmax.f32 %v2541_v25, 0.0  ;;  %v2558_v41 = vmax.f32 %v2542_v35, 0.0 }
 0x494   :  { %2567 = vst.msk [vmem:[%s5382_s9 + $0x30] sm:$0xff] %vm973_vm2, %v2551_v61  ;;  %v2559_v59 = vmax.f32 %v2543_v1, 0.0  ;;  %v2560_v7 = vmax.f32 %v2544_v56, 0.0 }
 0x495   :  { %2568 = vst.msk [vmem:[%s5382_s9 + $0x38] sm:$0xff] %vm973_vm2, %v2552_v47 }
 0x496   :  { %2569 = vst.msk [vmem:[%s5382_s9 + $0x40] sm:$0xff] %vm973_vm2, %v2553_v31 }
 0x497   :  { %2570 = vst.msk [vmem:[%s5382_s9 + $0x48] sm:$0xff] %vm973_vm2, %v2554_v6 }
 0x498   :  { %2571 = vst.msk [vmem:[%s5382_s9 + $0x50] sm:$0xff] %vm973_vm2, %v2555_v14 }
 0x499   :  { %2572 = vst.msk [vmem:[%s5382_s9 + $0x58] sm:$0xff] %vm973_vm2, %v2556_v33 }
 0x49a   :  { %2573 = vst.msk [vmem:[%s5382_s9 + $0x60] sm:$0xff] %vm973_vm2, %v2557_v40 }
 0x49b   :  { %2574 = vst.msk [vmem:[%s5382_s9 + $0x68] sm:$0xff] %vm973_vm2, %v2558_v41 }
 0x49c   :  { %2575 = vst.msk [vmem:[%s5382_s9 + $0x70] sm:$0xff] %vm973_vm2, %v2559_v59 }
 0x49d   :  { %2576 = vst.msk [vmem:[%s5382_s9 + $0x78] sm:$0xff] %vm973_vm2, %v2560_v7 }

</bundles_post_ra>
